<compile_context>
chip_gen: v7x
topology: tpu7x:2x2x1
jax: 0.10.0
libtpu: 0.0.40
codegen_flags: <defaults>
</compile_context>

<pallas_src>
import functools

import jax
import jax.numpy as jnp
from jax.experimental import pallas as pl
from jax.experimental.pallas import tpu as pltpu


# ---------------------------------------------------------------------------
# Model / tiling constants
# ---------------------------------------------------------------------------
C_IN, C_FEAT, N_ANCHORS = 3, 32, 4
K_IM2COL = 9 * C_IN          # 27 raw im2col columns
K_PAD = 32                   # padded K for the backbone matmul
HEAD_N = 128                 # lane-dense head width (obj in [:A], box in [A:5A])
TM_MAX = 2048                # row-tile cap (review: 1024-4096; 2048 keeps the
                             # worst-case elementwise intermediates comfortably
                             # under v7x's 32 MiB default scoped VMEM)


def _round_up(x, m):
    return ((x + m - 1) // m) * m


def _pick_tm(m_half):
    """Row tile sized to the real problem, multiple of 8, capped at TM_MAX."""
    return max(8, min(TM_MAX, _round_up(m_half, 8)))


# ---------------------------------------------------------------------------
# Fused kernel: backbone matmul + ReLU + heads for pred AND pseudo-GT rows,
# plus BCE / SmoothL1 / F1 partial reductions — no head slab ever hits HBM.
# ---------------------------------------------------------------------------
def _head(patch_ref, wb_ref, bb_ref, wh_ref, bh_ref):
    # backbone "conv": (TM, K) @ (K, C_FEAT) on MXU, bf16 operands, f32 acc
    feat = jnp.dot(patch_ref[...], wb_ref[...],
                   preferred_element_type=jnp.float32)
    feat = jnp.maximum(feat + bb_ref[...], 0.0)            # bias + ReLU
    # fused 1x1 heads: (TM, C_FEAT) @ (C_FEAT, 128) -> lane-dense slab
    head = jnp.dot(feat.astype(jnp.bfloat16), wh_ref[...],
                   preferred_element_type=jnp.float32)
    return head + bh_ref[...]


def _fused_detector_loss_kernel(pred_ref, gt_ref, wb_ref, bb_ref, wh_ref,
                                bh_ref, part_ref, *, m_half, tm):
    i = pl.program_id(0)
    A = N_ANCHORS

    pred = _head(pred_ref, wb_ref, bb_ref, wh_ref, bh_ref)   # (tm, 128) f32
    gt = _head(gt_ref, wb_ref, bb_ref, wh_ref, bh_ref)       # (tm, 128) f32

    lane = jax.lax.broadcasted_iota(jnp.int32, (tm, HEAD_N), 1)
    row = jax.lax.broadcasted_iota(jnp.int32, (tm, HEAD_N), 0)
    row_valid = (i * tm + row) < m_half                      # mask padded tail rows
    obj_mask = jnp.where(row_valid & (lane < A), 1.0, 0.0)
    # Padded rows give bit-identical pred/gt heads (zero patches through the
    # same weights) -> d == 0 exactly, so SmoothL1 needs only the lane mask.
    box_mask = jnp.where((lane >= A) & (lane < 5 * A), 1.0, 0.0)

    # ---- BCE-with-logits on objectness vs hard pseudo-labels (stable form) ----
    x = pred
    labels = (gt > 0.0).astype(jnp.float32)
    bce = (jnp.maximum(x, 0.0) - x * labels
           + jnp.log1p(jnp.exp(-jnp.abs(x)))) * obj_mask

    # ---- SmoothL1 on box deltas ----
    d = pred - gt
    ad = jnp.abs(d)
    sl1 = jnp.where(ad < 1.0, 0.5 * d * d, ad - 0.5) * box_mask

    # ---- anchor-level objectness F1 counts (predictions vs pseudo-GT) ----
    pred_pos = jnp.where(x > 0.0, 1.0, 0.0)
    tp = pred_pos * labels * obj_mask
    fp = pred_pos * (1.0 - labels) * obj_mask
    fn = (1.0 - pred_pos) * labels * obj_mask

    # Per-tile, per-lane partial sums packed into one (1, 8, 128) slab:
    # rows 0..4 = [bce, sl1, tp, fp, fn], rows 5..7 = 0.  Full-vreg store.
    part = jnp.concatenate(
        [jnp.sum(t, axis=0, keepdims=True) for t in (bce, sl1, tp, fp, fn)]
        + [jnp.zeros((3, HEAD_N), jnp.float32)], axis=0)
    part_ref[...] = part.reshape(1, 8, HEAD_N)


# ---------------------------------------------------------------------------
# JAX glue: im2col + padding (kept outside the kernel for these small shapes)
# ---------------------------------------------------------------------------
def _im2col_3x3(x_nhwc):
    n, h, w, c = x_nhwc.shape
    xp = jnp.pad(x_nhwc, ((0, 0), (1, 1), (1, 1), (0, 0)))
    patches = [xp[:, dy:dy + h, dx:dx + w, :] for dy in range(3) for dx in range(3)]
    return jnp.concatenate(patches, axis=-1).reshape(n * h * w, 9 * c)


def _patches_padded(x_nchw, mpad):
    x = jnp.transpose(x_nchw, (0, 2, 3, 1)).astype(jnp.bfloat16)   # NCHW -> NHWC
    p = _im2col_3x3(x)                                             # (M, 27) bf16
    return jnp.pad(p, ((0, mpad - p.shape[0]), (0, K_PAD - K_IM2COL)))


# ---------------------------------------------------------------------------
# Synthetic detector parameters (Faster R-CNN stand-in)
# ---------------------------------------------------------------------------
def make_params():
    k = jax.random.PRNGKey(42)
    k1, k2, k3 = jax.random.split(k, 3)
    wb = jnp.zeros((K_PAD, C_FEAT), jnp.float32)
    wb = wb.at[:K_IM2COL].set(
        0.1 * jax.random.normal(k1, (K_IM2COL, C_FEAT), jnp.float32))
    w_obj = 0.1 * jax.random.normal(k2, (C_FEAT, N_ANCHORS), jnp.float32)
    w_box = 0.1 * jax.random.normal(k3, (C_FEAT, 4 * N_ANCHORS), jnp.float32)
    w_head = jnp.zeros((C_FEAT, HEAD_N), jnp.float32)
    w_head = w_head.at[:, :N_ANCHORS].set(w_obj)
    w_head = w_head.at[:, N_ANCHORS:5 * N_ANCHORS].set(w_box)
    return {
        "w_backbone": wb.astype(jnp.bfloat16),
        "b_backbone": jnp.zeros((1, C_FEAT), jnp.float32),
        "w_head": w_head.astype(jnp.bfloat16),
        "b_head": jnp.zeros((1, HEAD_N), jnp.float32),
    }


# ---------------------------------------------------------------------------
# FasterRCNNLoss.forward equivalent
# ---------------------------------------------------------------------------
def faster_rcnn_loss(outputs, imgs, params):
    b, _, h, w = imgs.shape
    m_half = b * h * w                       # rows per half of cat([outputs, imgs])
    tm = _pick_tm(m_half)
    mpad = _round_up(m_half, tm)
    num_tiles = mpad // tm

    # im2col of cat([outputs, imgs]) == [im2col(outputs); im2col(imgs)] — pass
    # the two halves as separate inputs sharing the same row-tile index map.
    pred_patches = _patches_padded(outputs, mpad)   # predictions ("results"/"train")
    gt_patches = _patches_padded(imgs, mpad)        # pseudo-GT (scores dropped)

    kernel = functools.partial(_fused_detector_loss_kernel,
                               m_half=m_half, tm=tm)
    parts = pl.pallas_call(
        kernel,
        out_shape=jax.ShapeDtypeStruct((num_tiles, 8, HEAD_N), jnp.float32),
        grid=(num_tiles,),
        in_specs=[
            pl.BlockSpec((tm, K_PAD), lambda i: (i, 0)),          # pred row tile
            pl.BlockSpec((tm, K_PAD), lambda i: (i, 0)),          # GT row tile
            pl.BlockSpec((K_PAD, C_FEAT), lambda i: (0, 0)),      # VMEM-resident
            pl.BlockSpec((1, C_FEAT), lambda i: (0, 0)),
            pl.BlockSpec((C_FEAT, HEAD_N), lambda i: (0, 0)),
            pl.BlockSpec((1, HEAD_N), lambda i: (0, 0)),
        ],
        out_specs=pl.BlockSpec((1, 8, HEAD_N), lambda i: (i, 0, 0)),
        compiler_params=pltpu.CompilerParams(
            dimension_semantics=("parallel",)),    # row tiles -> both TCs on v7x
    )(pred_patches, gt_patches, params["w_backbone"], params["b_backbone"],
      params["w_head"], params["b_head"])

    # Tiny final combine in JAX (num_tiles x 8 x 128 floats).
    sums = jnp.sum(parts, axis=(0, 2))                           # (8,)
    n_obj = float(m_half * N_ANCHORS)
    n_box = float(m_half * 4 * N_ANCHORS)
    loss = sums[0] / n_obj + sums[1] / n_box                     # sum(loss_dict)
    tp, fp, fn = sums[2], sums[3], sums[4]
    accuracy = 2.0 * tp / (2.0 * tp + fp + fn + 1e-8)            # anchor-level F1
    return loss, accuracy


if __name__ == "__main__":
    key = jax.random.PRNGKey(0)
    k_out, k_img = jax.random.split(key)
    B, C, H, W = 2, 3, 16, 16
    outputs = jax.random.uniform(k_out, (B, C, H, W), jnp.float32)  # generated imgs
    imgs = jax.random.uniform(k_img, (B, C, H, W), jnp.float32)     # real imgs

    params = make_params()
    loss, acc = jax.jit(faster_rcnn_loss)(outputs, imgs, params)
    jax.block_until_ready((loss, acc))
    assert loss.shape == () and acc.shape == ()
    print("KERNEL_OK")
</pallas_src>

<mosaic_0001>
module attributes {stable_mosaic.version = 11 : i64} {
  func.func @_fused_detector_loss_kernel(%arg0: i32, %arg1: memref<512x32xbf16, #tpu.memory_space<vmem>>, %arg2: memref<512x32xbf16, #tpu.memory_space<vmem>>, %arg3: memref<32x32xbf16, #tpu.memory_space<vmem>>, %arg4: memref<1x32xf32, #tpu.memory_space<vmem>>, %arg5: memref<32x128xbf16, #tpu.memory_space<vmem>>, %arg6: memref<1x128xf32, #tpu.memory_space<vmem>>, %arg7: memref<1x8x128xf32, #tpu.memory_space<vmem>>) attributes {dimension_semantics = [#tpu.dimension_semantics<parallel>], iteration_bounds = array<i64: 1>, scalar_prefetch = 0 : i64, scratch_operands = 0 : i64, tpu.core_type = #tpu.core_type<tc>, window_params = [{transform_indices = @transform_0, window_bounds = array<i64: 512, 32>}, {transform_indices = @transform_1, window_bounds = array<i64: 512, 32>}, {pipeline_mode = #tpu.pipeline_mode<synchronous>, transform_indices = @transform_2, window_bounds = array<i64: 32, 32>}, {pipeline_mode = #tpu.pipeline_mode<synchronous>, transform_indices = @transform_3, window_bounds = array<i64: 1, 32>}, {pipeline_mode = #tpu.pipeline_mode<synchronous>, transform_indices = @transform_4, window_bounds = array<i64: 32, 128>}, {pipeline_mode = #tpu.pipeline_mode<synchronous>, transform_indices = @transform_5, window_bounds = array<i64: 1, 128>}, {transform_indices = @transform_6, window_bounds = array<i64: 1, 8, 128>}]} {
    %c0 = arith.constant 0 : index
    %c0_0 = arith.constant 0 : index
    %0 = vector.load %arg1[%c0, %c0_0] : memref<512x32xbf16, #tpu.memory_space<vmem>>, vector<512x32xbf16>
    %c0_1 = arith.constant 0 : index
    %c0_2 = arith.constant 0 : index
    %1 = vector.load %arg3[%c0_1, %c0_2] : memref<32x32xbf16, #tpu.memory_space<vmem>>, vector<32x32xbf16>
    %cst = arith.constant dense<0.000000e+00> : vector<512x32xf32>
    %2 = tpu.matmul %0, %1, %cst {dimension_numbers = #tpu.dot_dimension_numbers<[1], [0], [0], [1], [0, 0, 1, 1], [], []>} : vector<512x32xbf16>, vector<32x32xbf16>, vector<512x32xf32> -> vector<512x32xf32>
    %c0_3 = arith.constant 0 : index
    %c0_4 = arith.constant 0 : index
    %3 = vector.load %arg4[%c0_3, %c0_4] : memref<1x32xf32, #tpu.memory_space<vmem>>, vector<1x32xf32>
    %4 = vector.broadcast %3 : vector<1x32xf32> to vector<512x32xf32>
    %5 = arith.addf %2, %4 : vector<512x32xf32>
    %cst_5 = arith.constant 0.000000e+00 : f32
    %6 = vector.broadcast %cst_5 : f32 to vector<512x32xf32>
    %7 = arith.maximumf %5, %6 : vector<512x32xf32>
    %8 = arith.truncf %7 : vector<512x32xf32> to vector<512x32xbf16>
    %c0_6 = arith.constant 0 : index
    %c0_7 = arith.constant 0 : index
    %9 = vector.load %arg5[%c0_6, %c0_7] : memref<32x128xbf16, #tpu.memory_space<vmem>>, vector<32x128xbf16>
    %cst_8 = arith.constant dense<0.000000e+00> : vector<512x128xf32>
    %10 = tpu.matmul %8, %9, %cst_8 {dimension_numbers = #tpu.dot_dimension_numbers<[1], [0], [0], [1], [0, 0, 1, 1], [], []>} : vector<512x32xbf16>, vector<32x128xbf16>, vector<512x128xf32> -> vector<512x128xf32>
    %c0_9 = arith.constant 0 : index
    %c0_10 = arith.constant 0 : index
    %11 = vector.load %arg6[%c0_9, %c0_10] : memref<1x128xf32, #tpu.memory_space<vmem>>, vector<1x128xf32>
    %12 = vector.broadcast %11 : vector<1x128xf32> to vector<512x128xf32>
    %13 = arith.addf %10, %12 : vector<512x128xf32>
    %c0_11 = arith.constant 0 : index
    %c0_12 = arith.constant 0 : index
    %14 = vector.load %arg2[%c0_11, %c0_12] : memref<512x32xbf16, #tpu.memory_space<vmem>>, vector<512x32xbf16>
    %c0_13 = arith.constant 0 : index
    %c0_14 = arith.constant 0 : index
    %15 = vector.load %arg3[%c0_13, %c0_14] : memref<32x32xbf16, #tpu.memory_space<vmem>>, vector<32x32xbf16>
    %cst_15 = arith.constant dense<0.000000e+00> : vector<512x32xf32>
    %16 = tpu.matmul %14, %15, %cst_15 {dimension_numbers = #tpu.dot_dimension_numbers<[1], [0], [0], [1], [0, 0, 1, 1], [], []>} : vector<512x32xbf16>, vector<32x32xbf16>, vector<512x32xf32> -> vector<512x32xf32>
    %c0_16 = arith.constant 0 : index
    %c0_17 = arith.constant 0 : index
    %17 = vector.load %arg4[%c0_16, %c0_17] : memref<1x32xf32, #tpu.memory_space<vmem>>, vector<1x32xf32>
    %18 = vector.broadcast %17 : vector<1x32xf32> to vector<512x32xf32>
    %19 = arith.addf %16, %18 : vector<512x32xf32>
    %cst_18 = arith.constant 0.000000e+00 : f32
    %20 = vector.broadcast %cst_18 : f32 to vector<512x32xf32>
    %21 = arith.maximumf %19, %20 : vector<512x32xf32>
    %22 = arith.truncf %21 : vector<512x32xf32> to vector<512x32xbf16>
    %c0_19 = arith.constant 0 : index
    %c0_20 = arith.constant 0 : index
    %23 = vector.load %arg5[%c0_19, %c0_20] : memref<32x128xbf16, #tpu.memory_space<vmem>>, vector<32x128xbf16>
    %cst_21 = arith.constant dense<0.000000e+00> : vector<512x128xf32>
    %24 = tpu.matmul %22, %23, %cst_21 {dimension_numbers = #tpu.dot_dimension_numbers<[1], [0], [0], [1], [0, 0, 1, 1], [], []>} : vector<512x32xbf16>, vector<32x128xbf16>, vector<512x128xf32> -> vector<512x128xf32>
    %c0_22 = arith.constant 0 : index
    %c0_23 = arith.constant 0 : index
    %25 = vector.load %arg6[%c0_22, %c0_23] : memref<1x128xf32, #tpu.memory_space<vmem>>, vector<1x128xf32>
    %26 = vector.broadcast %25 : vector<1x128xf32> to vector<512x128xf32>
    %27 = arith.addf %24, %26 : vector<512x128xf32>
    %28 = tpu.iota {dimensions = array<i32: 1>} : vector<512x128xi32>
    %29 = tpu.iota {dimensions = array<i32: 0>} : vector<512x128xi32>
    %c512_i32 = arith.constant 512 : i32
    %30 = arith.muli %arg0, %c512_i32 : i32
    %31 = vector.broadcast %30 : i32 to vector<512x128xi32>
    %32 = arith.addi %31, %29 : vector<512x128xi32>
    %c512_i32_24 = arith.constant 512 : i32
    %33 = vector.broadcast %c512_i32_24 : i32 to vector<512x128xi32>
    %34 = arith.cmpi slt, %32, %33 : vector<512x128xi32>
    %c4_i32 = arith.constant 4 : i32
    %35 = vector.broadcast %c4_i32 : i32 to vector<512x128xi32>
    %36 = arith.cmpi slt, %28, %35 : vector<512x128xi32>
    %37 = arith.andi %34, %36 : vector<512x128xi1>
    %cst_25 = arith.constant 1.000000e+00 : f32
    %cst_26 = arith.constant 0.000000e+00 : f32
    %38 = vector.broadcast %cst_25 : f32 to vector<512x128xf32>
    %39 = vector.broadcast %cst_26 : f32 to vector<512x128xf32>
    %40 = arith.select %37, %38, %39 : vector<512x128xi1>, vector<512x128xf32>
    %c4_i32_27 = arith.constant 4 : i32
    %41 = vector.broadcast %c4_i32_27 : i32 to vector<512x128xi32>
    %42 = arith.cmpi sge, %28, %41 : vector<512x128xi32>
    %c20_i32 = arith.constant 20 : i32
    %43 = vector.broadcast %c20_i32 : i32 to vector<512x128xi32>
    %44 = arith.cmpi slt, %28, %43 : vector<512x128xi32>
    %45 = arith.andi %42, %44 : vector<512x128xi1>
    %cst_28 = arith.constant 1.000000e+00 : f32
    %cst_29 = arith.constant 0.000000e+00 : f32
    %46 = vector.broadcast %cst_28 : f32 to vector<512x128xf32>
    %47 = vector.broadcast %cst_29 : f32 to vector<512x128xf32>
    %48 = arith.select %45, %46, %47 : vector<512x128xi1>, vector<512x128xf32>
    %cst_30 = arith.constant 0.000000e+00 : f32
    %49 = vector.broadcast %cst_30 : f32 to vector<512x128xf32>
    %50 = arith.cmpf ogt, %27, %49 : vector<512x128xf32>
    %51 = arith.extui %50 : vector<512x128xi1> to vector<512x128xi32>
    %52 = arith.sitofp %51 : vector<512x128xi32> to vector<512x128xf32>
    %cst_31 = arith.constant 0.000000e+00 : f32
    %53 = vector.broadcast %cst_31 : f32 to vector<512x128xf32>
    %54 = arith.maximumf %13, %53 : vector<512x128xf32>
    %55 = arith.mulf %13, %52 : vector<512x128xf32>
    %56 = arith.subf %54, %55 : vector<512x128xf32>
    %57 = math.absf %13 : vector<512x128xf32>
    %cst_32 = arith.constant 0.000000e+00 : f32
    %58 = vector.broadcast %cst_32 : f32 to vector<512x128xf32>
    %59 = arith.subf %58, %57 : vector<512x128xf32>
    %60 = math.exp %59 : vector<512x128xf32>
    %61 = math.log1p %60 : vector<512x128xf32>
    %62 = arith.addf %56, %61 : vector<512x128xf32>
    %63 = arith.mulf %62, %40 : vector<512x128xf32>
    %64 = arith.subf %13, %27 : vector<512x128xf32>
    %65 = math.absf %64 : vector<512x128xf32>
    %cst_33 = arith.constant 1.000000e+00 : f32
    %66 = vector.broadcast %cst_33 : f32 to vector<512x128xf32>
    %67 = arith.cmpf olt, %65, %66 : vector<512x128xf32>
    %cst_34 = arith.constant 5.000000e-01 : f32
    %68 = vector.broadcast %cst_34 : f32 to vector<512x128xf32>
    %69 = arith.mulf %68, %64 : vector<512x128xf32>
    %70 = arith.mulf %69, %64 : vector<512x128xf32>
    %cst_35 = arith.constant 5.000000e-01 : f32
    %71 = vector.broadcast %cst_35 : f32 to vector<512x128xf32>
    %72 = arith.subf %65, %71 : vector<512x128xf32>
    %73 = arith.select %67, %70, %72 : vector<512x128xi1>, vector<512x128xf32>
    %74 = arith.mulf %73, %48 : vector<512x128xf32>
    %cst_36 = arith.constant 0.000000e+00 : f32
    %75 = vector.broadcast %cst_36 : f32 to vector<512x128xf32>
    %76 = arith.cmpf ogt, %13, %75 : vector<512x128xf32>
    %cst_37 = arith.constant 1.000000e+00 : f32
    %cst_38 = arith.constant 0.000000e+00 : f32
    %77 = vector.broadcast %cst_37 : f32 to vector<512x128xf32>
    %78 = vector.broadcast %cst_38 : f32 to vector<512x128xf32>
    %79 = arith.select %76, %77, %78 : vector<512x128xi1>, vector<512x128xf32>
    %80 = arith.mulf %79, %52 : vector<512x128xf32>
    %81 = arith.mulf %80, %40 : vector<512x128xf32>
    %cst_39 = arith.constant 1.000000e+00 : f32
    %82 = vector.broadcast %cst_39 : f32 to vector<512x128xf32>
    %83 = arith.subf %82, %52 : vector<512x128xf32>
    %84 = arith.mulf %79, %83 : vector<512x128xf32>
    %85 = arith.mulf %84, %40 : vector<512x128xf32>
    %cst_40 = arith.constant 1.000000e+00 : f32
    %86 = vector.broadcast %cst_40 : f32 to vector<512x128xf32>
    %87 = arith.subf %86, %79 : vector<512x128xf32>
    %88 = arith.mulf %87, %52 : vector<512x128xf32>
    %89 = arith.mulf %88, %40 : vector<512x128xf32>
    %cst_41 = arith.constant dense<0.000000e+00> : vector<128xf32>
    %90 = vector.multi_reduction <add>, %63, %cst_41 [0] : vector<512x128xf32> to vector<128xf32>
    %91 = vector.shape_cast %90 : vector<128xf32> to vector<1x128xf32>
    %cst_42 = arith.constant dense<0.000000e+00> : vector<128xf32>
    %92 = vector.multi_reduction <add>, %74, %cst_42 [0] : vector<512x128xf32> to vector<128xf32>
    %93 = vector.shape_cast %92 : vector<128xf32> to vector<1x128xf32>
    %cst_43 = arith.constant dense<0.000000e+00> : vector<128xf32>
    %94 = vector.multi_reduction <add>, %81, %cst_43 [0] : vector<512x128xf32> to vector<128xf32>
    %95 = vector.shape_cast %94 : vector<128xf32> to vector<1x128xf32>
    %cst_44 = arith.constant dense<0.000000e+00> : vector<128xf32>
    %96 = vector.multi_reduction <add>, %85, %cst_44 [0] : vector<512x128xf32> to vector<128xf32>
    %97 = vector.shape_cast %96 : vector<128xf32> to vector<1x128xf32>
    %cst_45 = arith.constant dense<0.000000e+00> : vector<128xf32>
    %98 = vector.multi_reduction <add>, %89, %cst_45 [0] : vector<512x128xf32> to vector<128xf32>
    %99 = vector.shape_cast %98 : vector<128xf32> to vector<1x128xf32>
    %cst_46 = arith.constant 0.000000e+00 : f32
    %100 = vector.broadcast %cst_46 : f32 to vector<3x128xf32>
    %101 = tpu.concatenate %91, %93, %95, %97, %99, %100 in 0 : vector<1x128xf32>, vector<1x128xf32>, vector<1x128xf32>, vector<1x128xf32>, vector<1x128xf32>, vector<3x128xf32> -> vector<8x128xf32>
    %102 = vector.shape_cast %101 : vector<8x128xf32> to vector<1x8x128xf32>
    %c0_47 = arith.constant 0 : index
    %c0_48 = arith.constant 0 : index
    %c0_49 = arith.constant 0 : index
    %103 = vector.load %arg7[%c0_47, %c0_48, %c0_49] : memref<1x8x128xf32, #tpu.memory_space<vmem>>, vector<1x8x128xf32>
    tpu.vector_store %arg7[%c0_47, %c0_48, %c0_49], %102 {strides = array<i32>} : memref<1x8x128xf32, #tpu.memory_space<vmem>>, vector<1x8x128xf32>,
    return
  }
  func.func @transform_0(%arg0: i32) -> (i32, i32) {
    %c0_i32 = arith.constant 0 : i32
    %c0_i32_0 = arith.constant 0 : i32
    return %arg0, %c0_i32 : i32, i32
  }
  func.func @transform_1(%arg0: i32) -> (i32, i32) {
    %c0_i32 = arith.constant 0 : i32
    %c0_i32_0 = arith.constant 0 : i32
    return %arg0, %c0_i32 : i32, i32
  }
  func.func @transform_2(%arg0: i32) -> (i32, i32) {
    %c0_i32 = arith.constant 0 : i32
    %c0_i32_0 = arith.constant 0 : i32
    %c0_i32_1 = arith.constant 0 : i32
    return %c0_i32, %c0_i32_0 : i32, i32
  }
  func.func @transform_3(%arg0: i32) -> (i32, i32) {
    %c0_i32 = arith.constant 0 : i32
    %c0_i32_0 = arith.constant 0 : i32
    %c0_i32_1 = arith.constant 0 : i32
    return %c0_i32, %c0_i32_0 : i32, i32
  }
  func.func @transform_4(%arg0: i32) -> (i32, i32) {
    %c0_i32 = arith.constant 0 : i32
    %c0_i32_0 = arith.constant 0 : i32
    %c0_i32_1 = arith.constant 0 : i32
    return %c0_i32, %c0_i32_0 : i32, i32
  }
  func.func @transform_5(%arg0: i32) -> (i32, i32) {
    %c0_i32 = arith.constant 0 : i32
    %c0_i32_0 = arith.constant 0 : i32
    %c0_i32_1 = arith.constant 0 : i32
    return %c0_i32, %c0_i32_0 : i32, i32
  }
  func.func @transform_6(%arg0: i32) -> (i32, i32, i32) {
    %c0_i32 = arith.constant 0 : i32
    %c0_i32_0 = arith.constant 0 : i32
    %c0_i32_1 = arith.constant 0 : i32
    return %arg0, %c0_i32, %c0_i32_0 : i32, i32, i32
  }
}

</mosaic_0001>

<bundles_post_ra>
// kernel: faster_rcnn_loss.1
= control target key start
LH: loop header
LB: loop body
LE: loop exit
PB: predicated region body
PF: predicated region fallthrough
CT: control target
= control target key end

     0   :  { %vm271_vm0 = vcmask 261120   ;;  %s10138_s2 = inlined_call_operand.vmem [shape: bf16[32,32], index: 2, kind: input, shape index: {}]   ;;  %s10139_s0 = inlined_call_operand.vmem [shape: bf16[512,32], index: 0, kind: input, shape index: {}]   ;;  %s10140_s1 = inlined_call_operand.vmem [shape: bf16[512,32], index: 1, kind: input, shape index: {}]   ;;  %s10141_s4 = inlined_call_operand.vmem [shape: bf16[32,128], index: 4, kind: input, shape index: {}]   ;;  %s10142_s3 = inlined_call_operand.vmem [shape: f32[1,32], index: 3, kind: input, shape index: {}]   ;;  %s10143_s5 = inlined_call_operand.vmem [shape: f32[1,128], index: 5, kind: input, shape index: {}]   ;;  %s10144_s6 = inlined_call_operand.vmem [shape: f32[1,8,128], index: 6, kind: output, shape index: {}]  }
   0x1   :  { %v6172_v0 = vld [vmem:[%s10138_s2] sm:$0xff]   ;;  %v6173_v1 = vld [vmem:[%s10138_s2 + $0x8] sm:$0xff]   ;;  %v6176_v4 = vld [vmem:[%s10139_s0 + $0x10] sm:$0xff]  }
   0x2   :  { %5899 = vmatprep.subr.bf16.mxu0 %v6172_v0  ;;  %v6174_v2 = vld [vmem:[%s10139_s0] sm:$0xff]   ;;  %v6175_v3 = vld [vmem:[%s10139_s0 + $0x8] sm:$0xff]   ;;  %v6177_v5 = vld [vmem:[%s10139_s0 + $0x18] sm:$0xff]  }
   0x3   :  { %5900 = vmatpush3.bf16.msra.mxu0 %v6172_v0  ;;  %5903 = vmatprep.mubr.msk.bf16.mxu0 %vm271_vm0, %v6174_v2  ;;  %v6178_v6 = vld [vmem:[%s10139_s0 + $0x20] sm:$0xff]   ;;  %v6179_v7 = vld [vmem:[%s10139_s0 + $0x28] sm:$0xff]   ;;  %v6180_v8 = vld [vmem:[%s10139_s0 + $0x30] sm:$0xff]  }
   0x4   :  { %5901 = vmatprep.subr.bf16.mxu0 %v6173_v1  ;;  %v6181_v9 = vld [vmem:[%s10139_s0 + $0x38] sm:$0xff]   ;;  %v6182_v10 = vld [vmem:[%s10139_s0 + $0x40] sm:$0xff]   ;;  %v6183_v11 = vld [vmem:[%s10139_s0 + $0x48] sm:$0xff]  }
   0x5   :  { %v6184_v12 = vld [vmem:[%s10139_s0 + $0x50] sm:$0xff]   ;;  %v6185_v13 = vld [vmem:[%s10139_s0 + $0x58] sm:$0xff]   ;;  %v6186_v14 = vld [vmem:[%s10139_s0 + $0x60] sm:$0xff]  }
   0x6   :  { %v6187_v15 = vld [vmem:[%s10139_s0 + $0x68] sm:$0xff]   ;;  %v6188_v16 = vld [vmem:[%s10139_s0 + $0x70] sm:$0xff]   ;;  %v6189_v17 = vld [vmem:[%s10139_s0 + $0x78] sm:$0xff]  }
   0x7   :  { %5902 = vmatpush3.bf16.msra.mxu0 %v6173_v1  ;;  %v6190_v18 = vld [vmem:[%s10139_s0 + $0x80] sm:$0xff]   ;;  %v6191_v19 = vld [vmem:[%s10139_s0 + $0x88] sm:$0xff]   ;;  %v6192_v20 = vld [vmem:[%s10139_s0 + $0x90] sm:$0xff]  }
   0x8   :  { %6035 = vmatprep.subr.bf16.mxu0 %v6172_v0  ;;  %v6193_v21 = vld [vmem:[%s10139_s0 + $0x98] sm:$0xff]   ;;  %v6194_v22 = vld [vmem:[%s10139_s0 + $0xa0] sm:$0xff]   ;;  %v6195_v23 = vld [vmem:[%s10139_s0 + $0xa8] sm:$0xff]  }
   0x9   :  { %v6196_v24 = vld [vmem:[%s10139_s0 + $0xb0] sm:$0xff]   ;;  %v6197_v25 = vld [vmem:[%s10139_s0 + $0xb8] sm:$0xff]   ;;  %v6642_v26 = vld [vmem:[%s10141_s4] sm:$0xff]  }
   0xa   :  { %5904 = vmatmul.mubr.msk.bf16.vlgmr.msra.gmra.mrb[0].mxu0 %vm271_vm0, %v6175_v3  ;;  %v6198_v27 = vld [vmem:[%s10139_s0 + $0xc0] sm:$0xff]   ;;  %5967 = vmatprep.subr.bf16.mxu1 %v6642_v26  ;;  %v6653_v28 = vld [vmem:[%s10141_s4 + $0x8] sm:$0xff]   ;;  %v6200_v30 = vld [vmem:[%s10139_s0 + $0xd0] sm:$0xff]  }
   0xb   :  { %6036 = vmatpush3.bf16.msra.mxu0 %v6172_v0  ;;  %5907 = vmatprep.mubr.msk.bf16.mxu0 %vm271_vm0, %v6176_v4  ;;  %v6199_v29 = vld [vmem:[%s10139_s0 + $0xc8] sm:$0xff]   ;;  %v6201_v31 = vld [vmem:[%s10139_s0 + $0xd8] sm:$0xff]   ;;  %v6202_v32 = vld [vmem:[%s10139_s0 + $0xe0] sm:$0xff]  }
   0xc   :  { %6037 = vmatprep.subr.bf16.mxu0 %v6173_v1  ;;  %5968 = vmatpush3.bf16.msra.mxu1 %v6642_v26  ;;  %v6203_v33 = vld [vmem:[%s10139_s0 + $0xe8] sm:$0xff]   ;;  %v6204_v34 = vld [vmem:[%s10139_s0 + $0xf0] sm:$0xff]   ;;  %v6205_v35 = vld [vmem:[%s10139_s0 + $0xf8] sm:$0xff]  }
   0xd   :  { %5969 = vmatprep.subr.bf16.mxu1 %v6653_v28  ;;  %v6206_v36 = vld [vmem:[%s10140_s1] sm:$0xff]   ;;  %v6207_v37 = vld [vmem:[%s10140_s1 + $0x8] sm:$0xff]   ;;  %v6208_v38 = vld [vmem:[%s10140_s1 + $0x10] sm:$0xff]  }
   0xe   :  { %v6209_v39 = vld [vmem:[%s10140_s1 + $0x18] sm:$0xff]   ;;  %v6210_v40 = vld [vmem:[%s10140_s1 + $0x20] sm:$0xff]   ;;  %v6211_v41 = vld [vmem:[%s10140_s1 + $0x28] sm:$0xff]  }
   0xf   :  { %6038 = vmatpush3.bf16.msra.mxu0 %v6173_v1  ;;  %v6212_v42 = vld [vmem:[%s10140_s1 + $0x30] sm:$0xff]   ;;  %v6213_v43 = vld [vmem:[%s10140_s1 + $0x38] sm:$0xff]   ;;  %v6214_v44 = vld [vmem:[%s10140_s1 + $0x40] sm:$0xff]  }
  0x10   :  { %5970 = vmatpush3.bf16.msra.mxu1 %v6653_v28  ;;  %v6215_v45 = vld [vmem:[%s10140_s1 + $0x48] sm:$0xff]   ;;  %v6216_v46 = vld [vmem:[%s10140_s1 + $0x50] sm:$0xff]   ;;  %v6217_v47 = vld [vmem:[%s10140_s1 + $0x58] sm:$0xff]  }
  0x11   :  { %6103 = vmatprep.subr.bf16.mxu1 %v6642_v26  ;;  %v6218_v48 = vld [vmem:[%s10140_s1 + $0x60] sm:$0xff]   ;;  %v6219_v49 = vld [vmem:[%s10140_s1 + $0x68] sm:$0xff]   ;;  %v6220_v50 = vld [vmem:[%s10140_s1 + $0x70] sm:$0xff]  }
  0x12   :  { %5908 = vmatmul.mubr.msk.bf16.gmra.mrb[4].mxu0 %vm271_vm0, %v6177_v5  ;;  %v6221_v51 = vld [vmem:[%s10140_s1 + $0x78] sm:$0xff]   ;;  %v6222_v52 = vld [vmem:[%s10140_s1 + $0x80] sm:$0xff]   ;;  %v6223_v53 = vld [vmem:[%s10140_s1 + $0x88] sm:$0xff]  }
  0x13   :  { %5911 = vmatprep.mubr.msk.bf16.mxu0 %vm271_vm0, %v6178_v6  ;;  %v6224_v54 = vld [vmem:[%s10140_s1 + $0x90] sm:$0xff]   ;;  %v6225_v55 = vld [vmem:[%s10140_s1 + $0x98] sm:$0xff]   ;;  %v6226_v56 = vld [vmem:[%s10140_s1 + $0xa0] sm:$0xff]  }
  0x14   :  { %v6227_v57 = vld [vmem:[%s10140_s1 + $0xa8] sm:$0xff]   ;;  %v6229_v58 = vld [vmem:[%s10140_s1 + $0xb0] sm:$0xff]   ;;  %v6781_v59 = vld [vmem:[%s10142_s3] ss:$0 sm:$0xff] }
  0x15   :  { %v6230_v63 = vld [vmem:[%s10140_s1 + $0xb8] sm:$0xff]   ;;  %v6232_v2 = vld [vmem:[%s10140_s1 + $0xc0] sm:$0xff]  }
  0x1a   :  { %5912 = vmatmul.mubr.msk.bf16.gmra.mrb[8].mxu0 %vm271_vm0, %v6179_v7 }
  0x1b   :  { %5915 = vmatprep.mubr.msk.bf16.mxu0 %vm271_vm0, %v6180_v8 }
  0x22   :  { %5916 = vmatmul.mubr.msk.bf16.gmra.mrb[12].mxu0 %vm271_vm0, %v6181_v9 }
  0x23   :  { %5919 = vmatprep.mubr.msk.bf16.mxu0 %vm271_vm0, %v6182_v10 }
  0x2a   :  { %5920 = vmatmul.mubr.msk.bf16.gmra.mrb[16].mxu0 %vm271_vm0, %v6183_v11 }
  0x2b   :  { %5923 = vmatprep.mubr.msk.bf16.mxu0 %vm271_vm0, %v6184_v12 }
  0x32   :  { %5924 = vmatmul.mubr.msk.bf16.gmra.mrb[20].mxu0 %vm271_vm0, %v6185_v13 }
  0x33   :  { %5927 = vmatprep.mubr.msk.bf16.mxu0 %vm271_vm0, %v6186_v14 }
  0x3a   :  { %5928 = vmatmul.mubr.msk.bf16.gmra.mrb[24].mxu0 %vm271_vm0, %v6187_v15  ;;  %v6233_v15 = vld [vmem:[%s10140_s1 + $0xc8] sm:$0xff]  }
  0x3b   :  { %5931 = vmatprep.mubr.msk.bf16.mxu0 %vm271_vm0, %v6188_v16 }
  0x42   :  { %5932 = vmatmul.mubr.msk.bf16.gmra.mrb[28].mxu0 %vm271_vm0, %v6189_v17 }
  0x43   :  { %5935 = vmatprep.mubr.msk.bf16.mxu0 %vm271_vm0, %v6190_v18  ;;  %v6234_v18 = vld [vmem:[%s10140_s1 + $0xd0] sm:$0xff]  }
  0x4a   :  { %5936 = vmatmul.mubr.msk.bf16.gmra.mrb[32].mxu0 %vm271_vm0, %v6191_v19 }
  0x4b   :  { %5939 = vmatprep.mubr.msk.bf16.mxu0 %vm271_vm0, %v6192_v20 }
  0x52   :  { %5940 = vmatmul.mubr.msk.bf16.gmra.mrb[36].mxu0 %vm271_vm0, %v6193_v21 }
  0x53   :  { %5943 = vmatprep.mubr.msk.bf16.mxu0 %vm271_vm0, %v6194_v22 }
  0x5a   :  { %5944 = vmatmul.mubr.msk.bf16.gmra.mrb[40].mxu0 %vm271_vm0, %v6195_v23 }
  0x5b   :  { %5947 = vmatprep.mubr.msk.bf16.mxu0 %vm271_vm0, %v6196_v24 }
  0x62   :  { %5948 = vmatmul.mubr.msk.bf16.gmra.mrb[44].mxu0 %vm271_vm0, %v6197_v25 }
  0x63   :  { %5951 = vmatprep.mubr.msk.bf16.mxu0 %vm271_vm0, %v6198_v27 }
  0x6a   :  { %5952 = vmatmul.mubr.msk.bf16.gmra.mrb[48].mxu0 %vm271_vm0, %v6199_v29 }
  0x6b   :  { %5955 = vmatprep.mubr.msk.bf16.mxu0 %vm271_vm0, %v6200_v30 }
  0x72   :  { %5956 = vmatmul.mubr.msk.bf16.gmra.mrb[52].mxu0 %vm271_vm0, %v6201_v31 }
  0x73   :  { %5959 = vmatprep.mubr.msk.bf16.mxu0 %vm271_vm0, %v6202_v32 }
  0x7a   :  { %5960 = vmatmul.mubr.msk.bf16.gmra.mrb[56].mxu0 %vm271_vm0, %v6203_v33 }
  0x7b   :  { %5963 = vmatprep.mubr.msk.bf16.mxu0 %vm271_vm0, %v6204_v34 }
  0x82   :  { %5964 = vmatmul.mubr.msk.bf16.gmra.mrb[60].mxu0 %vm271_vm0, %v6205_v35  ;;  %v6236_v35 = vld [vmem:[%s10140_s1 + $0xe0] sm:$0xff]  }
  0x83   :  { %6039 = vmatprep.mubr.msk.bf16.mxu0 %vm271_vm0, %v6206_v36 }
  0x8a   :  { %6040 = vmatmul.mubr.msk.bf16.vlgmr.msra.gmra.mrb[64].mxu0 %vm271_vm0, %v6207_v37 }
  0x8b   :  { %6043 = vmatprep.mubr.msk.bf16.mxu0 %vm271_vm0, %v6208_v38 }
  0x92   :  { %6044 = vmatmul.mubr.msk.bf16.gmra.mrb[68].mxu0 %vm271_vm0, %v6209_v39 }
  0x93   :  { %6047 = vmatprep.mubr.msk.bf16.mxu0 %vm271_vm0, %v6210_v40 }
  0x9a   :  { %6048 = vmatmul.mubr.msk.bf16.gmra.mrb[72].mxu0 %vm271_vm0, %v6211_v41 }
  0x9b   :  { %6051 = vmatprep.mubr.msk.bf16.mxu0 %vm271_vm0, %v6212_v42 }
  0xa2   :  { %6052 = vmatmul.mubr.msk.bf16.gmra.mrb[76].mxu0 %vm271_vm0, %v6213_v43 }
  0xa3   :  { %6055 = vmatprep.mubr.msk.bf16.mxu0 %vm271_vm0, %v6214_v44 }
  0xaa   :  { %6056 = vmatmul.mubr.msk.bf16.gmra.mrb[80].mxu0 %vm271_vm0, %v6215_v45 }
  0xab   :  { %6059 = vmatprep.mubr.msk.bf16.mxu0 %vm271_vm0, %v6216_v46 }
  0xb2   :  { %6060 = vmatmul.mubr.msk.bf16.gmra.mrb[84].mxu0 %vm271_vm0, %v6217_v47  ;;  %v6237_v47 = vld [vmem:[%s10140_s1 + $0xe8] sm:$0xff]  }
  0xb3   :  { %6063 = vmatprep.mubr.msk.bf16.mxu0 %vm271_vm0, %v6218_v48 }
  0xba   :  { %6064 = vmatmul.mubr.msk.bf16.gmra.mrb[88].mxu0 %vm271_vm0, %v6219_v49 }
  0xbb   :  { %6067 = vmatprep.mubr.msk.bf16.mxu0 %vm271_vm0, %v6220_v50  ;;  %v6238_v50 = vld [vmem:[%s10140_s1 + $0xf0] sm:$0xff]  }
  0xc2   :  { %6068 = vmatmul.mubr.msk.bf16.gmra.mrb[92].mxu0 %vm271_vm0, %v6221_v51 }
  0xc3   :  { %6071 = vmatprep.mubr.msk.bf16.mxu0 %vm271_vm0, %v6222_v52 }
  0xca   :  { %6072 = vmatmul.mubr.msk.bf16.gmra.mrb[96].mxu0 %vm271_vm0, %v6223_v53 }
  0xcb   :  { %6075 = vmatprep.mubr.msk.bf16.mxu0 %vm271_vm0, %v6224_v54 }
  0xd2   :  { %6076 = vmatmul.mubr.msk.bf16.gmra.mrb[100].mxu0 %vm271_vm0, %v6225_v55 }
  0xd3   :  { %6079 = vmatprep.mubr.msk.bf16.mxu0 %vm271_vm0, %v6226_v56 }
  0xda   :  { %6080 = vmatmul.mubr.msk.bf16.gmra.mrb[104].mxu0 %vm271_vm0, %v6227_v57 }
  0xdb   :  { %6083 = vmatprep.mubr.msk.bf16.mxu0 %vm271_vm0, %v6229_v58 }
  0xdd   :  { %v5905_v60 = vpop.f32.mrb[0].mxu0 }
  0xde   :  { %v411_v61 = vadd.f32 %v5905_v60, %v6781_v59  ;;  %v402_v62 = vpop.f32.mrb[1].mxu0 }
  0xdf   :  { %v403_v0 = vadd.f32 %v6781_v59, %v402_v62  ;;  %v5906_v1 = vpop.f32.mrb[2].mxu0 }
  0xe0   :  { %v414_v3 = vadd.f32 %v5906_v1, %v6781_v59  ;;  %v405_v4 = vpop.f32.mrb[3].mxu0  ;;  %v659_v6 = vmax.f32 %v411_v61, 0.0 }
  0xe1   :  { %v406_v5 = vadd.f32 %v6781_v59, %v405_v4  ;;  %v657_v8 = vmax.f32 %v403_v0, 0.0  ;;  %v6239_v0 = vld [vmem:[%s10140_s1 + $0xf8] sm:$0xff]  }
  0xe2   :  { %v660_v7 = vmax.f32 %v414_v3, 0.0  ;;  %6084 = vmatmul.mubr.msk.bf16.gmra.mrb[108].mxu0 %vm271_vm0, %v6230_v63 }
  0xe3   :  { %v658_v9 = vmax.f32 %v406_v5, 0.0  ;;  %6087 = vmatprep.mubr.msk.bf16.mxu0 %vm271_vm0, %v6232_v2 }
  0xe4   :  { %v722_v10 = vpack.c.bf16 %v660_v7, %v659_v6 }
  0xe5   :  { %v5909_v11 = vpop.f32.mrb[4].mxu0  ;;  %v721_v12 = vpack.c.bf16 %v658_v9, %v657_v8 }
  0xe6   :  { %v427_v13 = vadd.f32 %v5909_v11, %v6781_v59  ;;  %v418_v14 = vpop.f32.mrb[5].mxu0 }
  0xe7   :  { %v419_v16 = vadd.f32 %v6781_v59, %v418_v14  ;;  %v5910_v17 = vpop.f32.mrb[6].mxu0  ;;  %5971 = vmatprep.mubr.msk.bf16.mxu1 %vm271_vm0, %v721_v12 }
  0xe8   :  { %v430_v19 = vadd.f32 %v5910_v17, %v6781_v59  ;;  %v421_v20 = vpop.f32.mrb[7].mxu0  ;;  %5972 = vmatmul.mubr.msk.bf16.vlgmr.msra.gmra.mrb[0].mxu1 %vm271_vm0, %v722_v10  ;;  %v663_v22 = vmax.f32 %v427_v13, 0.0 }
  0xe9   :  { %v422_v21 = vadd.f32 %v6781_v59, %v421_v20  ;;  %6104 = vmatpush3.bf16.msra.mxu1 %v6642_v26  ;;  %v661_v24 = vmax.f32 %v419_v16, 0.0  ;;  %v6235_v26 = vld [vmem:[%s10140_s1 + $0xd8] sm:$0xff]  }
  0xea   :  { %v664_v23 = vmax.f32 %v430_v19, 0.0  ;;  %6088 = vmatmul.mubr.msk.bf16.gmra.mrb[112].mxu0 %vm271_vm0, %v6233_v15  ;;  %6105 = vmatprep.subr.bf16.mxu1 %v6653_v28 }
  0xeb   :  { %v662_v25 = vmax.f32 %v422_v21, 0.0  ;;  %6091 = vmatprep.mubr.msk.bf16.mxu0 %vm271_vm0, %v6234_v18 }
  0xec   :  { %v724_v27 = vpack.c.bf16 %v664_v23, %v663_v22 }
  0xed   :  { %v723_v29 = vpack.c.bf16 %v662_v25, %v661_v24  ;;  %v5913_v30 = vpop.f32.mrb[8].mxu0  ;;  %6106 = vmatpush3.bf16.msra.mxu1 %v6653_v28 }
  0xee   :  { %v443_v31 = vadd.f32 %v5913_v30, %v6781_v59  ;;  %v434_v32 = vpop.f32.mrb[9].mxu0 }
  0xef   :  { %v435_v33 = vadd.f32 %v6781_v59, %v434_v32  ;;  %v5914_v34 = vpop.f32.mrb[10].mxu0  ;;  %5975 = vmatprep.mubr.msk.bf16.mxu1 %vm271_vm0, %v723_v29 }
  0xf0   :  { %v446_v36 = vadd.f32 %v5914_v34, %v6781_v59  ;;  %v437_v37 = vpop.f32.mrb[11].mxu0  ;;  %5976 = vmatmul.mubr.msk.bf16.gmra.mrb[4].mxu1 %vm271_vm0, %v724_v27  ;;  %v667_v38 = vmax.f32 %v443_v31, 0.0 }
  0xf1   :  { %v438_v28 = vadd.f32 %v6781_v59, %v437_v37  ;;  %v665_v40 = vmax.f32 %v435_v33, 0.0 }
  0xf2   :  { %v668_v39 = vmax.f32 %v446_v36, 0.0  ;;  %6092 = vmatmul.mubr.msk.bf16.gmra.mrb[116].mxu0 %vm271_vm0, %v6235_v26 }
  0xf3   :  { %v666_v41 = vmax.f32 %v438_v28, 0.0  ;;  %6095 = vmatprep.mubr.msk.bf16.mxu0 %vm271_vm0, %v6236_v35 }
  0xf4   :  { %v726_v42 = vpack.c.bf16 %v668_v39, %v667_v38 }
  0xf5   :  { %v725_v43 = vpack.c.bf16 %v666_v41, %v665_v40  ;;  %v5917_v44 = vpop.f32.mrb[12].mxu0 }
  0xf6   :  { %v459_v45 = vadd.f32 %v5917_v44, %v6781_v59  ;;  %v450_v46 = vpop.f32.mrb[13].mxu0 }
  0xf7   :  { %v451_v48 = vadd.f32 %v6781_v59, %v450_v46  ;;  %v5918_v49 = vpop.f32.mrb[14].mxu0  ;;  %5979 = vmatprep.mubr.msk.bf16.mxu1 %vm271_vm0, %v725_v43 }
  0xf8   :  { %v462_v51 = vadd.f32 %v5918_v49, %v6781_v59  ;;  %v453_v52 = vpop.f32.mrb[15].mxu0  ;;  %5980 = vmatmul.mubr.msk.bf16.gmra.mrb[8].mxu1 %vm271_vm0, %v726_v42  ;;  %v671_v54 = vmax.f32 %v459_v45, 0.0 }
  0xf9   :  { %v454_v53 = vadd.f32 %v6781_v59, %v453_v52  ;;  %v669_v56 = vmax.f32 %v451_v48, 0.0 }
  0xfa   :  { %v672_v55 = vmax.f32 %v462_v51, 0.0  ;;  %6096 = vmatmul.mubr.msk.bf16.gmra.mrb[120].mxu0 %vm271_vm0, %v6237_v47 }
  0xfb   :  { %v670_v57 = vmax.f32 %v454_v53, 0.0  ;;  %6099 = vmatprep.mubr.msk.bf16.mxu0 %vm271_vm0, %v6238_v50 }
  0xfc   :  { %v728_v58 = vpack.c.bf16 %v672_v55, %v671_v54 }
  0xfd   :  { %v727_v60 = vpack.c.bf16 %v670_v57, %v669_v56  ;;  %v5921_v61 = vpop.f32.mrb[16].mxu0 }
  0xfe   :  { %v475_v62 = vadd.f32 %v5921_v61, %v6781_v59  ;;  %v466_v63 = vpop.f32.mrb[17].mxu0 }
  0xff   :  { %v467_v1 = vadd.f32 %v6781_v59, %v466_v63  ;;  %v5922_v2 = vpop.f32.mrb[18].mxu0  ;;  %5983 = vmatprep.mubr.msk.bf16.mxu1 %vm271_vm0, %v727_v60 }
 0x100   :  { %v478_v3 = vadd.f32 %v5922_v2, %v6781_v59  ;;  %v469_v4 = vpop.f32.mrb[19].mxu0  ;;  %5984 = vmatmul.mubr.msk.bf16.gmra.mrb[12].mxu1 %vm271_vm0, %v728_v58  ;;  %v675_v6 = vmax.f32 %v475_v62, 0.0 }
 0x101   :  { %v470_v5 = vadd.f32 %v6781_v59, %v469_v4  ;;  %v673_v8 = vmax.f32 %v467_v1, 0.0 }
 0x102   :  { %v676_v7 = vmax.f32 %v478_v3, 0.0  ;;  %6100 = vmatmul.mubr.msk.bf16.gmra.mrb[124].mxu0 %vm271_vm0, %v6239_v0 }
 0x103   :  { %v674_v9 = vmax.f32 %v470_v5, 0.0 }
 0x104   :  { %v730_v10 = vpack.c.bf16 %v676_v7, %v675_v6 }
 0x105   :  { %v729_v11 = vpack.c.bf16 %v674_v9, %v673_v8  ;;  %v5925_v12 = vpop.f32.mrb[20].mxu0 }
 0x106   :  { %v491_v13 = vadd.f32 %v5925_v12, %v6781_v59  ;;  %v482_v14 = vpop.f32.mrb[21].mxu0 }
 0x107   :  { %v483_v15 = vadd.f32 %v6781_v59, %v482_v14  ;;  %v5926_v16 = vpop.f32.mrb[22].mxu0  ;;  %5987 = vmatprep.mubr.msk.bf16.mxu1 %vm271_vm0, %v729_v11 }
 0x108   :  { %v494_v17 = vadd.f32 %v5926_v16, %v6781_v59  ;;  %v485_v18 = vpop.f32.mrb[23].mxu0  ;;  %5988 = vmatmul.mubr.msk.bf16.gmra.mrb[16].mxu1 %vm271_vm0, %v730_v10  ;;  %v679_v20 = vmax.f32 %v491_v13, 0.0 }
 0x109   :  { %v486_v19 = vadd.f32 %v6781_v59, %v485_v18  ;;  %v677_v22 = vmax.f32 %v483_v15, 0.0 }
 0x10a   :  { %v680_v21 = vmax.f32 %v494_v17, 0.0 }
 0x10b   :  { %v678_v23 = vmax.f32 %v486_v19, 0.0 }
 0x10c   :  { %v732_v24 = vpack.c.bf16 %v680_v21, %v679_v20 }
 0x10d   :  { %v731_v25 = vpack.c.bf16 %v678_v23, %v677_v22  ;;  %v5929_v27 = vpop.f32.mrb[24].mxu0 }
 0x10e   :  { %v507_v29 = vadd.f32 %v5929_v27, %v6781_v59  ;;  %v498_v30 = vpop.f32.mrb[25].mxu0 }
 0x10f   :  { %v499_v31 = vadd.f32 %v6781_v59, %v498_v30  ;;  %v5930_v32 = vpop.f32.mrb[26].mxu0  ;;  %5991 = vmatprep.mubr.msk.bf16.mxu1 %vm271_vm0, %v731_v25 }
 0x110   :  { %v510_v26 = vadd.f32 %v5930_v32, %v6781_v59  ;;  %v501_v33 = vpop.f32.mrb[27].mxu0  ;;  %5992 = vmatmul.mubr.msk.bf16.gmra.mrb[20].mxu1 %vm271_vm0, %v732_v24  ;;  %v683_v35 = vmax.f32 %v507_v29, 0.0 }
 0x111   :  { %v502_v34 = vadd.f32 %v6781_v59, %v501_v33  ;;  %v681_v37 = vmax.f32 %v499_v31, 0.0 }
 0x112   :  { %v684_v36 = vmax.f32 %v510_v26, 0.0 }
 0x113   :  { %v682_v28 = vmax.f32 %v502_v34, 0.0 }
 0x114   :  { %v734_v38 = vpack.c.bf16 %v684_v36, %v683_v35 }
 0x115   :  { %v733_v39 = vpack.c.bf16 %v682_v28, %v681_v37  ;;  %v5933_v40 = vpop.f32.mrb[28].mxu0 }
 0x116   :  { %v523_v41 = vadd.f32 %v5933_v40, %v6781_v59  ;;  %v514_v42 = vpop.f32.mrb[29].mxu0 }
 0x117   :  { %v515_v43 = vadd.f32 %v6781_v59, %v514_v42  ;;  %v5934_v44 = vpop.f32.mrb[30].mxu0  ;;  %5995 = vmatprep.mubr.msk.bf16.mxu1 %vm271_vm0, %v733_v39 }
 0x118   :  { %v526_v45 = vadd.f32 %v5934_v44, %v6781_v59  ;;  %v517_v46 = vpop.f32.mrb[31].mxu0  ;;  %5996 = vmatmul.mubr.msk.bf16.gmra.mrb[24].mxu1 %vm271_vm0, %v734_v38  ;;  %v687_v48 = vmax.f32 %v523_v41, 0.0 }
 0x119   :  { %v518_v47 = vadd.f32 %v6781_v59, %v517_v46  ;;  %v685_v50 = vmax.f32 %v515_v43, 0.0 }
 0x11a   :  { %v688_v49 = vmax.f32 %v526_v45, 0.0 }
 0x11b   :  { %v686_v51 = vmax.f32 %v518_v47, 0.0 }
 0x11c   :  { %v736_v52 = vpack.c.bf16 %v688_v49, %v687_v48 }
 0x11d   :  { %v735_v53 = vpack.c.bf16 %v686_v51, %v685_v50  ;;  %v5937_v54 = vpop.f32.mrb[32].mxu0 }
 0x11e   :  { %v539_v55 = vadd.f32 %v5937_v54, %v6781_v59  ;;  %v530_v56 = vpop.f32.mrb[33].mxu0 }
 0x11f   :  { %v531_v57 = vadd.f32 %v6781_v59, %v530_v56  ;;  %v5938_v58 = vpop.f32.mrb[34].mxu0  ;;  %5999 = vmatprep.mubr.msk.bf16.mxu1 %vm271_vm0, %v735_v53 }
 0x120   :  { %v542_v60 = vadd.f32 %v5938_v58, %v6781_v59  ;;  %v533_v61 = vpop.f32.mrb[35].mxu0  ;;  %6000 = vmatmul.mubr.msk.bf16.gmra.mrb[28].mxu1 %vm271_vm0, %v736_v52  ;;  %v691_v63 = vmax.f32 %v539_v55, 0.0 }
 0x121   :  { %v534_v62 = vadd.f32 %v6781_v59, %v533_v61  ;;  %v689_v1 = vmax.f32 %v531_v57, 0.0 }
 0x122   :  { %v692_v0 = vmax.f32 %v542_v60, 0.0 }
 0x123   :  { %v690_v2 = vmax.f32 %v534_v62, 0.0 }
 0x124   :  { %v738_v3 = vpack.c.bf16 %v692_v0, %v691_v63 }
 0x125   :  { %v737_v4 = vpack.c.bf16 %v690_v2, %v689_v1  ;;  %v5941_v5 = vpop.f32.mrb[36].mxu0 }
 0x126   :  { %v555_v6 = vadd.f32 %v5941_v5, %v6781_v59  ;;  %v546_v7 = vpop.f32.mrb[37].mxu0 }
 0x127   :  { %v547_v8 = vadd.f32 %v6781_v59, %v546_v7  ;;  %v5942_v9 = vpop.f32.mrb[38].mxu0  ;;  %6003 = vmatprep.mubr.msk.bf16.mxu1 %vm271_vm0, %v737_v4 }
 0x128   :  { %v558_v10 = vadd.f32 %v5942_v9, %v6781_v59  ;;  %v549_v11 = vpop.f32.mrb[39].mxu0  ;;  %6004 = vmatmul.mubr.msk.bf16.gmra.mrb[32].mxu1 %vm271_vm0, %v738_v3  ;;  %v695_v13 = vmax.f32 %v555_v6, 0.0 }
 0x129   :  { %v550_v12 = vadd.f32 %v6781_v59, %v549_v11  ;;  %v693_v15 = vmax.f32 %v547_v8, 0.0 }
 0x12a   :  { %v696_v14 = vmax.f32 %v558_v10, 0.0 }
 0x12b   :  { %v694_v16 = vmax.f32 %v550_v12, 0.0 }
 0x12c   :  { %v740_v17 = vpack.c.bf16 %v696_v14, %v695_v13 }
 0x12d   :  { %v739_v18 = vpack.c.bf16 %v694_v16, %v693_v15  ;;  %v5945_v19 = vpop.f32.mrb[40].mxu0 }
 0x12e   :  { %v571_v20 = vadd.f32 %v5945_v19, %v6781_v59  ;;  %v562_v21 = vpop.f32.mrb[41].mxu0 }
 0x12f   :  { %v563_v22 = vadd.f32 %v6781_v59, %v562_v21  ;;  %v5946_v23 = vpop.f32.mrb[42].mxu0  ;;  %6007 = vmatprep.mubr.msk.bf16.mxu1 %vm271_vm0, %v739_v18 }
 0x130   :  { %v574_v24 = vadd.f32 %v5946_v23, %v6781_v59  ;;  %v565_v25 = vpop.f32.mrb[43].mxu0  ;;  %6008 = vmatmul.mubr.msk.bf16.gmra.mrb[36].mxu1 %vm271_vm0, %v740_v17  ;;  %v699_v29 = vmax.f32 %v571_v20, 0.0 }
 0x131   :  { %v566_v27 = vadd.f32 %v6781_v59, %v565_v25  ;;  %v697_v31 = vmax.f32 %v563_v22, 0.0 }
 0x132   :  { %v700_v30 = vmax.f32 %v574_v24, 0.0 }
 0x133   :  { %v698_v32 = vmax.f32 %v566_v27, 0.0 }
 0x134   :  { %v742_v26 = vpack.c.bf16 %v700_v30, %v699_v29 }
 0x135   :  { %v741_v33 = vpack.c.bf16 %v698_v32, %v697_v31  ;;  %v5949_v34 = vpop.f32.mrb[44].mxu0 }
 0x136   :  { %v587_v35 = vadd.f32 %v5949_v34, %v6781_v59  ;;  %v578_v36 = vpop.f32.mrb[45].mxu0 }
 0x137   :  { %v579_v37 = vadd.f32 %v6781_v59, %v578_v36  ;;  %v5950_v28 = vpop.f32.mrb[46].mxu0  ;;  %6011 = vmatprep.mubr.msk.bf16.mxu1 %vm271_vm0, %v741_v33 }
 0x138   :  { %v590_v38 = vadd.f32 %v5950_v28, %v6781_v59  ;;  %v581_v39 = vpop.f32.mrb[47].mxu0  ;;  %6012 = vmatmul.mubr.msk.bf16.gmra.mrb[40].mxu1 %vm271_vm0, %v742_v26  ;;  %v703_v41 = vmax.f32 %v587_v35, 0.0 }
 0x139   :  { %v582_v40 = vadd.f32 %v6781_v59, %v581_v39  ;;  %v701_v43 = vmax.f32 %v579_v37, 0.0 }
 0x13a   :  { %v704_v42 = vmax.f32 %v590_v38, 0.0 }
 0x13b   :  { %v702_v44 = vmax.f32 %v582_v40, 0.0 }
 0x13c   :  { %v744_v45 = vpack.c.bf16 %v704_v42, %v703_v41 }
 0x13d   :  { %v743_v46 = vpack.c.bf16 %v702_v44, %v701_v43  ;;  %v5953_v47 = vpop.f32.mrb[48].mxu0 }
 0x13e   :  { %v603_v48 = vadd.f32 %v5953_v47, %v6781_v59  ;;  %v594_v49 = vpop.f32.mrb[49].mxu0 }
 0x13f   :  { %v595_v50 = vadd.f32 %v6781_v59, %v594_v49  ;;  %v5954_v51 = vpop.f32.mrb[50].mxu0  ;;  %6015 = vmatprep.mubr.msk.bf16.mxu1 %vm271_vm0, %v743_v46 }
 0x140   :  { %v606_v52 = vadd.f32 %v5954_v51, %v6781_v59  ;;  %v597_v53 = vpop.f32.mrb[51].mxu0  ;;  %6016 = vmatmul.mubr.msk.bf16.gmra.mrb[44].mxu1 %vm271_vm0, %v744_v45  ;;  %v707_v55 = vmax.f32 %v603_v48, 0.0 }
 0x141   :  { %v598_v54 = vadd.f32 %v6781_v59, %v597_v53  ;;  %v705_v57 = vmax.f32 %v595_v50, 0.0 }
 0x142   :  { %v708_v56 = vmax.f32 %v606_v52, 0.0 }
 0x143   :  { %v706_v58 = vmax.f32 %v598_v54, 0.0 }
 0x144   :  { %v746_v60 = vpack.c.bf16 %v708_v56, %v707_v55 }
 0x145   :  { %v745_v61 = vpack.c.bf16 %v706_v58, %v705_v57  ;;  %v5957_v62 = vpop.f32.mrb[52].mxu0 }
 0x146   :  { %v619_v63 = vadd.f32 %v5957_v62, %v6781_v59  ;;  %v610_v0 = vpop.f32.mrb[53].mxu0 }
 0x147   :  { %v611_v1 = vadd.f32 %v6781_v59, %v610_v0  ;;  %v5958_v2 = vpop.f32.mrb[54].mxu0  ;;  %6019 = vmatprep.mubr.msk.bf16.mxu1 %vm271_vm0, %v745_v61 }
 0x148   :  { %v622_v3 = vadd.f32 %v5958_v2, %v6781_v59  ;;  %v613_v4 = vpop.f32.mrb[55].mxu0  ;;  %6020 = vmatmul.mubr.msk.bf16.gmra.mrb[48].mxu1 %vm271_vm0, %v746_v60  ;;  %v711_v6 = vmax.f32 %v619_v63, 0.0 }
 0x149   :  { %v614_v5 = vadd.f32 %v6781_v59, %v613_v4  ;;  %v709_v8 = vmax.f32 %v611_v1, 0.0 }
 0x14a   :  { %v712_v7 = vmax.f32 %v622_v3, 0.0 }
 0x14b   :  { %v710_v9 = vmax.f32 %v614_v5, 0.0 }
 0x14c   :  { %v748_v10 = vpack.c.bf16 %v712_v7, %v711_v6 }
 0x14d   :  { %v747_v11 = vpack.c.bf16 %v710_v9, %v709_v8  ;;  %v5961_v12 = vpop.f32.mrb[56].mxu0 }
 0x14e   :  { %v635_v13 = vadd.f32 %v5961_v12, %v6781_v59  ;;  %v626_v14 = vpop.f32.mrb[57].mxu0 }
 0x14f   :  { %v627_v15 = vadd.f32 %v6781_v59, %v626_v14  ;;  %v5962_v16 = vpop.f32.mrb[58].mxu0  ;;  %6023 = vmatprep.mubr.msk.bf16.mxu1 %vm271_vm0, %v747_v11 }
 0x150   :  { %v638_v17 = vadd.f32 %v5962_v16, %v6781_v59  ;;  %v629_v18 = vpop.f32.mrb[59].mxu0  ;;  %6024 = vmatmul.mubr.msk.bf16.gmra.mrb[52].mxu1 %vm271_vm0, %v748_v10  ;;  %v715_v20 = vmax.f32 %v635_v13, 0.0 }
 0x151   :  { %v630_v19 = vadd.f32 %v6781_v59, %v629_v18  ;;  %v713_v22 = vmax.f32 %v627_v15, 0.0 }
 0x152   :  { %v716_v21 = vmax.f32 %v638_v17, 0.0 }
 0x153   :  { %v714_v23 = vmax.f32 %v630_v19, 0.0 }
 0x154   :  { %v750_v24 = vpack.c.bf16 %v716_v21, %v715_v20 }
 0x155   :  { %v749_v25 = vpack.c.bf16 %v714_v23, %v713_v22  ;;  %v5965_v27 = vpop.f32.mrb[60].mxu0 }
 0x156   :  { %v651_v29 = vadd.f32 %v5965_v27, %v6781_v59  ;;  %v642_v30 = vpop.f32.mrb[61].mxu0 }
 0x157   :  { %v643_v31 = vadd.f32 %v6781_v59, %v642_v30  ;;  %v5966_v32 = vpop.f32.mrb[62].mxu0  ;;  %6027 = vmatprep.mubr.msk.bf16.mxu1 %vm271_vm0, %v749_v25 }
 0x158   :  { %v654_v26 = vadd.f32 %v5966_v32, %v6781_v59  ;;  %v645_v33 = vpop.f32.mrb[63].mxu0  ;;  %6028 = vmatmul.mubr.msk.bf16.gmra.mrb[56].mxu1 %vm271_vm0, %v750_v24  ;;  %v719_v35 = vmax.f32 %v651_v29, 0.0 }
 0x159   :  { %v646_v34 = vadd.f32 %v6781_v59, %v645_v33  ;;  %v717_v37 = vmax.f32 %v643_v31, 0.0 }
 0x15a   :  { %v720_v36 = vmax.f32 %v654_v26, 0.0 }
 0x15b   :  { %v718_v28 = vmax.f32 %v646_v34, 0.0 }
 0x15c   :  { %v752_v38 = vpack.c.bf16 %v720_v36, %v719_v35 }
 0x15d   :  { %v751_v39 = vpack.c.bf16 %v718_v28, %v717_v37  ;;  %v6041_v40 = vpop.f32.mrb[64].mxu0 }
 0x15e   :  { %v1524_v41 = vadd.f32 %v6041_v40, %v6781_v59  ;;  %v1515_v42 = vpop.f32.mrb[65].mxu0 }
 0x15f   :  { %v1516_v43 = vadd.f32 %v6781_v59, %v1515_v42  ;;  %6031 = vmatprep.mubr.msk.bf16.mxu1 %vm271_vm0, %v751_v39  ;;  %v6042_v44 = vpop.f32.mrb[66].mxu0 }
 0x160   :  { %v1527_v45 = vadd.f32 %v6042_v44, %v6781_v59  ;;  %6032 = vmatmul.mubr.msk.bf16.gmra.mrb[60].mxu1 %vm271_vm0, %v752_v38  ;;  %v1518_v46 = vpop.f32.mrb[67].mxu0  ;;  %v1772_v48 = vmax.f32 %v1524_v41, 0.0 }
 0x161   :  { %v1519_v47 = vadd.f32 %v6781_v59, %v1518_v46  ;;  %v1770_v50 = vmax.f32 %v1516_v43, 0.0 }
 0x162   :  { %v1773_v49 = vmax.f32 %v1527_v45, 0.0 }
 0x163   :  { %v1771_v51 = vmax.f32 %v1519_v47, 0.0 }
 0x164   :  { %v1835_v52 = vpack.c.bf16 %v1773_v49, %v1772_v48 }
 0x165   :  { %v1834_v53 = vpack.c.bf16 %v1771_v51, %v1770_v50  ;;  %v6045_v54 = vpop.f32.mrb[68].mxu0 }
 0x166   :  { %v1540_v55 = vadd.f32 %v6045_v54, %v6781_v59  ;;  %v1531_v56 = vpop.f32.mrb[69].mxu0 }
 0x167   :  { %v1532_v57 = vadd.f32 %v6781_v59, %v1531_v56  ;;  %v6046_v58 = vpop.f32.mrb[70].mxu0  ;;  %6107 = vmatprep.mubr.msk.bf16.mxu1 %vm271_vm0, %v1834_v53 }
 0x168   :  { %v1543_v60 = vadd.f32 %v6046_v58, %v6781_v59  ;;  %v1534_v61 = vpop.f32.mrb[71].mxu0  ;;  %6108 = vmatmul.mubr.msk.bf16.vlgmr.msra.gmra.mrb[64].mxu1 %vm271_vm0, %v1835_v52  ;;  %v1776_v63 = vmax.f32 %v1540_v55, 0.0 }
 0x169   :  { %v1535_v62 = vadd.f32 %v6781_v59, %v1534_v61  ;;  %v1774_v1 = vmax.f32 %v1532_v57, 0.0 }
 0x16a   :  { %v1777_v0 = vmax.f32 %v1543_v60, 0.0 }
 0x16b   :  { %v1775_v2 = vmax.f32 %v1535_v62, 0.0 }
 0x16c   :  { %v1837_v3 = vpack.c.bf16 %v1777_v0, %v1776_v63 }
 0x16d   :  { %v1836_v4 = vpack.c.bf16 %v1775_v2, %v1774_v1  ;;  %v6049_v5 = vpop.f32.mrb[72].mxu0 }
 0x16e   :  { %v1556_v6 = vadd.f32 %v6049_v5, %v6781_v59  ;;  %v1547_v7 = vpop.f32.mrb[73].mxu0 }
 0x16f   :  { %v1548_v8 = vadd.f32 %v6781_v59, %v1547_v7  ;;  %v6050_v9 = vpop.f32.mrb[74].mxu0  ;;  %6111 = vmatprep.mubr.msk.bf16.mxu1 %vm271_vm0, %v1836_v4 }
 0x170   :  { %v1559_v10 = vadd.f32 %v6050_v9, %v6781_v59  ;;  %v1550_v11 = vpop.f32.mrb[75].mxu0  ;;  %6112 = vmatmul.mubr.msk.bf16.gmra.mrb[68].mxu1 %vm271_vm0, %v1837_v3  ;;  %v1780_v13 = vmax.f32 %v1556_v6, 0.0 }
 0x171   :  { %v1551_v12 = vadd.f32 %v6781_v59, %v1550_v11  ;;  %v1778_v15 = vmax.f32 %v1548_v8, 0.0 }
 0x172   :  { %v1781_v14 = vmax.f32 %v1559_v10, 0.0 }
 0x173   :  { %v1779_v16 = vmax.f32 %v1551_v12, 0.0 }
 0x174   :  { %v1839_v17 = vpack.c.bf16 %v1781_v14, %v1780_v13 }
 0x175   :  { %v1838_v18 = vpack.c.bf16 %v1779_v16, %v1778_v15  ;;  %v6053_v19 = vpop.f32.mrb[76].mxu0 }
 0x176   :  { %v1572_v20 = vadd.f32 %v6053_v19, %v6781_v59  ;;  %v1563_v21 = vpop.f32.mrb[77].mxu0 }
 0x177   :  { %v1564_v22 = vadd.f32 %v6781_v59, %v1563_v21  ;;  %v6054_v23 = vpop.f32.mrb[78].mxu0  ;;  %6115 = vmatprep.mubr.msk.bf16.mxu1 %vm271_vm0, %v1838_v18 }
 0x178   :  { %v1575_v24 = vadd.f32 %v6054_v23, %v6781_v59  ;;  %v1566_v25 = vpop.f32.mrb[79].mxu0  ;;  %6116 = vmatmul.mubr.msk.bf16.gmra.mrb[72].mxu1 %vm271_vm0, %v1839_v17  ;;  %v1784_v29 = vmax.f32 %v1572_v20, 0.0 }
 0x179   :  { %v1567_v27 = vadd.f32 %v6781_v59, %v1566_v25  ;;  %v1782_v31 = vmax.f32 %v1564_v22, 0.0 }
 0x17a   :  { %v1785_v30 = vmax.f32 %v1575_v24, 0.0 }
 0x17b   :  { %v1783_v32 = vmax.f32 %v1567_v27, 0.0 }
 0x17c   :  { %v1841_v26 = vpack.c.bf16 %v1785_v30, %v1784_v29 }
 0x17d   :  { %v1840_v33 = vpack.c.bf16 %v1783_v32, %v1782_v31  ;;  %v6057_v34 = vpop.f32.mrb[80].mxu0 }
 0x17e   :  { %v1588_v35 = vadd.f32 %v6057_v34, %v6781_v59  ;;  %v1579_v36 = vpop.f32.mrb[81].mxu0 }
 0x17f   :  { %v1580_v37 = vadd.f32 %v6781_v59, %v1579_v36  ;;  %v6058_v28 = vpop.f32.mrb[82].mxu0  ;;  %6119 = vmatprep.mubr.msk.bf16.mxu1 %vm271_vm0, %v1840_v33 }
 0x180   :  { %v1591_v38 = vadd.f32 %v6058_v28, %v6781_v59  ;;  %v1582_v39 = vpop.f32.mrb[83].mxu0  ;;  %6120 = vmatmul.mubr.msk.bf16.gmra.mrb[76].mxu1 %vm271_vm0, %v1841_v26  ;;  %v1788_v41 = vmax.f32 %v1588_v35, 0.0 }
 0x181   :  { %v1583_v40 = vadd.f32 %v6781_v59, %v1582_v39  ;;  %v1786_v43 = vmax.f32 %v1580_v37, 0.0 }
 0x182   :  { %v1789_v42 = vmax.f32 %v1591_v38, 0.0 }
 0x183   :  { %v1787_v44 = vmax.f32 %v1583_v40, 0.0 }
 0x184   :  { %v1843_v45 = vpack.c.bf16 %v1789_v42, %v1788_v41 }
 0x185   :  { %v1842_v46 = vpack.c.bf16 %v1787_v44, %v1786_v43  ;;  %v6061_v47 = vpop.f32.mrb[84].mxu0 }
 0x186   :  { %v1604_v48 = vadd.f32 %v6061_v47, %v6781_v59  ;;  %v1595_v49 = vpop.f32.mrb[85].mxu0 }
 0x187   :  { %v1596_v50 = vadd.f32 %v6781_v59, %v1595_v49  ;;  %v6062_v51 = vpop.f32.mrb[86].mxu0  ;;  %6123 = vmatprep.mubr.msk.bf16.mxu1 %vm271_vm0, %v1842_v46 }
 0x188   :  { %v1607_v52 = vadd.f32 %v6062_v51, %v6781_v59  ;;  %v1598_v53 = vpop.f32.mrb[87].mxu0  ;;  %6124 = vmatmul.mubr.msk.bf16.gmra.mrb[80].mxu1 %vm271_vm0, %v1843_v45  ;;  %v1792_v55 = vmax.f32 %v1604_v48, 0.0 }
 0x189   :  { %v1599_v54 = vadd.f32 %v6781_v59, %v1598_v53  ;;  %v1790_v57 = vmax.f32 %v1596_v50, 0.0 }
 0x18a   :  { %v1793_v56 = vmax.f32 %v1607_v52, 0.0 }
 0x18b   :  { %v1791_v58 = vmax.f32 %v1599_v54, 0.0 }
 0x18c   :  { %v1845_v60 = vpack.c.bf16 %v1793_v56, %v1792_v55 }
 0x18d   :  { %v1844_v61 = vpack.c.bf16 %v1791_v58, %v1790_v57  ;;  %v6065_v62 = vpop.f32.mrb[88].mxu0 }
 0x18e   :  { %v1620_v63 = vadd.f32 %v6065_v62, %v6781_v59  ;;  %v1611_v0 = vpop.f32.mrb[89].mxu0 }
 0x18f   :  { %v1612_v1 = vadd.f32 %v6781_v59, %v1611_v0  ;;  %v6066_v2 = vpop.f32.mrb[90].mxu0  ;;  %6127 = vmatprep.mubr.msk.bf16.mxu1 %vm271_vm0, %v1844_v61 }
 0x190   :  { %v1623_v3 = vadd.f32 %v6066_v2, %v6781_v59  ;;  %v1614_v4 = vpop.f32.mrb[91].mxu0  ;;  %6128 = vmatmul.mubr.msk.bf16.gmra.mrb[84].mxu1 %vm271_vm0, %v1845_v60  ;;  %v1796_v6 = vmax.f32 %v1620_v63, 0.0 }
 0x191   :  { %v1615_v5 = vadd.f32 %v6781_v59, %v1614_v4  ;;  %v1794_v8 = vmax.f32 %v1612_v1, 0.0 }
 0x192   :  { %v1797_v7 = vmax.f32 %v1623_v3, 0.0 }
 0x193   :  { %v1795_v9 = vmax.f32 %v1615_v5, 0.0 }
 0x194   :  { %v1847_v10 = vpack.c.bf16 %v1797_v7, %v1796_v6 }
 0x195   :  { %v1846_v11 = vpack.c.bf16 %v1795_v9, %v1794_v8  ;;  %v6069_v12 = vpop.f32.mrb[92].mxu0 }
 0x196   :  { %v1636_v13 = vadd.f32 %v6069_v12, %v6781_v59  ;;  %v1627_v14 = vpop.f32.mrb[93].mxu0 }
 0x197   :  { %v1628_v15 = vadd.f32 %v6781_v59, %v1627_v14  ;;  %v6070_v16 = vpop.f32.mrb[94].mxu0  ;;  %6131 = vmatprep.mubr.msk.bf16.mxu1 %vm271_vm0, %v1846_v11 }
 0x198   :  { %v1639_v17 = vadd.f32 %v6070_v16, %v6781_v59  ;;  %v1630_v18 = vpop.f32.mrb[95].mxu0  ;;  %6132 = vmatmul.mubr.msk.bf16.gmra.mrb[88].mxu1 %vm271_vm0, %v1847_v10  ;;  %v1800_v20 = vmax.f32 %v1636_v13, 0.0 }
 0x199   :  { %v1631_v19 = vadd.f32 %v6781_v59, %v1630_v18  ;;  %v1798_v22 = vmax.f32 %v1628_v15, 0.0 }
 0x19a   :  { %v1801_v21 = vmax.f32 %v1639_v17, 0.0 }
 0x19b   :  { %v1799_v23 = vmax.f32 %v1631_v19, 0.0 }
 0x19c   :  { %v1849_v24 = vpack.c.bf16 %v1801_v21, %v1800_v20 }
 0x19d   :  { %v1848_v25 = vpack.c.bf16 %v1799_v23, %v1798_v22  ;;  %v6073_v27 = vpop.f32.mrb[96].mxu0 }
 0x19e   :  { %v1652_v29 = vadd.f32 %v6073_v27, %v6781_v59  ;;  %v1643_v30 = vpop.f32.mrb[97].mxu0 }
 0x19f   :  { %v1644_v31 = vadd.f32 %v6781_v59, %v1643_v30  ;;  %v6074_v32 = vpop.f32.mrb[98].mxu0  ;;  %6135 = vmatprep.mubr.msk.bf16.mxu1 %vm271_vm0, %v1848_v25 }
 0x1a0   :  { %v1655_v26 = vadd.f32 %v6074_v32, %v6781_v59  ;;  %v1646_v33 = vpop.f32.mrb[99].mxu0  ;;  %6136 = vmatmul.mubr.msk.bf16.gmra.mrb[92].mxu1 %vm271_vm0, %v1849_v24  ;;  %v1804_v35 = vmax.f32 %v1652_v29, 0.0 }
 0x1a1   :  { %v1647_v34 = vadd.f32 %v6781_v59, %v1646_v33  ;;  %v1802_v37 = vmax.f32 %v1644_v31, 0.0 }
 0x1a2   :  { %v1805_v36 = vmax.f32 %v1655_v26, 0.0 }
 0x1a3   :  { %v1803_v28 = vmax.f32 %v1647_v34, 0.0  ;;  %v6998_v34 = vld [vmem:[%s10143_s5] ss:$0 sm:$0xff] }
 0x1a4   :  { %v1851_v38 = vpack.c.bf16 %v1805_v36, %v1804_v35 }
 0x1a5   :  { %v1850_v39 = vpack.c.bf16 %v1803_v28, %v1802_v37  ;;  %v6077_v40 = vpop.f32.mrb[100].mxu0 }
 0x1a6   :  { %v1668_v41 = vadd.f32 %v6077_v40, %v6781_v59  ;;  %v1659_v42 = vpop.f32.mrb[101].mxu0 }
 0x1a7   :  { %v1660_v43 = vadd.f32 %v6781_v59, %v1659_v42  ;;  %v6078_v44 = vpop.f32.mrb[102].mxu0  ;;  %6139 = vmatprep.mubr.msk.bf16.mxu1 %vm271_vm0, %v1850_v39 }
 0x1a8   :  { %v1671_v45 = vadd.f32 %v6078_v44, %v6781_v59  ;;  %v1662_v46 = vpop.f32.mrb[103].mxu0  ;;  %6140 = vmatmul.mubr.msk.bf16.gmra.mrb[96].mxu1 %vm271_vm0, %v1851_v38  ;;  %v1808_v48 = vmax.f32 %v1668_v41, 0.0 }
 0x1a9   :  { %v1663_v47 = vadd.f32 %v6781_v59, %v1662_v46  ;;  %v1806_v50 = vmax.f32 %v1660_v43, 0.0 }
 0x1aa   :  { %v1809_v49 = vmax.f32 %v1671_v45, 0.0 }
 0x1ab   :  { %v1807_v51 = vmax.f32 %v1663_v47, 0.0 }
 0x1ac   :  { %v1853_v52 = vpack.c.bf16 %v1809_v49, %v1808_v48 }
 0x1ad   :  { %v1852_v53 = vpack.c.bf16 %v1807_v51, %v1806_v50  ;;  %v6081_v54 = vpop.f32.mrb[104].mxu0 }
 0x1ae   :  { %v1684_v55 = vadd.f32 %v6081_v54, %v6781_v59  ;;  %v1675_v56 = vpop.f32.mrb[105].mxu0 }
 0x1af   :  { %v1676_v57 = vadd.f32 %v6781_v59, %v1675_v56  ;;  %v6082_v58 = vpop.f32.mrb[106].mxu0  ;;  %6143 = vmatprep.mubr.msk.bf16.mxu1 %vm271_vm0, %v1852_v53 }
 0x1b0   :  { %v1687_v60 = vadd.f32 %v6082_v58, %v6781_v59  ;;  %v1678_v61 = vpop.f32.mrb[107].mxu0  ;;  %6144 = vmatmul.mubr.msk.bf16.gmra.mrb[100].mxu1 %vm271_vm0, %v1853_v52  ;;  %v1812_v63 = vmax.f32 %v1684_v55, 0.0 }
 0x1b1   :  { %v1679_v62 = vadd.f32 %v6781_v59, %v1678_v61  ;;  %v1810_v1 = vmax.f32 %v1676_v57, 0.0 }
 0x1b2   :  { %v1813_v0 = vmax.f32 %v1687_v60, 0.0 }
 0x1b3   :  { %v1811_v2 = vmax.f32 %v1679_v62, 0.0 }
 0x1b4   :  { %v1855_v3 = vpack.c.bf16 %v1813_v0, %v1812_v63 }
 0x1b5   :  { %v1854_v4 = vpack.c.bf16 %v1811_v2, %v1810_v1  ;;  %v6085_v5 = vpop.f32.mrb[108].mxu0 }
 0x1b6   :  { %v1700_v6 = vadd.f32 %v6085_v5, %v6781_v59  ;;  %v1691_v7 = vpop.f32.mrb[109].mxu0 }
 0x1b7   :  { %v1692_v8 = vadd.f32 %v6781_v59, %v1691_v7  ;;  %v6086_v9 = vpop.f32.mrb[110].mxu0  ;;  %6147 = vmatprep.mubr.msk.bf16.mxu1 %vm271_vm0, %v1854_v4 }
 0x1b8   :  { %v1703_v10 = vadd.f32 %v6086_v9, %v6781_v59  ;;  %v1694_v11 = vpop.f32.mrb[111].mxu0  ;;  %6148 = vmatmul.mubr.msk.bf16.gmra.mrb[104].mxu1 %vm271_vm0, %v1855_v3  ;;  %v1816_v13 = vmax.f32 %v1700_v6, 0.0  ;;  %v6496_v3 = vld [vmem:[%s10142_s3] ss:$0 sm:$0xff] }
 0x1b9   :  { %v1695_v12 = vadd.f32 %v6781_v59, %v1694_v11  ;;  %v1814_v15 = vmax.f32 %v1692_v8, 0.0 }
 0x1ba   :  { %v1817_v14 = vmax.f32 %v1703_v10, 0.0 }
 0x1bb   :  { %v1815_v16 = vmax.f32 %v1695_v12, 0.0  ;;  %v5973_v17 = vpop.f32.mrb[0].mxu1 }
 0x1bc   :  { %v1857_v18 = vpack.c.bf16 %v1817_v14, %v1816_v13  ;;  %v906_v19 = vpop.f32.mrb[1].mxu1  ;;  %v7001_v42 = vadd.f32 %v5973_v17, %v6998_v34 }
 0x1bd   :  { %v1856_v20 = vpack.c.bf16 %v1815_v16, %v1814_v15  ;;  %v5974_v21 = vpop.f32.mrb[2].mxu1  ;;  %v6089_v22 = vpop.f32.mrb[112].mxu0  ;;  %v7007_v48 = vadd.f32 %v6998_v34, %v906_v19 }
 0x1be   :  { %v1716_v23 = vadd.f32 %v6089_v22, %v6781_v59  ;;  %v909_v24 = vpop.f32.mrb[3].mxu1  ;;  %v1707_v25 = vpop.f32.mrb[113].mxu0  ;;  %v2967_v52 = vand.u32 2147483647, %v7001_v42  ;;  %v7014_v55 = vadd.f32 %v5974_v21, %v6998_v34  ;;  %vm4439_vm4 = vcmp.gt.f32.partialorder %v7001_v42, 0.0 }
 0x1bf   :  { %v1708_v27 = vadd.f32 %v6781_v59, %v1707_v25  ;;  %v6090_v29 = vpop.f32.mrb[114].mxu0  ;;  %6151 = vmatprep.mubr.msk.bf16.mxu1 %vm271_vm0, %v1856_v20  ;;  %v2965_v60 = vand.u32 2147483647, %v7007_v48  ;;  %vm4437_vm7 = vcmp.gt.f32.partialorder %v7007_v48, 0.0 }
 0x1c0   :  { %v1719_v30 = vadd.f32 %v6090_v29, %v6781_v59  ;;  %v1710_v31 = vpop.f32.mrb[115].mxu0  ;;  %6152 = vmatmul.mubr.msk.bf16.gmra.mrb[108].mxu1 %vm271_vm0, %v1857_v18  ;;  %v1820_v26 = vmax.f32 %v1716_v23, 0.0  ;;  %v3031_v2 = vsub.f32 0.0, %v2967_v52  ;;  %v2968_v7 = vand.u32 2147483647, %v7014_v55 }
 0x1c1   :  { %v1711_v32 = vadd.f32 %v6781_v59, %v1710_v31  ;;  %v1818_v35 = vmax.f32 %v1708_v27, 0.0  ;;  %v3029_v10 = vsub.f32 0.0, %v2965_v60  ;;  %vm4440_vm9 = vcmp.gt.f32.partialorder %v7014_v55, 0.0 }
 0x1c2   :  { %v1821_v33 = vmax.f32 %v1719_v30, 0.0  ;;  %v3097_v16 = vmul.f32 1.442695, %v3031_v2  ;;  %v3032_v20 = vsub.f32 0.0, %v2968_v7 }
 0x1c3   :  { %v1819_v36 = vmax.f32 %v1711_v32, 0.0  ;;  %v5977_v37 = vpop.f32.mrb[4].mxu1  ;;  %v3093_v25 = vmul.f32 1.442695, %v3029_v10 }
 0x1c4   :  { %v1859_v28 = vpack.c.bf16 %v1821_v33, %v1820_v26  ;;  %v922_v38 = vpop.f32.mrb[5].mxu1  ;;  %v7026_v11 = vadd.f32 %v5977_v37, %v6998_v34  ;;  %6240 = vpow2.f32 %v3097_v16 }
 0x1c5   :  { %v1858_v39 = vpack.c.bf16 %v1819_v36, %v1818_v35  ;;  %v5978_v40 = vpop.f32.mrb[6].mxu1  ;;  %v6093_v41 = vpop.f32.mrb[116].mxu0  ;;  %v7030_v14 = vadd.f32 %v6998_v34, %v922_v38  ;;  %6242 = vpow2.f32 %v3093_v25 }
 0x1c6   :  { %v1732_v43 = vadd.f32 %v6093_v41, %v6781_v59  ;;  %v925_v44 = vpop.f32.mrb[7].mxu1  ;;  %v1723_v45 = vpop.f32.mrb[117].mxu0  ;;  %10326 = vst [vmem:[#allocation2_spill] sm:$0xff] %v7026_v11  ;;  %v7034_v21 = vadd.f32 %v5978_v40, %v6998_v34  ;;  %v2971_v27 = vand.u32 2147483647, %v7026_v11  ;;  %vm4443_vm13 = vcmp.gt.f32.partialorder %v7026_v11, 0.0 }
 0x1c7   :  { %v1724_v46 = vadd.f32 %v6781_v59, %v1723_v45  ;;  %v6094_v47 = vpop.f32.mrb[118].mxu0  ;;  %6155 = vmatprep.mubr.msk.bf16.mxu1 %vm271_vm0, %v1858_v39  ;;  %10327 = vst [vmem:[#allocation3_spill] sm:$0xff] %v7030_v14  ;;  %v7038_v29 = vadd.f32 %v6998_v34, %v925_v44  ;;  %v2969_v32 = vand.u32 2147483647, %v7030_v14  ;;  %v3099_v41 = vmul.f32 1.442695, %v3032_v20 }
 0x1c8   :  { %v1735_v49 = vadd.f32 %v6094_v47, %v6781_v59  ;;  %v1726_v50 = vpop.f32.mrb[119].mxu0  ;;  %6156 = vmatmul.mubr.msk.bf16.gmra.mrb[112].mxu1 %vm271_vm0, %v1859_v28  ;;  %v1824_v53 = vmax.f32 %v1732_v43, 0.0  ;;  %10328 = vst [vmem:[#allocation4_spill] sm:$0xff] %v7034_v21  ;;  %v2972_v43 = vand.u32 2147483647, %v7034_v21  ;;  %v3035_v47 = vsub.f32 0.0, %v2971_v27 }
 0x1c9   :  { %v1727_v51 = vadd.f32 %v6781_v59, %v1726_v50  ;;  %v1822_v56 = vmax.f32 %v1724_v46, 0.0  ;;  %v7018_v59 = vadd.f32 %v6998_v34, %v909_v24  ;;  %10329 = vst [vmem:[#allocation5_spill] sm:$0xff] %v7038_v29  ;;  %v3033_v52 = vsub.f32 0.0, %v2969_v32 }
 0x1ca   :  { %v1825_v54 = vmax.f32 %v1735_v49, 0.0  ;;  %v2970_v49 = vand.u32 2147483647, %v7038_v29  ;;  %6244 = vpow2.f32 %v3099_v41  ;;  %v2251_v27 = vlaneseq }
 0x1cb   :  { %v1823_v57 = vmax.f32 %v1727_v51, 0.0  ;;  %v5981_v58 = vpop.f32.mrb[8].mxu1  ;;  %v2966_v17 = vand.u32 2147483647, %v7018_v59  ;;  %vm4438_vm11 = vcmp.gt.f32.partialorder %v7018_v59, 0.0  ;;  %vm4441_vm15 = vcmp.gt.f32.partialorder %v7030_v14, 0.0 }
 0x1cc   :  { %v1861_v61 = vpack.c.bf16 %v1825_v54, %v1824_v53  ;;  %v938_v62 = vpop.f32.mrb[9].mxu1  ;;  %v7042_v26 = vadd.f32 %v5981_v58, %v6998_v34  ;;  %v3034_v7 = vsub.f32 0.0, %v2970_v49 }
 0x1cd   :  { %v1860_v63 = vpack.c.bf16 %v1823_v57, %v1822_v56  ;;  %v5982_v0 = vpop.f32.mrb[10].mxu1  ;;  %v6097_v1 = vpop.f32.mrb[120].mxu0  ;;  %v3030_v37 = vsub.f32 0.0, %v2966_v17  ;;  %v7045_v28 = vadd.f32 %v6998_v34, %v938_v62  ;;  %v3036_v62 = vsub.f32 0.0, %v2972_v43 }
 0x1ce   :  { %v1748_v4 = vadd.f32 %v6496_v3, %v6097_v1  ;;  %v941_v5 = vpop.f32.mrb[11].mxu1  ;;  %v1739_v6 = vpop.f32.mrb[121].mxu0  ;;  %10330 = vst [vmem:[#allocation6_spill] sm:$0xff] %v7042_v26  ;;  %v7049_v44 = vadd.f32 %v5982_v0, %v6998_v34  ;;  %v2975_v53 = vand.u32 2147483647, %v7042_v26 }
 0x1cf   :  { %v1740_v8 = vadd.f32 %v6496_v3, %v1739_v6  ;;  %v6098_v9 = vpop.f32.mrb[122].mxu0  ;;  %6159 = vmatprep.mubr.msk.bf16.mxu1 %vm271_vm0, %v1860_v63  ;;  %10331 = vst [vmem:[#allocation7_spill] sm:$0xff] %v7045_v28  ;;  %v7056_v54 = vadd.f32 %v6998_v34, %v941_v5  ;;  %v2973_v57 = vand.u32 2147483647, %v7045_v28  ;;  %v3105_v6 = vmul.f32 1.442695, %v3035_v47 }
 0x1d0   :  { %v1751_v12 = vadd.f32 %v6496_v3, %v6098_v9  ;;  %v1742_v13 = vpop.f32.mrb[123].mxu0  ;;  %6160 = vmatmul.mubr.msk.bf16.gmra.mrb[116].mxu1 %vm271_vm0, %v1861_v61  ;;  %v1828_v18 = vmax.f32 %v1748_v4, 0.0  ;;  %v2976_v63 = vand.u32 2147483647, %v7049_v44  ;;  %v3095_v4 = vmul.f32 1.442695, %v3030_v37 }
 0x1d1   :  { %v1743_v15 = vadd.f32 %v6496_v3, %v1742_v13  ;;  %v1826_v22 = vmax.f32 %v1740_v8, 0.0  ;;  %10332 = vst [vmem:[#allocation8_spill] sm:$0xff] %v7056_v54  ;;  %v3039_v9 = vsub.f32 0.0, %v2975_v53  ;;  %v3037_v16 = vsub.f32 0.0, %v2973_v57 }
 0x1d2   :  { %v1829_v19 = vmax.f32 %v1751_v12, 0.0  ;;  %v3107_v20 = vmul.f32 1.442695, %v3036_v62  ;;  %6246 = vpow2.f32 %v3095_v4  ;;  %v3103_v25 = vmul.f32 1.442695, %v3034_v7 }
 0x1d3   :  { %v1827_v23 = vmax.f32 %v1743_v15, 0.0  ;;  %v5985_v24 = vpop.f32.mrb[12].mxu1  ;;  %v3101_v15 = vmul.f32 1.442695, %v3033_v52  ;;  %6248 = vpow2.f32 %v3105_v6 }
 0x1d4   :  { %v1863_v30 = vpack.c.bf16 %v1829_v19, %v1828_v18  ;;  %v954_v31 = vpop.f32.mrb[13].mxu1  ;;  %v7060_v58 = vadd.f32 %v5985_v24, %v6998_v34  ;;  %v7075_v24 = vpop.eup %6240 }
 0x1d5   :  { %v1862_v33 = vpack.c.bf16 %v1827_v23, %v1826_v22  ;;  %v5986_v35 = vpop.f32.mrb[14].mxu1  ;;  %v6101_v36 = vpop.f32.mrb[124].mxu0  ;;  %v7065_v10 = vadd.f32 %v6998_v34, %v954_v31  ;;  %v3040_v22 = vsub.f32 0.0, %v2976_v63  ;;  %6250 = vpow2.f32 %v3101_v15 }
 0x1d6   :  { %v1764_v38 = vadd.f32 %v6496_v3, %v6101_v36  ;;  %v957_v39 = vpop.f32.mrb[15].mxu1  ;;  %v1755_v40 = vpop.f32.mrb[125].mxu0  ;;  %10333 = vst [vmem:[#allocation9_spill] sm:$0xff] %v7060_v58  ;;  %v2979_v17 = vand.u32 2147483647, %v7060_v58  ;;  %v7069_v18 = vadd.f32 %v5986_v35, %v6998_v34  ;;  %6252 = vpow2.f32 %v3107_v20 }
 0x1d7   :  { %v1756_v45 = vadd.f32 %v6496_v3, %v1755_v40  ;;  %v6102_v46 = vpop.f32.mrb[126].mxu0  ;;  %6163 = vmatprep.mubr.msk.bf16.mxu1 %vm271_vm0, %v1862_v33  ;;  %10334 = vst [vmem:[#allocation10_spill] sm:$0xff] %v7065_v10  ;;  %v7072_v23 = vadd.f32 %v6998_v34, %v957_v39  ;;  %v2977_v32 = vand.u32 2147483647, %v7065_v10  ;;  %v7079_v33 = vpop.eup %6242  ;;  %v3109_v35 = vmul.f32 1.442695, %v3037_v16 }
 0x1d8   :  { %v1767_v50 = vadd.f32 %v6496_v3, %v6102_v46  ;;  %v1758_v51 = vpop.f32.mrb[127].mxu0  ;;  %6164 = vmatmul.mubr.msk.bf16.gmra.mrb[120].mxu1 %vm271_vm0, %v1863_v30  ;;  %v1832_v60 = vmax.f32 %v1764_v38, 0.0  ;;  %10335 = vst [vmem:[#allocation11_spill] sm:$0xff] %v7069_v18  ;;  %v3113_v30 = vmul.f32 1.442695, %v3039_v9  ;;  %v3043_v36 = vsub.f32 0.0, %v2979_v17 }
 0x1d9   :  { %v1759_v56 = vadd.f32 %v6496_v3, %v1758_v51  ;;  %v1830_v0 = vmax.f32 %v1756_v45, 0.0  ;;  %v2974_v3 = vand.u32 2147483647, %v7056_v54  ;;  %10336 = vst [vmem:[#allocation12_spill] sm:$0xff] %v7072_v23  ;;  %v2980_v37 = vand.u32 2147483647, %v7069_v18 }
 0x1da   :  { %v1833_v61 = vmax.f32 %v1767_v50, 0.0  ;;  %v3115_v38 = vmul.f32 1.442695, %v3040_v22  ;;  %v2978_v39 = vand.u32 2147483647, %v7072_v23  ;;  %6254 = vpow2.f32 %v3103_v25 }
 0x1db   :  { %v1831_v1 = vmax.f32 %v1759_v56, 0.0  ;;  %v5989_v2 = vpop.f32.mrb[16].mxu1  ;;  %v3038_v31 = vsub.f32 0.0, %v2974_v3  ;;  %v3239_v46 = vadd.f32 1.0, %v7075_v24  ;;  %6256 = vpow2.f32 %v3113_v30 }
 0x1dc   :  { %v1865_v8 = vpack.c.bf16 %v1833_v61, %v1832_v60  ;;  %v970_v5 = vpop.f32.mrb[17].mxu1  ;;  %v7084_v40 = vadd.f32 %v5989_v2, %v6998_v34  ;;  %v3041_v49 = vsub.f32 0.0, %v2977_v32  ;;  %v2252_v51 = vand.u32 127, %v2251_v27 }
 0x1dd   :  { %v1864_v12 = vpack.c.bf16 %v1831_v1, %v1830_v0  ;;  %v5990_v13 = vpop.f32.mrb[18].mxu1  ;;  %v7087_v43 = vadd.f32 %v6998_v34, %v970_v5  ;;  %v3111_v47 = vmul.f32 1.442695, %v3038_v31  ;;  %6258 = vpow2.f32 %v3109_v35  ;;  %v7099_v1 = vpop.eup %6244 }
 0x1de   :  { %v973_v19 = vpop.f32.mrb[19].mxu1  ;;  %10337 = vst [vmem:[#allocation13_spill] sm:$0xff] %v7084_v40  ;;  %v3121_v52 = vmul.f32 1.442695, %v3043_v36  ;;  %v3044_v53 = vsub.f32 0.0, %v2980_v37  ;;  %v7091_v56 = vadd.f32 %v5990_v13, %v6998_v34  ;;  %6260 = vpow2.f32 %v3115_v38  ;;  %v7101_v4 = vpop.eup %6246 }
 0x1df   :  { %6167 = vmatprep.mubr.msk.bf16.mxu1 %vm271_vm0, %v1864_v12  ;;  %10338 = vst [vmem:[#allocation14_spill] sm:$0xff] %v7087_v43  ;;  %v3042_v60 = vsub.f32 0.0, %v2978_v39  ;;  %v2983_v61 = vand.u32 2147483647, %v7084_v40  ;;  %v3242_v62 = vmul.f32 -0.5, %v7075_v24  ;;  %v7097_v0 = vadd.f32 %v6998_v34, %v973_v19 }
 0x1e0   :  { %6168 = vmatmul.mubr.msk.bf16.gmra.mrb[124].mxu1 %vm271_vm0, %v1865_v8  ;;  %10339 = vst [vmem:[#allocation15_spill] sm:$0xff] %v7091_v56  ;;  %v2981_v63 = vand.u32 2147483647, %v7087_v43  ;;  %6262 = vlog2.f32 %v3239_v46  ;;  %v3117_v2 = vmul.f32 1.442695, %v3041_v49  ;;  %vm2577_vm1 = vcmp.ge.s32.totalorder %v2252_v51, 4  ;;  %v7104_v8 = vpop.eup %6248 }
 0x1e1   :  { %10340 = vst [vmem:[#allocation16_spill] sm:$0xff] %v7097_v0  ;;  %6264 = vpow2.f32 %v3111_v47  ;;  %vm2578_vm2 = vcmp.lt.s32.totalorder %v2252_v51, 20  ;;  %v3123_v6 = vmul.f32 1.442695, %v3044_v53  ;;  %v2984_v7 = vand.u32 2147483647, %v7091_v56  ;;  %v7107_v13 = vpop.eup %6250 }
 0x1e2   :  { %6266 = vpow2.f32 %v3121_v52  ;;  %vm2448_vm3 = vcmp.lt.s32.totalorder %v2252_v51, 4  ;;  %v3119_v5 = vmul.f32 1.442695, %v3042_v60  ;;  %v3047_v9 = vsub.f32 0.0, %v2983_v61  ;;  %vm7115_vm5 = vmand %vm2577_vm1, %vm2578_vm2  ;;  %v7120_v25 = vpop.eup %6252 }
 0x1e3   :  { %v5993_v41 = vpop.f32.mrb[20].mxu1  ;;  %v3243_v12 = vadd.f32 1.0, %v3242_v62  ;;  %v3045_v15 = vsub.f32 0.0, %v2981_v63  ;;  %v2982_v16 = vand.u32 2147483647, %v7097_v0  ;;  %6268 = vpow2.f32 %v3117_v2 }
 0x1e4   :  { %v986_v45 = vpop.f32.mrb[21].mxu1  ;;  %v7111_v17 = vadd.f32 %v5993_v41, %v6998_v34  ;;  %v3245_v22 = vand.u32 2147483647, %v7075_v24  ;;  %v10145_v31 = vmov 0.0   ;;  %v7130_v36 = vpop.eup %6254  ;;  %6270 = vpow2.f32 %v3123_v6 }
 0x1e5   :  { %v5994_v50 = vpop.f32.mrb[22].mxu1  ;;  %v7123_v27 = vadd.f32 %v6998_v34, %v986_v45  ;;  %v7127_v32 = vsel %vm2448_vm3, 1.0, %v10145_v31  ;;  %v3048_v37 = vsub.f32 0.0, %v2984_v7  ;;  %v7138_v41 = vsel %vm4439_vm4, 1.0, %v10145_v31  ;;  %v7140_v45 = vpop.eup %6256 }
 0x1e6   :  { %v989_v57 = vpop.f32.mrb[23].mxu1  ;;  %10341 = vst [vmem:[#allocation17_spill] sm:$0xff] %v7111_v17  ;;  %v7133_v38 = vadd.f32 %v5994_v50, %v6998_v34  ;;  %6272 = vpow2.f32 %v3119_v5  ;;  %v3129_v46 = vmul.f32 1.442695, %v3047_v9  ;;  %v7148_v49 = vsel %vm7115_vm5, 1.0, %v10145_v31 }
 0x1e7   :  { %10344 = vst [vmem:[#allocation18_spill] sm:$0xff] %v7123_v27  ;;  %v7143_v47 = vadd.f32 %v6998_v34, %v989_v57  ;;  %v7150_v50 = vpop.eup %6258  ;;  %v3125_v51 = vmul.f32 1.442695, %v3045_v15  ;;  %v3046_v52 = vsub.f32 0.0, %v2982_v16  ;;  %v2987_v53 = vand.u32 2147483647, %v7111_v17 }
 0x1e8   :  { %10345 = vst [vmem:[#allocation19_spill] sm:$0xff] %v7133_v38  ;;  %v7154_v60 = vmul.f32 %v7075_v24, %v3243_v12  ;;  %vm7156_vm6 = vcmp.lt.f32.partialorder %v3245_v22, 0.0004427343  ;;  %v7160_v57 = vpop.eup %6260  ;;  %v2985_v62 = vand.u32 2147483647, %v7123_v27  ;;  %v3221_v6 = vadd.f32 1.0, %v7079_v33 }
 0x1e9   :  { %10346 = vst [vmem:[#allocation20_spill] sm:$0xff] %v7143_v47  ;;  %10349 = vst [vmem:[#allocation21_spill] sm:$0xff] %v7160_v57  ;;  %v3131_v5 = vmul.f32 1.442695, %v3048_v37  ;;  %v2988_v24 = vand.u32 2147483647, %v7133_v38  ;;  %6274 = vpow2.f32 %v3129_v46 }
 0x1ea   :  { %v6263_v7 = vpop.eup %6262  ;;  %v2986_v16 = vand.u32 2147483647, %v7143_v47  ;;  %v3224_v20 = vmul.f32 -0.5, %v7079_v33  ;;  %v3227_v22 = vand.u32 2147483647, %v7079_v33  ;;  %6276 = vpow2.f32 %v3125_v51 }
 0x1eb   :  { %v5997_v3 = vpop.f32.mrb[24].mxu1  ;;  %v7173_v15 = vpop.eup %6264  ;;  %v3127_v37 = vmul.f32 1.442695, %v3046_v52  ;;  %v3051_v2 = vsub.f32 0.0, %v2987_v53  ;;  %v3049_v12 = vsub.f32 0.0, %v2985_v62  ;;  %6278 = vlog2.f32 %v3221_v6 }
 0x1ec   :  { %v1002_v19 = vpop.f32.mrb[25].mxu1  ;;  %v7164_v63 = vadd.f32 %v5997_v3, %v6998_v34  ;;  %10352 = vst [vmem:[#allocation24_spill] sm:$0xff] %v7173_v15  ;;  %v7178_v35 = vpop.eup %6266  ;;  %v7184_v27 = vmul.f32 0.6931472, %v6263_v7  ;;  %6280 = vpow2.f32 %v3131_v5  ;;  %v3052_v47 = vsub.f32 0.0, %v2988_v24 }
 0x1ed   :  { %v5998_v30 = vpop.f32.mrb[26].mxu1  ;;  %v7170_v9 = vadd.f32 %v6998_v34, %v1002_v19  ;;  %10353 = vst [vmem:[#allocation25_spill] sm:$0xff] %v7178_v35  ;;  %v7190_v52 = vpop.eup %6268  ;;  %v3225_v53 = vadd.f32 1.0, %v3224_v20  ;;  %v3248_v62 = vadd.f32 1.0, %v7099_v1  ;;  %6282 = vpow2.f32 %v3127_v37 }
 0x1ee   :  { %v1005_v39 = vpop.f32.mrb[27].mxu1  ;;  %10350 = vst [vmem:[#allocation22_spill] sm:$0xff] %v7164_v63  ;;  %v7181_v19 = vadd.f32 %v5998_v30, %v6998_v34  ;;  %v2991_v38 = vand.u32 2147483647, %v7164_v63  ;;  %10356 = vst [vmem:[#allocation28_spill] sm:$0xff] %v7190_v52  ;;  %v3050_v30 = vsub.f32 0.0, %v2986_v16  ;;  %v7194_v63 = vpop.eup %6270 }
 0x1ef   :  { %10351 = vst [vmem:[#allocation23_spill] sm:$0xff] %v7170_v9  ;;  %v2989_v17 = vand.u32 2147483647, %v7170_v9  ;;  %v7188_v0 = vadd.f32 %v6998_v34, %v1005_v39  ;;  %10357 = vst [vmem:[#allocation29_spill] sm:$0xff] %v7194_v63  ;;  %v3137_v6 = vmul.f32 1.442695, %v3051_v2  ;;  %6284 = vlog2.f32 %v3248_v62 }
 0x1f0   :  { %10354 = vst [vmem:[#allocation26_spill] sm:$0xff] %v7181_v19  ;;  %v2992_v7 = vand.u32 2147483647, %v7181_v19  ;;  %v3251_v5 = vmul.f32 -0.5, %v7099_v1  ;;  %v7198_v24 = vpop.eup %6272  ;;  %v3133_v39 = vmul.f32 1.442695, %v3049_v12  ;;  %v7212_v12 = vmul.f32 %v7079_v33, %v3225_v53 }
 0x1f1   :  { %10355 = vst [vmem:[#allocation27_spill] sm:$0xff] %v7188_v0  ;;  %10358 = vst [vmem:[#allocation30_spill] sm:$0xff] %v7198_v24  ;;  %v3055_v9 = vsub.f32 0.0, %v2991_v38  ;;  %v3139_v20 = vmul.f32 1.442695, %v3052_v47  ;;  %v3053_v43 = vsub.f32 0.0, %v2989_v17  ;;  %6286 = vpow2.f32 %v3137_v6 }
 0x1f2   :  { %v2990_v2 = vand.u32 2147483647, %v7188_v0  ;;  %v10360_v37 = vmov 0.0   ;;  %v3135_v40 = vmul.f32 1.442695, %v3050_v30  ;;  %v3252_v17 = vadd.f32 1.0, %v3251_v5 }
 0x1f3   :  { %v6001_v3 = vpop.f32.mrb[28].mxu1  ;;  %v7209_v19 = vsel %vm4437_vm7, 1.0, %v10360_v37  ;;  %v7218_v16 = vpop.eup %6274  ;;  %6288 = vpow2.f32 %v3133_v39  ;;  %v3145_v0 = vmul.f32 1.442695, %v3055_v9  ;;  %vm7221_vm8 = vcmp.lt.f32.partialorder %v3227_v22, 0.0004427343 }
 0x1f4   :  { %v1018_v31 = vpop.f32.mrb[29].mxu1  ;;  %v7201_v56 = vadd.f32 %v6001_v3, %v6998_v34  ;;  %v3056_v3 = vsub.f32 0.0, %v2992_v7  ;;  %10362 = vst [vmem:[#allocation33_spill] sm:$0xff] %v7218_v16  ;;  %v7226_v62 = vpop.eup %6276  ;;  %6290 = vpow2.f32 %v3139_v20  ;;  %v3054_v6 = vsub.f32 0.0, %v2990_v2 }
 0x1f5   :  { %v6002_v46 = vpop.f32.mrb[30].mxu1  ;;  %v7216_v24 = vadd.f32 %v6998_v34, %v1018_v31  ;;  %10365 = vst [vmem:[#allocation34_spill] sm:$0xff] %v7226_v62  ;;  %v3141_v31 = vmul.f32 1.442695, %v3053_v43  ;;  %v6279_v39 = vpop.eup %6278  ;;  %6292 = vpow2.f32 %v3135_v40  ;;  %v3254_v22 = vand.u32 2147483647, %v7099_v1 }
 0x1f6   :  { %v1021_v51 = vpop.f32.mrb[31].mxu1  ;;  %10359 = vst [vmem:[#allocation31_spill] sm:$0xff] %v7201_v56  ;;  %v2995_v30 = vand.u32 2147483647, %v7201_v56  ;;  %v7229_v7 = vadd.f32 %v6002_v46, %v6998_v34  ;;  %v3230_v38 = vadd.f32 1.0, %v7101_v4  ;;  %v7236_v56 = vpop.eup %6280  ;;  %v7240_v43 = vmul.f32 %v7099_v1, %v3252_v17 }
 0x1f7   :  { %10361 = vst [vmem:[#allocation32_spill] sm:$0xff] %v7216_v24  ;;  %v7232_v9 = vadd.f32 %v6998_v34, %v1021_v51  ;;  %10368 = vst [vmem:[#allocation37_spill] sm:$0xff] %v7236_v56  ;;  %v3147_v53 = vmul.f32 1.442695, %v3056_v3  ;;  %v2993_v20 = vand.u32 2147483647, %v7216_v24  ;;  %6294 = vpow2.f32 %v3145_v0  ;;  %v7247_v2 = vpop.eup %6282 }
 0x1f8   :  { %10366 = vst [vmem:[#allocation35_spill] sm:$0xff] %v7229_v7  ;;  %v3059_v46 = vsub.f32 0.0, %v2995_v30  ;;  %v3233_v51 = vmul.f32 -0.5, %v7101_v4  ;;  %10370 = vst [vmem:[#allocation39_spill] sm:$0xff] %v7247_v2  ;;  %6296 = vpow2.f32 %v3141_v31  ;;  %v3143_v62 = vmul.f32 1.442695, %v3054_v6 }
 0x1f9   :  { %10367 = vst [vmem:[#allocation36_spill] sm:$0xff] %v7232_v9  ;;  %v2996_v3 = vand.u32 2147483647, %v7229_v7  ;;  %v7250_v56 = vmul.f32 0.6931472, %v6279_v39  ;;  %6298 = vlog2.f32 %v3230_v38  ;;  %v3057_v31 = vsub.f32 0.0, %v2993_v20 }
 0x1fa   :  { %v2994_v1 = vand.u32 2147483647, %v7232_v9  ;;  %vm7256_vm10 = vcmp.lt.f32.partialorder %v3254_v22, 0.0004427343  ;;  %6300 = vpow2.f32 %v3147_v53  ;;  %v6285_v9 = vpop.eup %6284  ;;  %v3153_v7 = vmul.f32 1.442695, %v3059_v46 }
 0x1fb   :  { %v6005_v23 = vpop.f32.mrb[32].mxu1  ;;  %v3234_v2 = vadd.f32 1.0, %v3233_v51  ;;  %v7269_v16 = vpop.eup %6286  ;;  %6302 = vpow2.f32 %v3143_v62  ;;  %v3060_v38 = vsub.f32 0.0, %v2996_v3  ;;  %v7282_v51 = vsel %vm4438_vm11, 1.0, %v10360_v37 }
 0x1fc   :  { %v1034_v47 = vpop.f32.mrb[33].mxu1  ;;  %v7244_v40 = vadd.f32 %v6005_v23, %v6998_v34  ;;  %v7261_v23 = vsel %vm4440_vm9, 1.0, %v10360_v37  ;;  %10375 = vst [vmem:[#allocation42_spill] sm:$0xff] %v7269_v16  ;;  %10377 = vst [vmem:[#allocation44_spill] sm:$0xff] %v7282_v51  ;;  %v3275_v62 = vadd.f32 1.0, %v7104_v8  ;;  %6304 = vpow2.f32 %v3153_v7 }
 0x1fd   :  { %v6006_v18 = vpop.f32.mrb[34].mxu1  ;;  %v7254_v17 = vadd.f32 %v6998_v34, %v1034_v47  ;;  %v7276_v46 = vpop.eup %6288  ;;  %v3149_v16 = vmul.f32 1.442695, %v3057_v31  ;;  %v7290_v20 = vmul.f32 0.6931472, %v6285_v9  ;;  %v7297_v52 = vmul.f32 %v7101_v4, %v3234_v2 }
 0x1fe   :  { %v1037_v5 = vpop.f32.mrb[35].mxu1  ;;  %10369 = vst [vmem:[#allocation38_spill] sm:$0xff] %v7244_v40  ;;  %v2999_v47 = vand.u32 2147483647, %v7244_v40  ;;  %v7267_v22 = vadd.f32 %v6006_v18, %v6998_v34  ;;  %10376 = vst [vmem:[#allocation43_spill] sm:$0xff] %v7276_v46  ;;  %v3058_v40 = vsub.f32 0.0, %v2994_v1  ;;  %v7285_v3 = vpop.eup %6290  ;;  %6306 = vlog2.f32 %v3275_v62 }
 0x1ff   :  { %10371 = vst [vmem:[#allocation40_spill] sm:$0xff] %v7254_v17  ;;  %v2997_v18 = vand.u32 2147483647, %v7254_v17  ;;  %10378 = vst [vmem:[#allocation45_spill] sm:$0xff] %v7285_v3  ;;  %v7288_v63 = vadd.f32 %v6998_v34, %v1037_v5  ;;  %v3236_v39 = vand.u32 2147483647, %v7101_v4  ;;  %v7293_v1 = vpop.eup %6292  ;;  %6308 = vpow2.f32 %v3149_v16 }
 0x200   :  { %10374 = vst [vmem:[#allocation41_spill] sm:$0xff] %v7267_v22  ;;  %10380 = vst [vmem:[#allocation47_spill] sm:$0xff] %v7293_v1  ;;  %v3063_v17 = vsub.f32 0.0, %v2999_v47  ;;  %v3000_v46 = vand.u32 2147483647, %v7267_v22  ;;  %v3278_v9 = vmul.f32 -0.5, %v7104_v8 }
 0x201   :  { %10379 = vst [vmem:[#allocation46_spill] sm:$0xff] %v7288_v63  ;;  %v3155_v10 = vmul.f32 1.442695, %v3060_v38  ;;  %v7304_v31 = vpop.eup %6294  ;;  %v3151_v35 = vmul.f32 1.442695, %v3058_v40  ;;  %v3061_v58 = vsub.f32 0.0, %v2997_v18 }
 0x202   :  { %10382 = vst [vmem:[#allocation49_spill] sm:$0xff] %v7304_v31  ;;  %v7309_v22 = vpop.eup %6296  ;;  %v2998_v4 = vand.u32 2147483647, %v7288_v63  ;;  %vm7319_vm12 = vcmp.lt.f32.partialorder %v3236_v39, 0.0004427343  ;;  %v3064_v62 = vsub.f32 0.0, %v3000_v46 }
 0x203   :  { %v6009_v0 = vpop.f32.mrb[36].mxu1  ;;  %10384 = vst [vmem:[#allocation51_spill] sm:$0xff] %v7309_v22  ;;  %v3161_v18 = vmul.f32 1.442695, %v3063_v17  ;;  %6310 = vpow2.f32 %v3155_v10  ;;  %v3279_v40 = vadd.f32 1.0, %v3278_v9  ;;  %v3257_v10 = vadd.f32 1.0, %v7107_v13 }
 0x204   :  { %v1050_v6 = vpop.f32.mrb[37].mxu1  ;;  %v7300_v3 = vadd.f32 %v6009_v0, %v6998_v34  ;;  %v3281_v39 = vand.u32 2147483647, %v7104_v8  ;;  %6312 = vpow2.f32 %v3151_v35  ;;  %v3157_v1 = vmul.f32 1.442695, %v3061_v58 }
 0x205   :  { %v6010_v24 = vpop.f32.mrb[38].mxu1  ;;  %v7307_v7 = vadd.f32 %v6998_v34, %v1050_v6  ;;  %v6299_v6 = vpop.eup %6298  ;;  %v3062_v46 = vsub.f32 0.0, %v2998_v4  ;;  %6314 = vpow2.f32 %v3161_v18  ;;  %v7350_v4 = vsel %vm4443_vm13, 1.0, %v10360_v37 }
 0x206   :  { %v1053_v53 = vpop.f32.mrb[39].mxu1  ;;  %10381 = vst [vmem:[#allocation48_spill] sm:$0xff] %v7300_v3  ;;  %v7313_v2 = vadd.f32 %v6010_v24, %v6998_v34  ;;  %v7327_v63 = vpop.eup %6300  ;;  %v3003_v22 = vand.u32 2147483647, %v7300_v3  ;;  %v7336_v15 = vmul.f32 0.6931472, %v6299_v6  ;;  %6316 = vpow2.f32 %v3157_v1 }
 0x207   :  { %10383 = vst [vmem:[#allocation50_spill] sm:$0xff] %v7307_v7  ;;  %v7324_v16 = vadd.f32 %v6998_v34, %v1053_v53  ;;  %10389 = vst [vmem:[#allocation54_spill] sm:$0xff] %v7327_v63  ;;  %v3001_v17 = vand.u32 2147483647, %v7307_v7  ;;  %v7333_v53 = vpop.eup %6302  ;;  %v3163_v3 = vmul.f32 1.442695, %v3064_v62  ;;  %6318 = vlog2.f32 %v3257_v10 }
 0x208   :  { %10385 = vst [vmem:[#allocation52_spill] sm:$0xff] %v7313_v2  ;;  %10390 = vst [vmem:[#allocation55_spill] sm:$0xff] %v7333_v53  ;;  %v3004_v24 = vand.u32 2147483647, %v7313_v2  ;;  %v3067_v58 = vsub.f32 0.0, %v3003_v22  ;;  %v7347_v53 = vmul.f32 %v7104_v8, %v3279_v40  ;;  %v7352_v6 = vpop.eup %6304  ;;  %v3260_v22 = vmul.f32 -0.5, %v7107_v13 }
 0x209   :  { %10388 = vst [vmem:[#allocation53_spill] sm:$0xff] %v7324_v16  ;;  %v3002_v9 = vand.u32 2147483647, %v7324_v16  ;;  %10393 = vst [vmem:[#allocation58_spill] sm:$0xff] %v7350_v4  ;;  %v3065_v18 = vsub.f32 0.0, %v3001_v17  ;;  %6320 = vpow2.f32 %v3163_v3  ;;  %vm4444_vm1 = vcmp.gt.f32.partialorder %v7034_v21, 0.0 }
 0x20a   :  { %10394 = vst [vmem:[#allocation59_spill] sm:$0xff] %v7352_v6  ;;  %vm7357_vm14 = vcmp.lt.f32.partialorder %v3281_v39, 0.0004427343  ;;  %v3068_v8 = vsub.f32 0.0, %v3004_v24  ;;  %v6307_v6 = vpop.eup %6306  ;;  %v3169_v24 = vmul.f32 1.442695, %v3067_v58 }
 0x20b   :  { %v6013_v47 = vpop.f32.mrb[40].mxu1  ;;  %v3066_v1 = vsub.f32 0.0, %v3002_v9  ;;  %v7371_v54 = vpop.eup %6308  ;;  %v3165_v10 = vmul.f32 1.442695, %v3065_v18  ;;  %v3261_v11 = vadd.f32 1.0, %v3260_v22  ;;  %v7386_v18 = vsel %vm4441_vm15, 1.0, %v10360_v37 }
 0x20c   :  { %v1066_v0 = vpop.f32.mrb[41].mxu1  ;;  %v7341_v35 = vadd.f32 %v6013_v47, %v6998_v34  ;;  %10399 = vst [vmem:[#allocation62_spill] sm:$0xff] %v7371_v54  ;;  %v3171_v39 = vmul.f32 1.442695, %v3068_v8  ;;  %v7380_v54 = vmul.f32 0.6931472, %v6307_v6 }
 0x20d   :  { %v6014_v5 = vpop.f32.mrb[42].mxu1  ;;  %v7344_v7 = vadd.f32 %v6998_v34, %v1066_v0  ;;  %v3159_v0 = vmul.f32 1.442695, %v3062_v46  ;;  %v7377_v51 = vpop.eup %6310  ;;  %v3167_v58 = vmul.f32 1.442695, %v3066_v1  ;;  %vm4442_vm3 = vcmp.gt.f32.partialorder %v7038_v29, 0.0 }
 0x20e   :  { %v1069_v31 = vpop.f32.mrb[43].mxu1  ;;  %10391 = vst [vmem:[#allocation56_spill] sm:$0xff] %v7341_v35  ;;  %v7355_v62 = vadd.f32 %v6014_v5, %v6998_v34  ;;  %v3007_v17 = vand.u32 2147483647, %v7341_v35  ;;  %10400 = vst [vmem:[#allocation63_spill] sm:$0xff] %v7377_v51  ;;  %v7382_v3 = vpop.eup %6312  ;;  %vm4447_vm5 = vcmp.gt.f32.partialorder %v7042_v26, 0.0 }
 0x20f   :  { %10392 = vst [vmem:[#allocation57_spill] sm:$0xff] %v7344_v7  ;;  %v7363_v40 = vadd.f32 %v6998_v34, %v1069_v31  ;;  %v3005_v31 = vand.u32 2147483647, %v7344_v7  ;;  %6322 = vpow2.f32 %v3159_v0  ;;  %10401 = vst [vmem:[#allocation64_spill] sm:$0xff] %v7382_v3  ;;  %v3263_v4 = vand.u32 2147483647, %v7107_v13  ;;  %v7392_v8 = vpop.eup %6314 }
 0x210   :  { %10395 = vst [vmem:[#allocation60_spill] sm:$0xff] %v7355_v62  ;;  %v3008_v9 = vand.u32 2147483647, %v7355_v62  ;;  %v3071_v7 = vsub.f32 0.0, %v3007_v17  ;;  %6324 = vpow2.f32 %v3169_v24  ;;  %v3284_v0 = vadd.f32 1.0, %v7120_v25  ;;  %10403 = vst [vmem:[#allocation66_spill] sm:$0xff] %v7392_v8 }
 0x211   :  { %10398 = vst [vmem:[#allocation61_spill] sm:$0xff] %v7363_v40  ;;  %v3006_v63 = vand.u32 2147483647, %v7363_v40  ;;  %v3069_v35 = vsub.f32 0.0, %v3005_v31  ;;  %6326 = vpow2.f32 %v3165_v10  ;;  %v3287_v17 = vmul.f32 -0.5, %v7120_v25  ;;  %v7405_v31 = vpop.eup %6316 }
 0x212   :  { %v3072_v6 = vsub.f32 0.0, %v3008_v9  ;;  %6328 = vpow2.f32 %v3171_v39  ;;  %v7403_v24 = vmul.f32 %v7107_v13, %v3261_v11  ;;  %10406 = vst [vmem:[#allocation69_spill] sm:$0xff] %v7405_v31  ;;  %v3177_v10 = vmul.f32 1.442695, %v3071_v7  ;;  %v6319_v39 = vpop.eup %6318 }
 0x213   :  { %v6017_v16 = vpop.f32.mrb[44].mxu1  ;;  %v3070_v62 = vsub.f32 0.0, %v3006_v63  ;;  %6330 = vpow2.f32 %v3167_v58  ;;  %vm7407_vm0 = vcmp.lt.f32.partialorder %v3263_v4, 0.0004427343  ;;  %v10407_v9 = vmov 0  ;;  %v7420_v31 = vpop.eup %6320 }
 0x214   :  { %v1082_v2 = vpop.f32.mrb[45].mxu1  ;;  %v7389_v22 = vadd.f32 %v6017_v16, %v6998_v34  ;;  %10405 = vst [vmem:[#allocation68_spill] sm:$0xff] %v7403_v24  ;;  %v10408_v9 = vsel %vm7407_vm0, 4294967295, %v10407_v9  ;;  %v3173_v8 = vmul.f32 1.442695, %v3069_v35  ;;  %6332 = vlog2.f32 %v3284_v0  ;;  %10412 = vst [vmem:[#allocation73_spill] sm:$0xff] %v7420_v31 }
 0x215   :  { %v6018_v5 = vpop.f32.mrb[46].mxu1  ;;  %v7395_v40 = vadd.f32 %v6998_v34, %v1082_v2  ;;  %10409 = vst [vmem:[#allocation70_spill] sm:$0xff] %v10408_v9  ;;  %v3179_v13 = vmul.f32 1.442695, %v3072_v6  ;;  %v3288_v4 = vadd.f32 1.0, %v3287_v17  ;;  %6334 = vpow2.f32 %v3177_v10 }
 0x216   :  { %v1085_v46 = vpop.f32.mrb[47].mxu1  ;;  %10402 = vst [vmem:[#allocation65_spill] sm:$0xff] %v7389_v22  ;;  %v3011_v51 = vand.u32 2147483647, %v7389_v22  ;;  %v7414_v16 = vadd.f32 %v6018_v5, %v6998_v34  ;;  %v3175_v14 = vmul.f32 1.442695, %v3070_v62  ;;  %6336 = vpow2.f32 %v3173_v8 }
 0x217   :  { %10404 = vst [vmem:[#allocation67_spill] sm:$0xff] %v7395_v40  ;;  %v3009_v58 = vand.u32 2147483647, %v7395_v40  ;;  %v7418_v7 = vadd.f32 %v6998_v34, %v1085_v46  ;;  %v3290_v5 = vand.u32 2147483647, %v7120_v25  ;;  %6338 = vpow2.f32 %v3179_v13 }
 0x218   :  { %10410 = vst [vmem:[#allocation71_spill] sm:$0xff] %v7414_v16  ;;  %v7430_v6 = vmul.f32 0.6931472, %v6319_v39  ;;  %v3075_v17 = vsub.f32 0.0, %v3011_v51  ;;  %v3012_v62 = vand.u32 2147483647, %v7414_v16  ;;  %6340 = vpow2.f32 %v3175_v14 }
 0x219   :  { %10411 = vst [vmem:[#allocation72_spill] sm:$0xff] %v7418_v7  ;;  %v7433_v46 = vpop.eup %6322  ;;  %v3073_v35 = vsub.f32 0.0, %v3009_v58  ;;  %v3010_v40 = vand.u32 2147483647, %v7418_v7  ;;  %v7450_v13 = vsel %vm4444_vm1, 1.0, %v10360_v37  ;;  %vm4445_vm9 = vcmp.gt.f32.partialorder %v7045_v28, 0.0 }
 0x21a   :  { %10415 = vst [vmem:[#allocation76_spill] sm:$0xff] %v7430_v6  ;;  %10416 = vst [vmem:[#allocation77_spill] sm:$0xff] %v7433_v46  ;;  %v7441_v39 = vpop.eup %6324  ;;  %v3185_v16 = vmul.f32 1.442695, %v3075_v17  ;;  %vm7465_vm2 = vcmp.lt.f32.partialorder %v3290_v5, 0.0004427343 }
 0x21b   :  { %v6021_v1 = vpop.f32.mrb[48].mxu1  ;;  %10417 = vst [vmem:[#allocation78_spill] sm:$0xff] %v7441_v39  ;;  %10419 = vst [vmem:[#allocation80_spill] sm:$0xff] %v7450_v13  ;;  %v7452_v58 = vpop.eup %6326  ;;  %v3076_v39 = vsub.f32 0.0, %v3012_v62  ;;  %v3181_v31 = vmul.f32 1.442695, %v3073_v35 }
 0x21c   :  { %v1098_v3 = vpop.f32.mrb[49].mxu1  ;;  %v7423_v63 = vadd.f32 %v6021_v1, %v6998_v34  ;;  %v3266_v1 = vadd.f32 1.0, %v7130_v36  ;;  %10420 = vst [vmem:[#allocation81_spill] sm:$0xff] %v7452_v58  ;;  %v3074_v21 = vsub.f32 0.0, %v3010_v40  ;;  %v3311_v40 = vadd.f32 1.0, %v7140_v45 }
 0x21d   :  { %v6022_v2 = vpop.f32.mrb[50].mxu1  ;;  %v7428_v0 = vadd.f32 %v6998_v34, %v1098_v3  ;;  %v7439_v3 = vmul.f32 %v7120_v25, %v3288_v4  ;;  %v3187_v35 = vmul.f32 1.442695, %v3076_v39  ;;  %v10472_v61 = vmax.f32 %v7007_v48, 0.0 }
 0x21e   :  { %v1101_v11 = vpop.f32.mrb[51].mxu1  ;;  %10413 = vst [vmem:[#allocation74_spill] sm:$0xff] %v7423_v63  ;;  %v3015_v22 = vand.u32 2147483647, %v7423_v63  ;;  %v7445_v8 = vadd.f32 %v6022_v2, %v6998_v34  ;;  %v7463_v63 = vpop.eup %6328  ;;  %6342 = vlog2.f32 %v3266_v1  ;;  %v3272_v2 = vand.u32 2147483647, %v7130_v36 }
 0x21f   :  { %10414 = vst [vmem:[#allocation75_spill] sm:$0xff] %v7428_v0  ;;  %v3013_v7 = vand.u32 2147483647, %v7428_v0  ;;  %v7456_v25 = vadd.f32 %v6998_v34, %v1101_v11  ;;  %10422 = vst [vmem:[#allocation83_spill] sm:$0xff] %v7463_v63  ;;  %v3269_v11 = vmul.f32 -0.5, %v7130_v36  ;;  %v7470_v0 = vpop.eup %6330  ;;  %6344 = vpow2.f32 %v3185_v16 }
 0x220   :  { %10418 = vst [vmem:[#allocation79_spill] sm:$0xff] %v7445_v8  ;;  %10425 = vst [vmem:[#allocation84_spill] sm:$0xff] %v7470_v0  ;;  %v6333_v6 = vpop.eup %6332  ;;  %v3079_v63 = vsub.f32 0.0, %v3015_v22  ;;  %v3016_v17 = vand.u32 2147483647, %v7445_v8  ;;  %6346 = vpow2.f32 %v3181_v31 }
 0x221   :  { %10421 = vst [vmem:[#allocation82_spill] sm:$0xff] %v7456_v25  ;;  %v3077_v62 = vsub.f32 0.0, %v3013_v7  ;;  %v3014_v1 = vand.u32 2147483647, %v7456_v25  ;;  %v3270_v8 = vadd.f32 1.0, %v3269_v11  ;;  %6348 = vlog2.f32 %v3311_v40 }
 0x222   :  { %v3183_v29 = vmul.f32 1.442695, %v3074_v21  ;;  %v7492_v13 = vmul.f32 0.6931472, %v6333_v6  ;;  %v3193_v39 = vmul.f32 1.442695, %v3079_v63  ;;  %6350 = vpow2.f32 %v3187_v35 }
 0x223   :  { %v6025_v10 = vpop.f32.mrb[52].mxu1  ;;  %v3189_v11 = vmul.f32 1.442695, %v3077_v62  ;;  %vm7515_vm4 = vcmp.lt.f32.partialorder %v3272_v2, 0.0004427343 }
 0x224   :  { %v1114_v51 = vpop.f32.mrb[53].mxu1  ;;  %v7476_v5 = vadd.f32 %v6025_v10, %v6998_v34  ;;  %v7490_v10 = vpop.eup %6334  ;;  %6352 = vpow2.f32 %v3183_v29  ;;  %v7523_v29 = vld [vmem:[%s10143_s5] ss:$0 sm:$0xff] }
 0x225   :  { %v6026_v4 = vpop.f32.mrb[54].mxu1  ;;  %v7481_v0 = vadd.f32 %v6998_v34, %v1114_v51  ;;  %10430 = vst [vmem:[#allocation89_spill] sm:$0xff] %v7490_v10  ;;  %v7495_v51 = vsel %vm4442_vm3, 1.0, %v10360_v37  ;;  %v7497_v25 = vpop.eup %6336  ;;  %v3078_v10 = vsub.f32 0.0, %v3014_v1  ;;  %v7513_v1 = vmul.f32 %v7130_v36, %v3270_v8 }
 0x226   :  { %v1117_v46 = vpop.f32.mrb[55].mxu1  ;;  %10426 = vst [vmem:[#allocation85_spill] sm:$0xff] %v7476_v5  ;;  %v7485_v14 = vadd.f32 %v6026_v4, %v6998_v34  ;;  %10431 = vst [vmem:[#allocation90_spill] sm:$0xff] %v7497_v25  ;;  %v3080_v4 = vsub.f32 0.0, %v3016_v17  ;;  %v3019_v24 = vand.u32 2147483647, %v7476_v5  ;;  %6354 = vpow2.f32 %v3193_v39 }
 0x227   :  { %10427 = vst [vmem:[#allocation86_spill] sm:$0xff] %v7481_v0  ;;  %v7488_v22 = vadd.f32 %v6998_v34, %v1117_v46  ;;  %v7500_v46 = vpop.eup %6338  ;;  %v3017_v21 = vand.u32 2147483647, %v7481_v0  ;;  %v3314_v17 = vmul.f32 -0.5, %v7140_v45  ;;  %v3317_v36 = vand.u32 2147483647, %v7140_v45 }
 0x228   :  { %10428 = vst [vmem:[#allocation87_spill] sm:$0xff] %v7485_v14  ;;  %10432 = vst [vmem:[#allocation91_spill] sm:$0xff] %v7500_v46  ;;  %v7503_v6 = vpop.eup %6340  ;;  %v3020_v9 = vand.u32 2147483647, %v7485_v14  ;;  %v3083_v0 = vsub.f32 0.0, %v3019_v24  ;;  %6356 = vpow2.f32 %v3189_v11  ;;  %v3296_v25 = vmul.f32 -0.5, %v7150_v50 }
 0x229   :  { %10429 = vst [vmem:[#allocation88_spill] sm:$0xff] %v7488_v22  ;;  %10433 = vst [vmem:[#allocation92_spill] sm:$0xff] %v7503_v6  ;;  %v3018_v31 = vand.u32 2147483647, %v7488_v22  ;;  %v6343_v14 = vpop.eup %6342  ;;  %v3195_v22 = vmul.f32 1.442695, %v3080_v4 }
 0x22a   :  { %v3191_v8 = vmul.f32 1.442695, %v3078_v10  ;;  %v3081_v2 = vsub.f32 0.0, %v3017_v21  ;;  %v3084_v35 = vsub.f32 0.0, %v3020_v9  ;;  %v3315_v24 = vadd.f32 1.0, %v3314_v17  ;;  %v7545_v11 = vpop.eup %6344 }
 0x22b   :  { %v6029_v7 = vpop.f32.mrb[56].mxu1  ;;  %v3082_v4 = vsub.f32 0.0, %v3018_v31  ;;  %v7534_v46 = vmul.f32 0.6931472, %v6343_v14  ;;  %6358 = vpow2.f32 %v3195_v22  ;;  %v3201_v10 = vmul.f32 1.442695, %v3083_v0  ;;  %v7555_v0 = vpop.eup %6346 }
 0x22c   :  { %v1130_v34 = vpop.f32.mrb[57].mxu1  ;;  %v7526_v5 = vadd.f32 %v7523_v29, %v6029_v7  ;;  %v3293_v7 = vadd.f32 1.0, %v7150_v50  ;;  %10441 = vst [vmem:[#allocation98_spill] sm:$0xff] %v7545_v11  ;;  %6360 = vpow2.f32 %v3191_v8  ;;  %v3197_v14 = vmul.f32 1.442695, %v3081_v2  ;;  %10446 = vst [vmem:[#allocation101_spill] sm:$0xff] %v7555_v0  ;;  %v6349_v2 = vpop.eup %6348 }
 0x22d   :  { %v6030_v16 = vpop.f32.mrb[58].mxu1  ;;  %v7530_v62 = vadd.f32 %v7523_v29, %v1130_v34  ;;  %vm7551_vm7 = vcmp.lt.f32.partialorder %v3317_v36, 0.0004427343  ;;  %v10443_v22 = vmov 0  ;;  %v7560_v11 = vmul.f32 %v7140_v45, %v3315_v24 }
 0x22e   :  { %v1133_v63 = vpop.f32.mrb[59].mxu1  ;;  %10436 = vst [vmem:[#allocation93_spill] sm:$0xff] %v7526_v5  ;;  %v3023_v39 = vand.u32 2147483647, %v7526_v5  ;;  %v7541_v34 = vadd.f32 %v7523_v29, %v6030_v16  ;;  %v10444_v22 = vsel %vm7551_vm7, 4294967295, %v10443_v22  ;;  %v7565_v8 = vsel %vm4447_vm5, 1.0, %v10360_v37 }
 0x22f   :  { %10437 = vst [vmem:[#allocation94_spill] sm:$0xff] %v7530_v62  ;;  %v3021_v21 = vand.u32 2147483647, %v7530_v62  ;;  %10445 = vst [vmem:[#allocation100_spill] sm:$0xff] %v10444_v22  ;;  %v3203_v16 = vmul.f32 1.442695, %v3084_v35  ;;  %v7568_v36 = vadd.f32 %v7523_v29, %v1133_v63  ;;  %6362 = vlog2.f32 %v3293_v7  ;;  %v7571_v35 = vpop.eup %6350 }
 0x230   :  { %10439 = vst [vmem:[#allocation96_spill] sm:$0xff] %v7541_v34  ;;  %v3199_v5 = vmul.f32 1.442695, %v3082_v4  ;;  %10448 = vst [vmem:[#allocation103_spill] sm:$0xff] %v7560_v11  ;;  %v3297_v17 = vadd.f32 1.0, %v3296_v25  ;;  %6364 = vpow2.f32 %v3201_v10  ;;  %v3087_v4 = vsub.f32 0.0, %v3023_v39  ;;  %v7578_v62 = vpop.eup %6352 }
 0x231   :  { %10449 = vst [vmem:[#allocation104_spill] sm:$0xff] %v7565_v8  ;;  %10450 = vst [vmem:[#allocation105_spill] sm:$0xff] %v7568_v36  ;;  %v3024_v45 = vand.u32 2147483647, %v7541_v34  ;;  %6366 = vpow2.f32 %v3197_v14  ;;  %v3085_v63 = vsub.f32 0.0, %v3021_v21  ;;  %v7585_v10 = vsel %vm4445_vm9, 1.0, %v10360_v37  ;;  %v7588_v34 = vpop.eup %6354 }
 0x232   :  { %10451 = vst [vmem:[#allocation106_spill] sm:$0xff] %v7571_v35  ;;  %10452 = vst [vmem:[#allocation107_spill] sm:$0xff] %v7578_v62  ;;  %6368 = vpow2.f32 %v3203_v16  ;;  %v7582_v0 = vmul.f32 0.6931472, %v6349_v2  ;;  %v3323_v39 = vmul.f32 -0.5, %v7160_v57  ;;  %v7592_v14 = vmul.f32 %v7150_v50, %v3297_v17  ;;  %v7595_v25 = vpop.eup %6356 }
 0x233   :  { %v7532_v6 = vpop.f32.mrb[60].mxu1  ;;  %10454 = vst [vmem:[#allocation109_spill] sm:$0xff] %v7585_v10  ;;  %10455 = vst [vmem:[#allocation110_spill] sm:$0xff] %v7588_v34  ;;  %6370 = vpow2.f32 %v3199_v5  ;;  %v7597_v16 = vmul.f32 1.442695, %v3087_v4  ;;  %v7599_v2 = vsub.f32 0.0, %v3024_v45 }
 0x234   :  { %10438 = vst [vmem:[#allocation95_spill] sm:$0xff] %v7532_v6  ;;  %v7543_v9 = vpop.f32.mrb[61].mxu1  ;;  %10453 = vst [vmem:[#allocation108_spill] sm:$0xff] %v7582_v0  ;;  %v7603_v5 = vmul.f32 1.442695, %v3085_v63  ;;  %v3320_v21 = vadd.f32 1.0, %v7160_v57 }
 0x235   :  { %10440 = vst [vmem:[#allocation97_spill] sm:$0xff] %v7543_v9  ;;  %v7548_v31 = vpop.f32.mrb[62].mxu1  ;;  %10456 = vst [vmem:[#allocation111_spill] sm:$0xff] %v7595_v25  ;;  %v3324_v63 = vadd.f32 1.0, %v3323_v39  ;;  %vm4448_vm5 = vcmp.gt.f32.partialorder %v7049_v44, 0.0 }
 0x236   :  { %10442 = vst [vmem:[#allocation99_spill] sm:$0xff] %v7548_v31  ;;  %v7557_v6 = vpop.f32.mrb[63].mxu1  ;;  %10457 = vst [vmem:[#allocation112_spill] sm:$0xff] %v7597_v16  ;;  %v7608_v31 = vpop.eup %6358  ;;  %6372 = vlog2.f32 %v3320_v21 }
 0x237   :  { %10447 = vst [vmem:[#allocation102_spill] sm:$0xff] %v7557_v6  ;;  %10458 = vst [vmem:[#allocation113_spill] sm:$0xff] %v7599_v2  ;;  %v7617_v34 = vpop.eup %6360 }
 0x238   :  { %10459 = vst [vmem:[#allocation114_spill] sm:$0xff] %v7603_v5  ;;  %10460 = vst [vmem:[#allocation115_spill] sm:$0xff] %v7608_v31  ;;  %v10475_v31 = vsel %vm7221_vm8, %v7212_v12, %v7250_v56 }
 0x239   :  { %10461 = vst [vmem:[#allocation116_spill] sm:$0xff] %v7617_v34  ;;  %v6363_v2 = vpop.eup %6362 }
 0x23a   :  { %v7627_v10 = vpop.eup %6364 }
 0x23b   :  { %v6109_v62 = vpop.f32.mrb[64].mxu1  ;;  %10463 = vst [vmem:[#allocation117_spill] sm:$0xff] %v7627_v10  ;;  %v7635_v11 = vpop.eup %6366 }
 0x23c   :  { %v2005_v7 = vadd.f32 %v7523_v29, %v6109_v62  ;;  %v1996_v35 = vpop.f32.mrb[65].mxu1  ;;  %v10462_v62 = vsub.f32 1.0, %v7138_v41  ;;  %10467 = vst [vmem:[#allocation118_spill] sm:$0xff] %v7635_v11  ;;  %v7640_v10 = vpop.eup %6368  ;;  %v10485_v11 = vld [vmem:[#allocation44_spill] sm:$0xff] }
 0x23d   :  { %v1997_v24 = vadd.f32 %v7523_v29, %v1996_v35  ;;  %v6110_v6 = vpop.f32.mrb[66].mxu1  ;;  %10468 = vst [vmem:[#allocation119_spill] sm:$0xff] %v7640_v10 }
 0x23e   :  { %vm2583_vm11 = vcmp.gt.f32.partialorder %v2005_v7, 0.0  ;;  %v3927_v4 = vsub.f32 %v7001_v42, %v2005_v7  ;;  %v7611_v45 = vpop.f32.mrb[67].mxu1 }
 0x23f   :  { %v5637_v35 = vsel %vm2583_vm11, 1.0, %v10360_v37  ;;  %vm2581_vm13 = vcmp.gt.f32.partialorder %v1997_v24, 0.0  ;;  %v3925_v17 = vsub.f32 %v7007_v48, %v1997_v24  ;;  %v10464_v24 = vmax.f32 %v7001_v42, 0.0 }
 0x240   :  { %v2839_v25 = vmul.f32 %v5637_v35, %v7001_v42  ;;  %v3991_v7 = vand.u32 2147483647, %v3927_v4  ;;  %v4119_v9 = vmul.f32 0.5, %v3927_v4  ;;  %v4567_v5 = vmul.f32 %v5637_v35, %v7138_v41 }
 0x241   :  { %v4695_v16 = vsub.f32 1.0, %v5637_v35  ;;  %v4951_v39 = vmul.f32 %v5637_v35, %v10462_v62  ;;  %v5635_v34 = vsel %vm2581_vm13, 1.0, %v10360_v37  ;;  %v3989_v36 = vand.u32 2147483647, %v3925_v17 }
 0x242   :  { %v2903_v28 = vsub.f32 %v10464_v24, %v2839_v25  ;;  %vm7631_vm15 = vcmp.lt.f32.partialorder %v3991_v7, 1.0  ;;  %v4183_v8 = vmul.f32 %v4119_v9, %v3927_v4  ;;  %v5701_v0 = vadd.f32 -0.5, %v3991_v7 }
 0x243   :  { %v4759_v22 = vmul.f32 %v4695_v16, %v7138_v41  ;;  %v2837_v62 = vmul.f32 %v5635_v34, %v7007_v48  ;;  %v2008_v35 = vadd.f32 %v7523_v29, %v6110_v6  ;;  %v6113_v26 = vpop.f32.mrb[68].mxu1  ;;  %v10469_v42 = vsel %vm7156_vm6, %v7154_v60, %v7184_v27  ;;  %v7654_v16 = vpop.eup %6370 }
 0x244   :  { %v3799_v25 = vadd.f32 %v10469_v42, %v2903_v28  ;;  %v4117_v9 = vmul.f32 0.5, %v3925_v17  ;;  %v7647_v4 = vpop.f32.mrb[69].mxu1  ;;  %v7649_v7 = vmul.f32 0.6931472, %v6363_v2  ;;  %v7652_v41 = vmul.f32 %v7160_v57, %v3324_v63  ;;  %10471 = vst [vmem:[#allocation121_spill] sm:$0xff] %v7654_v16 }
 0x245   :  { %v4311_v6 = vsel %vm7631_vm15, %v4183_v8, %v5701_v0  ;;  %v7659_v21 = vmul.f32 %v4567_v5, %v7127_v32  ;;  %v2901_v27 = vsub.f32 %v10472_v61, %v2837_v62  ;;  %v5699_v28 = vadd.f32 -0.5, %v3989_v36  ;;  %v7663_v60 = vpop.f32.mrb[70].mxu1 }
 0x246   :  { %10470 = vst [vmem:[#allocation120_spill] sm:$0xff] %v7652_v41  ;;  %vm7665_vm6 = vcmp.lt.f32.partialorder %v3989_v36, 1.0  ;;  %v4181_v63 = vmul.f32 %v4117_v9, %v3925_v17  ;;  %v4565_v24 = vmul.f32 %v5635_v34, %v7209_v19  ;;  %v4693_v42 = vsub.f32 1.0, %v5635_v34  ;;  %v7670_v16 = vpop.f32.mrb[71].mxu1 }
 0x247   :  { %v3797_v48 = vadd.f32 %v10475_v31, %v2901_v27  ;;  %v10476_v0 = vsub.f32 1.0, %v7209_v19  ;;  %vm2584_vm1 = vcmp.gt.f32.partialorder %v2008_v35, 0.0  ;;  %v3928_v36 = vsub.f32 %v7014_v55, %v2008_v35 }
 0x248   :  { %v7681_v5 = vmul.f32 %v4311_v6, %v7148_v49  ;;  %v7684_v17 = vmul.f32 %v4951_v39, %v7127_v32  ;;  %v4757_v62 = vmul.f32 %v4693_v42, %v7209_v19  ;;  %v5638_v33 = vsel %vm2584_vm1, 1.0, %v10360_v37 }
 0x249   :  { %v4949_v8 = vmul.f32 %v5635_v34, %v10476_v0  ;;  %v7689_v9 = vmul.f32 %v3799_v25, %v7127_v32  ;;  %v7692_v56 = vmul.f32 %v4759_v22, %v7127_v32  ;;  %v4309_v12 = vsel %vm7665_vm6, %v4181_v63, %v5699_v28 }
 0x24a   :  { %v2840_v34 = vmul.f32 %v5638_v33, %v7014_v55  ;;  %v4629_v35 = vmul.f32 %v4565_v24, %v7127_v32  ;;  %v3992_v6 = vand.u32 2147483647, %v3928_v36  ;;  %v4120_v39 = vmul.f32 0.5, %v3928_v36 }
 0x24b   :  { %v4568_v61 = vmul.f32 %v5638_v33, %v7261_v23  ;;  %v10477_v19 = vmax.f32 %v7014_v55, 0.0  ;;  %v4696_v42 = vsub.f32 1.0, %v5638_v33  ;;  %v10478_v25 = vsub.f32 1.0, %v7261_v23  ;;  %v7705_v2 = vpop.f32.mrb[72].mxu1  ;;  %v7713_v55 = vpop.eup %6372 }
 0x24c   :  { %v2000_v22 = vadd.f32 %v7523_v29, %v7611_v45  ;;  %v3861_v28 = vmul.f32 %v3797_v48, %v7127_v32  ;;  %v4373_v63 = vmul.f32 %v4309_v12, %v7148_v49  ;;  %v4821_v24 = vmul.f32 %v4757_v62, %v7127_v32  ;;  %v7711_v10 = vpop.f32.mrb[73].mxu1  ;;  %10479 = vst [vmem:[#allocation122_spill] sm:$0xff] %v7713_v55 }
 0x24d   :  { %v2904_v27 = vsub.f32 %v10477_v19, %v2840_v34  ;;  %v4952_v31 = vmul.f32 %v5638_v33, %v10478_v25  ;;  %v5013_v0 = vmul.f32 %v4949_v8, %v7127_v32  ;;  %v10480_v33 = vsel %vm7256_vm10, %v7240_v43, %v7290_v20  ;;  %v7725_v62 = vpop.f32.mrb[74].mxu1 }
 0x24e   :  { %vm7720_vm8 = vcmp.lt.f32.partialorder %v3992_v6, 1.0  ;;  %v4760_v48 = vmul.f32 %v4696_v42, %v7261_v23  ;;  %vm2582_vm3 = vcmp.gt.f32.partialorder %v2000_v22, 0.0  ;;  %10483 = vst [vmem:[#allocation123_spill] sm:$0xff] %v7725_v62  ;;  %v4184_v8 = vmul.f32 %v4120_v39, %v3928_v36  ;;  %v7730_v25 = vpop.f32.mrb[75].mxu1 }
 0x24f   :  { %v3800_v45 = vadd.f32 %v10480_v33, %v2904_v27  ;;  %v5636_v12 = vsel %vm2582_vm3, 1.0, %v10360_v37  ;;  %v3926_v19 = vsub.f32 %v7018_v59, %v2000_v22  ;;  %v2021_v30 = vadd.f32 %v7523_v29, %v6113_v26  ;;  %10484 = vst [vmem:[#allocation124_spill] sm:$0xff] %v7730_v25 }
 0x250   :  { %v5702_v43 = vadd.f32 -0.5, %v3992_v6  ;;  %v4632_v20 = vmul.f32 %v4568_v61, %v7127_v32  ;;  %v7734_v27 = vmul.f32 %v4952_v31, %v7127_v32  ;;  %v2838_v23 = vmul.f32 %v5636_v12, %v7018_v59  ;;  %v10488_v6 = vld [vmem:[#allocation2_spill] sm:$0xff] }
 0x251   :  { %v3990_v42 = vand.u32 2147483647, %v3926_v19  ;;  %v4118_v33 = vmul.f32 0.5, %v3926_v19  ;;  %v4566_v36 = vmul.f32 %v5636_v12, %v10485_v11  ;;  %v4694_v39 = vsub.f32 1.0, %v5636_v12 }
 0x252   :  { %v10486_v41 = vmax.f32 %v7018_v59, 0.0  ;;  %v10487_v26 = vsub.f32 1.0, %v10485_v11  ;;  %vm2587_vm10 = vcmp.gt.f32.partialorder %v2021_v30, 0.0  ;;  %v3931_v25 = vsub.f32 %v10488_v6, %v2021_v30 }
 0x253   :  { %vm7744_vm9 = vcmp.lt.f32.partialorder %v3990_v42, 1.0  ;;  %v4182_v31 = vmul.f32 %v4118_v33, %v3926_v19  ;;  %v5700_v55 = vadd.f32 -0.5, %v3990_v42  ;;  %v4630_v62 = vmul.f32 %v4566_v36, %v7127_v32 }
 0x254   :  { %v2902_v22 = vsub.f32 %v10486_v41, %v2838_v23  ;;  %v4950_v57 = vmul.f32 %v5636_v12, %v10487_v26  ;;  %v10491_v59 = vsel %vm7319_vm12, %v7297_v52, %v7336_v15  ;;  %v4758_v12 = vmul.f32 %v4694_v39, %v10485_v11  ;;  %v7757_v26 = vpop.f32.mrb[76].mxu1 }
 0x255   :  { %v5641_v23 = vsel %vm2587_vm10, 1.0, %v10360_v37  ;;  %v4312_v19 = vsel %vm7720_vm8, %v4184_v8, %v5702_v43  ;;  %v4310_v42 = vsel %vm7744_vm9, %v4182_v31, %v5700_v55  ;;  %v5215_v33 = vadd.f32 %v4630_v62, %v4629_v35 }
 0x256   :  { %v3798_v41 = vadd.f32 %v10491_v59, %v2902_v22  ;;  %v5014_v30 = vmul.f32 %v4950_v57, %v7127_v32  ;;  %v2843_v38 = vmul.f32 %v5641_v23, %v10488_v6  ;;  %v10492_v15 = vand.u32 2147483647, %v7150_v50  ;;  %v7770_v57 = vpop.f32.mrb[77].mxu1 }
 0x257   :  { %v4374_v36 = vmul.f32 %v4310_v42, %v7148_v49  ;;  %v4822_v34 = vmul.f32 %v4758_v12, %v7127_v32  ;;  %v7775_v43 = vpop.f32.mrb[78].mxu1  ;;  %v5216_v35 = vadd.f32 %v5215_v33, %v7659_v21  ;;  %v10495_v55 = vmax.f32 %v10488_v6, 0.0  ;;  %v10497_v12 = vld [vmem:[#allocation58_spill] sm:$0xff] }
 0x258   :  { %vm7766_vm12 = vcmp.lt.f32.partialorder %v10492_v15, 0.0004427343  ;;  %v3862_v11 = vmul.f32 %v3798_v41, %v7127_v32  ;;  %v5353_v8 = vadd.f32 %v5014_v30, %v5013_v0  ;;  %v3995_v62 = vand.u32 2147483647, %v3931_v25  ;;  %v7780_v22 = vpop.f32.mrb[79].mxu1  ;;  %v10507_v15 = vld [vmem:[#allocation76_spill] sm:$0xff] }
 0x259   :  { %v2907_v50 = vsub.f32 %v10495_v55, %v2843_v38  ;;  %v4123_v39 = vmul.f32 0.5, %v3931_v25  ;;  %v5146_v31 = vadd.f32 %v4374_v36, %v4373_v63  ;;  %v5284_v59 = vadd.f32 %v4822_v34, %v4821_v24  ;;  %v10501_v36 = vld [vmem:[#allocation3_spill] sm:$0xff] }
 0x25a   :  { %v5077_v61 = vadd.f32 %v3862_v11, %v3861_v28  ;;  %v5354_v41 = vadd.f32 %v5353_v8, %v7684_v17  ;;  %v3864_v42 = vmul.f32 %v3800_v45, %v7127_v32  ;;  %v4376_v0 = vmul.f32 %v4312_v19, %v7148_v49 }
 0x25b   :  { %v10496_v21 = vsel %vm7357_vm14, %v7347_v53, %v7380_v54  ;;  %v4571_v30 = vmul.f32 %v5641_v23, %v10497_v12  ;;  %v5147_v28 = vadd.f32 %v5146_v31, %v7681_v5  ;;  %v5285_v63 = vadd.f32 %v5284_v59, %v7692_v56 }
 0x25c   :  { %v3803_v6 = vadd.f32 %v10496_v21, %v2907_v50  ;;  %v5078_v33 = vadd.f32 %v5077_v61, %v7689_v9  ;;  %v4699_v24 = vsub.f32 1.0, %v5641_v23  ;;  %v4824_v17 = vmul.f32 %v4760_v48, %v7127_v32  ;;  %v7804_v9 = vpop.f32.mrb[80].mxu1  ;;  %v10503_v21 = vld [vmem:[#allocation4_spill] sm:$0xff] }
 0x25d   :  { %v4187_v45 = vmul.f32 %v4123_v39, %v3931_v25  ;;  %v5705_v38 = vadd.f32 -0.5, %v3995_v62  ;;  %v10498_v19 = vsub.f32 1.0, %v10497_v12  ;;  %vm7797_vm11 = vcmp.lt.f32.partialorder %v3995_v62, 1.0 }
 0x25e   :  { %v4763_v54 = vmul.f32 %v4699_v24, %v10497_v12  ;;  %v2013_v53 = vadd.f32 %v7523_v29, %v7647_v4  ;;  %v5079_v5 = vadd.f32 %v5078_v33, %v3864_v42  ;;  %v5148_v56 = vadd.f32 %v5147_v28, %v4376_v0 }
 0x25f   :  { %v4955_v47 = vmul.f32 %v5641_v23, %v10498_v19  ;;  %v5217_v11 = vadd.f32 %v5216_v35, %v4632_v20  ;;  %v5286_v48 = vadd.f32 %v5285_v63, %v4824_v17  ;;  %v7809_v25 = vsel %vm4448_vm5, 1.0, %v10360_v37  ;;  %v7811_v23 = vpop.f32.mrb[81].mxu1  ;;  %v10506_v19 = vld [vmem:[#allocation68_spill] sm:$0xff] }
 0x260   :  { %vm2585_vm14 = vcmp.gt.f32.partialorder %v2013_v53, 0.0  ;;  %v3929_v34 = vsub.f32 %v10501_v36, %v2013_v53  ;;  %v5355_v8 = vadd.f32 %v5354_v41, %v7734_v27  ;;  %v3301_v4 = vsel %vm7766_vm12, %v7592_v14, %v7649_v7  ;;  %v7819_v55 = vpop.f32.mrb[82].mxu1 }
 0x261   :  { %v7822_v20 = vmul.f32 %v3803_v6, %v7127_v32  ;;  %v4315_v35 = vsel %vm7797_vm11, %v4187_v45, %v5705_v38  ;;  %v5639_v50 = vsel %vm2585_vm14, 1.0, %v10360_v37  ;;  %v2024_v62 = vadd.f32 %v7523_v29, %v7663_v60  ;;  %v7829_v39 = vpop.f32.mrb[83].mxu1 }
 0x262   :  { %v2841_v27 = vmul.f32 %v5639_v50, %v10501_v36  ;;  %v3993_v61 = vand.u32 2147483647, %v3929_v34  ;;  %v4121_v31 = vmul.f32 0.5, %v3929_v34  ;;  %v4569_v59 = vmul.f32 %v5639_v50, %v7386_v18 }
 0x263   :  { %v4697_v41 = vsub.f32 1.0, %v5639_v50  ;;  %v10502_v42 = vsub.f32 1.0, %v7386_v18  ;;  %vm2588_vm13 = vcmp.gt.f32.partialorder %v2024_v62, 0.0  ;;  %v3932_v6 = vsub.f32 %v10503_v21, %v2024_v62 }
 0x264   :  { %v10504_v12 = vmax.f32 %v10501_v36, 0.0  ;;  %vm4057_vm15 = vcmp.lt.f32.partialorder %v3993_v61, 1.0  ;;  %v4185_v60 = vmul.f32 %v4121_v31, %v3929_v34  ;;  %v5703_v28 = vadd.f32 -0.5, %v3993_v61 }
 0x265   :  { %v4953_v0 = vmul.f32 %v5639_v50, %v10502_v42  ;;  %v4633_v63 = vmul.f32 %v4569_v59, %v7127_v32  ;;  %v4761_v24 = vmul.f32 %v4697_v41, %v7386_v18  ;;  %v5642_v45 = vsel %vm2588_vm13, 1.0, %v10360_v37 }
 0x266   :  { %v2905_v33 = vsub.f32 %v10504_v12, %v2841_v27  ;;  %v10508_v53 = vsel %vm7407_vm0, %v10506_v19, %v10507_v15  ;;  %v4313_v62 = vsel %vm4057_vm15, %v4185_v60, %v5703_v28  ;;  %v2844_v36 = vmul.f32 %v5642_v45, %v10503_v21 }
 0x267   :  { %v5017_v17 = vmul.f32 %v4953_v0, %v7127_v32  ;;  %v2016_v34 = vadd.f32 %v7523_v29, %v7670_v16  ;;  %v4377_v27 = vmul.f32 %v4313_v62, %v7148_v49  ;;  %v4825_v18 = vmul.f32 %v4761_v24, %v7127_v32  ;;  %v10510_v16 = vld [vmem:[#allocation80_spill] sm:$0xff] }
 0x268   :  { %v3801_v50 = vadd.f32 %v10508_v53, %v2905_v33  ;;  %v5218_v61 = vadd.f32 %v5217_v11, %v4633_v63  ;;  %v7853_v59 = vmul.f32 %v4315_v35, %v7148_v49  ;;  %v4635_v41 = vmul.f32 %v4571_v30, %v7127_v32 }
 0x269   :  { %v5356_v31 = vadd.f32 %v5355_v8, %v5017_v17  ;;  %v10509_v0 = vmax.f32 %v10503_v21, 0.0  ;;  %v5149_v33 = vadd.f32 %v5148_v56, %v4377_v27  ;;  %v5287_v60 = vadd.f32 %v5286_v48, %v4825_v18  ;;  %v10513_v56 = vld [vmem:[#allocation5_spill] sm:$0xff]  ;;  %v7869_v17 = vpop.f32.mrb[84].mxu1 }
 0x26a   :  { %v3865_v42 = vmul.f32 %v3801_v50, %v7127_v32  ;;  %v3996_v28 = vand.u32 2147483647, %v3932_v6  ;;  %v4572_v38 = vmul.f32 %v5642_v45, %v10510_v16  ;;  %v10511_v11 = vsel %vm7465_vm2, %v7439_v3, %v7492_v13 }
 0x26b   :  { %v2908_v12 = vsub.f32 %v10509_v0, %v2844_v36  ;;  %v4124_v35 = vmul.f32 0.5, %v3932_v6  ;;  %v4700_v63 = vsub.f32 1.0, %v5642_v45  ;;  %v5019_v30 = vmul.f32 %v4955_v47, %v7127_v32 }
 0x26c   :  { %v5080_v19 = vadd.f32 %v5079_v5, %v3865_v42  ;;  %v10512_v24 = vsub.f32 1.0, %v10510_v16  ;;  %vm2586_vm0 = vcmp.gt.f32.partialorder %v2016_v34, 0.0  ;;  %v3930_v48 = vsub.f32 %v10513_v56, %v2016_v34 }
 0x26d   :  { %v3804_v8 = vadd.f32 %v10511_v11, %v2908_v12  ;;  %v4827_v5 = vmul.f32 %v4763_v54, %v7127_v32  ;;  %v4764_v58 = vmul.f32 %v4700_v63, %v10510_v16  ;;  %v5640_v15 = vsel %vm2586_vm0, 1.0, %v10360_v37  ;;  %v7892_v16 = vpop.f32.mrb[85].mxu1 }
 0x26e   :  { %v4956_v21 = vmul.f32 %v5642_v45, %v10512_v24  ;;  %v2037_v3 = vadd.f32 %v7523_v29, %v7705_v2  ;;  %vm7876_vm2 = vcmp.lt.f32.partialorder %v3996_v28, 1.0  ;;  %v5706_v47 = vadd.f32 -0.5, %v3996_v28 }
 0x26f   :  { %v2842_v45 = vmul.f32 %v5640_v15, %v10513_v56  ;;  %v3994_v53 = vand.u32 2147483647, %v3930_v48  ;;  %v4188_v50 = vmul.f32 %v4124_v35, %v3932_v6  ;;  %v4122_v62 = vmul.f32 0.5, %v3930_v48 }
 0x270   :  { %v4570_v36 = vmul.f32 %v5640_v15, %v7495_v51  ;;  %v4698_v54 = vsub.f32 1.0, %v5640_v15  ;;  %v10516_v34 = vmax.f32 %v10513_v56, 0.0  ;;  %v10519_v42 = vsub.f32 1.0, %v7495_v51  ;;  %v10521_v56 = vld [vmem:[#allocation6_spill] sm:$0xff] }
 0x271   :  { %vm7884_vm6 = vcmp.lt.f32.partialorder %v3994_v53, 1.0  ;;  %v5704_v2 = vadd.f32 -0.5, %v3994_v53  ;;  %v4186_v12 = vmul.f32 %v4122_v62, %v3930_v48  ;;  %vm2591_vm1 = vcmp.gt.f32.partialorder %v2037_v3, 0.0 }
 0x272   :  { %v2906_v27 = vsub.f32 %v10516_v34, %v2842_v45  ;;  %v4954_v0 = vmul.f32 %v5640_v15, %v10519_v42  ;;  %v4634_v28 = vmul.f32 %v4570_v36, %v7127_v32  ;;  %v4762_v6 = vmul.f32 %v4698_v54, %v7495_v51 }
 0x273   :  { %v10520_v11 = vsel %vm7515_vm4, %v7513_v1, %v7534_v46  ;;  %v5645_v24 = vsel %vm2591_vm1, 1.0, %v10360_v37  ;;  %v3935_v15 = vsub.f32 %v10521_v56, %v2037_v3  ;;  %v4314_v48 = vsel %vm7884_vm6, %v4186_v12, %v5704_v2 }
 0x274   :  { %v3802_v35 = vadd.f32 %v10520_v11, %v2906_v27  ;;  %v5018_v63 = vmul.f32 %v4954_v0, %v7127_v32  ;;  %v4826_v51 = vmul.f32 %v4762_v6, %v7127_v32  ;;  %v5219_v45 = vadd.f32 %v5218_v61, %v4634_v28  ;;  %v10524_v28 = vld [vmem:[#allocation103_spill] sm:$0xff]  ;;  %v10525_v6 = vld [vmem:[#allocation108_spill] sm:$0xff] }
 0x275   :  { %v2847_v53 = vmul.f32 %v5645_v24, %v10521_v56  ;;  %v4636_v40 = vmul.f32 %v4572_v38, %v7127_v32  ;;  %v4378_v46 = vmul.f32 %v4314_v48, %v7148_v49  ;;  %v4316_v36 = vsel %vm7876_vm2, %v4188_v50, %v5706_v47  ;;  %v10527_v47 = vld [vmem:[#allocation104_spill] sm:$0xff] }
 0x276   :  { %v3866_v62 = vmul.f32 %v3802_v35, %v7127_v32  ;;  %v5357_v1 = vadd.f32 %v5356_v31, %v5018_v63  ;;  %v5220_v54 = vadd.f32 %v5219_v45, %v4635_v41  ;;  %v5288_v3 = vadd.f32 %v5287_v60, %v4826_v51 }
 0x277   :  { %v10522_v34 = vmax.f32 %v10521_v56, 0.0  ;;  %v5150_v2 = vadd.f32 %v5149_v33, %v4378_v46  ;;  %v3999_v42 = vand.u32 2147483647, %v3935_v15  ;;  %v3868_v0 = vmul.f32 %v3804_v8, %v7127_v32 }
 0x278   :  { %v5081_v18 = vadd.f32 %v5080_v19, %v3866_v62  ;;  %v5358_v61 = vadd.f32 %v5357_v1, %v5019_v30  ;;  %v5289_v38 = vadd.f32 %v5288_v3, %v4827_v5  ;;  %v10526_v31 = vsel %vm7551_vm7, %v10524_v28, %v10525_v6 }
 0x279   :  { %v2911_v27 = vsub.f32 %v10522_v34, %v2847_v53  ;;  %v4127_v13 = vmul.f32 0.5, %v3935_v15  ;;  %v5151_v60 = vadd.f32 %v5150_v2, %v7853_v59  ;;  %v7924_v19 = vmul.f32 %v5645_v24, %v10527_v47  ;;  %v10534_v2 = vld [vmem:[#allocation123_spill] sm:$0xff] }
 0x27a   :  { %v5082_v41 = vadd.f32 %v5081_v18, %v7822_v20  ;;  %v4703_v33 = vsub.f32 1.0, %v5645_v24  ;;  %v4380_v30 = vmul.f32 %v4316_v36, %v7148_v49  ;;  %v5020_v8 = vmul.f32 %v4956_v21, %v7127_v32  ;;  %v10531_v21 = vld [vmem:[#allocation7_spill] sm:$0xff]  ;;  %v10532_v36 = vld [vmem:[#allocation109_spill] sm:$0xff] }
 0x27b   :  { %v7919_v11 = vadd.f32 %v10526_v31, %v2911_v27  ;;  %v10528_v5 = vsub.f32 1.0, %v10527_v47  ;;  %v2029_v35 = vadd.f32 %v7523_v29, %v7711_v10  ;;  %v4828_v63 = vmul.f32 %v4764_v58, %v7127_v32  ;;  %v10542_v20 = vld [vmem:[#allocation105_spill] sm:$0xff] }
 0x27c   :  { %vm7935_vm4 = vcmp.lt.f32.partialorder %v3999_v42, 1.0  ;;  %v7940_v59 = vmul.f32 %v4703_v33, %v10527_v47  ;;  %v5083_v56 = vadd.f32 %v5082_v41, %v3868_v0  ;;  %v4191_v48 = vmul.f32 %v4127_v13, %v3935_v15  ;;  %v10536_v41 = vld [vmem:[#allocation122_spill] sm:$0xff]  ;;  %v7962_v47 = vpop.f32.mrb[86].mxu1 }
 0x27d   :  { %v7930_v50 = vmul.f32 %v5645_v24, %v10528_v5  ;;  %vm2589_vm7 = vcmp.gt.f32.partialorder %v2029_v35, 0.0  ;;  %v3933_v51 = vsub.f32 %v10531_v21, %v2029_v35  ;;  %v5152_v45 = vadd.f32 %v5151_v60, %v4380_v30 }
 0x27e   :  { %v5709_v24 = vadd.f32 -0.5, %v3999_v42  ;;  %v5643_v53 = vsel %vm2589_vm7, 1.0, %v10360_v37  ;;  %v5221_v62 = vadd.f32 %v5220_v54, %v4636_v40  ;;  %v5290_v10 = vadd.f32 %v5289_v38, %v4828_v63 }
 0x27f   :  { %v2845_v58 = vmul.f32 %v5643_v53, %v10531_v21  ;;  %v3997_v46 = vand.u32 2147483647, %v3933_v51  ;;  %v4125_v1 = vmul.f32 0.5, %v3933_v51  ;;  %v4573_v3 = vmul.f32 %v5643_v53, %v10532_v36 }
 0x280   :  { %v4701_v34 = vsub.f32 1.0, %v5643_v53  ;;  %v10533_v27 = vsub.f32 1.0, %v10532_v36  ;;  %v5359_v15 = vadd.f32 %v5358_v61, %v5020_v8  ;;  %v2040_v0 = vadd.f32 %v7523_v29, %v10534_v2 }
 0x281   :  { %v10535_v42 = vmax.f32 %v10531_v21, 0.0  ;;  %vm4061_vm8 = vcmp.lt.f32.partialorder %v3997_v46, 1.0  ;;  %v4189_v40 = vmul.f32 %v4125_v1, %v3933_v51  ;;  %v5707_v54 = vadd.f32 -0.5, %v3997_v46  ;;  %v10538_v1 = vld [vmem:[#allocation21_spill] sm:$0xff] }
 0x282   :  { %v4957_v18 = vmul.f32 %v5643_v53, %v10533_v27  ;;  %v4637_v38 = vmul.f32 %v4573_v3, %v7127_v32  ;;  %v4765_v28 = vmul.f32 %v4701_v34, %v10532_v36  ;;  %vm2592_vm3 = vcmp.gt.f32.partialorder %v2040_v0, 0.0  ;;  %v10540_v3 = vld [vmem:[#allocation120_spill] sm:$0xff] }
 0x283   :  { %v2909_v12 = vsub.f32 %v10535_v42, %v2845_v58  ;;  %v4317_v31 = vsel %vm4061_vm8, %v4189_v40, %v5707_v54  ;;  %v5646_v13 = vsel %vm2592_vm3, 1.0, %v10360_v37  ;;  %v3322_v60 = vmul.f32 0.6931472, %v10536_v41  ;;  %v10541_v27 = vld [vmem:[#allocation124_spill] sm:$0xff]  ;;  %v8008_v40 = vpop.f32.mrb[87].mxu1 }
 0x284   :  { %v5021_v6 = vmul.f32 %v4957_v18, %v7127_v32  ;;  %v4381_v33 = vmul.f32 %v4317_v31, %v7148_v49  ;;  %v4829_v30 = vmul.f32 %v4765_v28, %v7127_v32  ;;  %v5222_v8 = vadd.f32 %v5221_v62, %v4637_v38  ;;  %v10545_v42 = vld [vmem:[#allocation24_spill] sm:$0xff] }
 0x285   :  { %v3805_v61 = vadd.f32 %v3301_v4, %v2909_v12  ;;  %v2848_v35 = vmul.f32 %v5646_v13, %v7049_v44  ;;  %v7971_v14 = vsub.f32 %v7049_v44, %v2040_v0  ;;  %v4896_v7 = vsub.f32 1.0, %v7809_v25 }
 0x286   :  { %v7966_v5 = vadd.f32 %v5359_v15, %v5021_v6  ;;  %v7974_v4 = vadd.f32 %v5152_v45, %v4381_v33  ;;  %v5291_v63 = vadd.f32 %v5290_v10, %v4829_v30  ;;  %v4576_v21 = vmul.f32 %v5646_v13, %v7809_v25  ;;  %v10544_v15 = vld [vmem:[#allocation8_spill] sm:$0xff] }
 0x287   :  { %v3869_v52 = vmul.f32 %v3805_v61, %v7127_v32  ;;  %v4704_v51 = vsub.f32 1.0, %v5646_v13  ;;  %v4319_v53 = vsel %vm7935_vm4, %v4191_v48, %v5709_v24  ;;  %v10537_v58 = vmax.f32 %v7049_v44, 0.0 }
 0x288   :  { %v10539_v36 = vand.u32 2147483647, %v10538_v1  ;;  %v7989_v10 = vmul.f32 %v5646_v13, %v4896_v7  ;;  %v2032_v18 = vadd.f32 %v7523_v29, %v10541_v27  ;;  %v10543_v48 = vand.u32 2147483647, %v10542_v20 }
 0x289   :  { %v7979_v62 = vadd.f32 %v5083_v56, %v3869_v52  ;;  %v2912_v46 = vsub.f32 %v10537_v58, %v2848_v35  ;;  %v7987_v45 = vmul.f32 %v4704_v51, %v7809_v25  ;;  %v7999_v44 = vmul.f32 %v7919_v11, %v7127_v32  ;;  %v10548_v58 = vld [vmem:[#allocation9_spill] sm:$0xff] }
 0x28a   :  { %vm3327_vm10 = vcmp.lt.f32.partialorder %v10539_v36, 0.0004427343  ;;  %v7995_v56 = vsub.f32 0.0, %v10543_v48  ;;  %v2782_v2 = vmax.f32 %v10544_v15, 0.0  ;;  %v4383_v25 = vmul.f32 %v4319_v53, %v7148_v49 }
 0x28b   :  { %v3328_v34 = vsel %vm3327_vm10, %v10540_v3, %v3322_v60  ;;  %v4639_v0 = vmul.f32 %v7924_v19, %v7127_v32  ;;  %vm2590_vm5 = vcmp.gt.f32.partialorder %v2032_v18, 0.0  ;;  %v3302_v12 = vadd.f32 1.0, %v10545_v42 }
 0x28c   :  { %v8001_v24 = vadd.f32 %v3328_v34, %v2912_v46  ;;  %v5023_v54 = vmul.f32 %v7930_v50, %v7127_v32  ;;  %v4000_v11 = vand.u32 2147483647, %v7971_v14  ;;  %v5644_v38 = vsel %vm2590_vm5, 1.0, %v10360_v37 }
 0x28d   :  { %v3305_v28 = vmul.f32 -0.5, %v10545_v42  ;;  %v4831_v6 = vmul.f32 %v7940_v59, %v7127_v32  ;;  %v4128_v61 = vmul.f32 0.5, %v7971_v14  ;;  %v2846_v19 = vmul.f32 %v5644_v38, %v10544_v15 }
 0x28e   :  { %6374 = vlog2.f32 %v3302_v12  ;;  %v8020_v31 = vmul.f32 %v4576_v21, %v7127_v32  ;;  %v3934_v13 = vsub.f32 %v10544_v15, %v2032_v18  ;;  %vm4446_vm9 = vcmp.gt.f32.partialorder %v10544_v15, 0.0  ;;  %v10549_v18 = vld [vmem:[#allocation25_spill] sm:$0xff] }
 0x28f   :  { %v4702_v50 = vsub.f32 1.0, %v5644_v38  ;;  %v2910_v41 = vsub.f32 %v2782_v2, %v2846_v19  ;;  %v3308_v60 = vand.u32 2147483647, %v10545_v42  ;;  %v4510_v33 = vsel %vm4446_vm9, 1.0, %v10360_v37 }
 0x290   :  { %v2053_v59 = vadd.f32 %v7523_v29, %v7757_v26  ;;  %vm8028_vm12 = vcmp.lt.f32.partialorder %v4000_v11, 1.0  ;;  %v3306_v52 = vadd.f32 1.0, %v3305_v28  ;;  %v3998_v35 = vand.u32 2147483647, %v3934_v13 }
 0x291   :  { %v4126_v7 = vmul.f32 0.5, %v3934_v13  ;;  %v4574_v21 = vmul.f32 %v5644_v38, %v4510_v33  ;;  %v4766_v51 = vmul.f32 %v4702_v50, %v4510_v33  ;;  %v4894_v53 = vsub.f32 1.0, %v4510_v33 }
 0x292   :  { %vm2595_vm11 = vcmp.gt.f32.partialorder %v2053_v59, 0.0  ;;  %v2787_v46 = vmax.f32 %v10548_v58, 0.0  ;;  %vm4062_vm14 = vcmp.lt.f32.partialorder %v3998_v35, 1.0  ;;  %v5708_v36 = vadd.f32 -0.5, %v3998_v35 }
 0x293   :  { %v4190_v1 = vmul.f32 %v4126_v7, %v3934_v13  ;;  %v4638_v3 = vmul.f32 %v4574_v21, %v7127_v32  ;;  %v4830_v26 = vmul.f32 %v4766_v51, %v7127_v32  ;;  %v4958_v34 = vmul.f32 %v5644_v38, %v4894_v53 }
 0x294   :  { %v5649_v27 = vsel %vm2595_vm11, 1.0, %v10360_v37  ;;  %v3347_v48 = vadd.f32 1.0, %v10549_v18  ;;  %v3350_v28 = vmul.f32 -0.5, %v10549_v18  ;;  %v4192_v33 = vmul.f32 %v4128_v61, %v7971_v14 }
 0x295   :  { %v4318_v15 = vsel %vm4062_vm14, %v4190_v1, %v5708_v36  ;;  %v5223_v2 = vadd.f32 %v5222_v8, %v4638_v3  ;;  %v2851_v12 = vmul.f32 %v5649_v27, %v10548_v58  ;;  %v5022_v13 = vmul.f32 %v4958_v34, %v7127_v32  ;;  %v8049_v36 = vpop.f32.mrb[88].mxu1 }
 0x296   :  { %v4382_v19 = vmul.f32 %v4318_v15, %v7148_v49  ;;  %v5292_v50 = vadd.f32 %v5291_v63, %v4830_v26  ;;  %6376 = vlog2.f32 %v3347_v48  ;;  %v5710_v35 = vadd.f32 -0.5, %v4000_v11 }
 0x297   :  { %v8042_v38 = vadd.f32 %v5223_v2, %v4639_v0  ;;  %v2915_v7 = vsub.f32 %v2787_v46, %v2851_v12  ;;  %v5361_v53 = vadd.f32 %v7966_v5, %v5022_v13  ;;  %v3939_v1 = vsub.f32 %v10548_v58, %v2053_v59 }
 0x298   :  { %v6375_v21 = vpop.eup %6374  ;;  %v5154_v51 = vadd.f32 %v7974_v4, %v4382_v19  ;;  %v8045_v8 = vadd.f32 %v5292_v50, %v4831_v6  ;;  %v8053_v63 = vmul.f32 %v7987_v45, %v7127_v32  ;;  %v3307_v0 = vmul.f32 %v10545_v42, %v3306_v52  ;;  %v10550_v19 = vld [vmem:[#allocation10_spill] sm:$0xff]  ;;  %v10551_v50 = vld [vmem:[#allocation28_spill] sm:$0xff] }
 0x299   :  { %v3304_v14 = vmul.f32 0.6931472, %v6375_v21  ;;  %vm4451_vm13 = vcmp.gt.f32.partialorder %v10548_v58, 0.0  ;;  %vm3309_vm15 = vcmp.lt.f32.partialorder %v3308_v60, 0.0004427343  ;;  %v5362_v4 = vadd.f32 %v5361_v53, %v5023_v54  ;;  %v8067_v54 = vpop.f32.mrb[89].mxu1 }
 0x29a   :  { %v5155_v11 = vadd.f32 %v5154_v51, %v4383_v25  ;;  %v3351_v6 = vadd.f32 1.0, %v3350_v28  ;;  %v4515_v5 = vsel %vm4451_vm13, 1.0, %v10360_v37  ;;  %v4707_v46 = vsub.f32 1.0, %v5649_v27 }
 0x29b   :  { %v3310_v61 = vsel %vm3309_vm15, %v3307_v0, %v3304_v14  ;;  %v2045_v59 = vadd.f32 %v7523_v29, %v7770_v57  ;;  %v4320_v45 = vsel %vm8028_vm12, %v4192_v33, %v5710_v35  ;;  %v3353_v26 = vand.u32 2147483647, %v10549_v18 }
 0x29c   :  { %v3806_v3 = vadd.f32 %v3310_v61, %v2910_v41  ;;  %v4003_v42 = vand.u32 2147483647, %v3939_v1  ;;  %v8063_v52 = vmul.f32 %v5649_v27, %v4515_v5  ;;  %v8065_v60 = vmul.f32 %v4707_v46, %v4515_v5 }
 0x29d   :  { %v4899_v25 = vsub.f32 1.0, %v4515_v5  ;;  %vm2593_vm0 = vcmp.gt.f32.partialorder %v2045_v59, 0.0  ;;  %v5024_v58 = vmul.f32 %v7989_v10, %v7127_v32  ;;  %v4131_v34 = vmul.f32 0.5, %v3939_v1 }
 0x29e   :  { %v3870_v57 = vmul.f32 %v3806_v3, %v7127_v32  ;;  %v5647_v30 = vsel %vm2593_vm0, 1.0, %v10360_v37  ;;  %v3872_v41 = vmul.f32 %v8001_v24, %v7127_v32  ;;  %v4384_v48 = vmul.f32 %v4320_v45, %v7148_v49 }
 0x29f   :  { %v3352_v15 = vmul.f32 %v10549_v18, %v3351_v6  ;;  %v8077_v2 = vmul.f32 %v5649_v27, %v4899_v25  ;;  %v2785_v13 = vmax.f32 %v10550_v19, 0.0  ;;  %v2849_v10 = vmul.f32 %v5647_v30, %v10550_v19 }
 0x2a0   :  { %v6377_v12 = vpop.eup %6376  ;;  %v5085_v28 = vadd.f32 %v7979_v62, %v3870_v57  ;;  %v3329_v33 = vadd.f32 1.0, %v10551_v50  ;;  %vm3354_vm2 = vcmp.lt.f32.partialorder %v3353_v26, 0.0004427343  ;;  %vm8083_vm6 = vcmp.lt.f32.partialorder %v4003_v42, 1.0 }
 0x2a1   :  { %v3349_v35 = vmul.f32 0.6931472, %v6377_v12  ;;  %v3937_v24 = vsub.f32 %v10550_v19, %v2045_v59  ;;  %v4195_v18 = vmul.f32 %v4131_v34, %v3939_v1  ;;  %v2913_v51 = vsub.f32 %v2785_v13, %v2849_v10 }
 0x2a2   :  { %v5086_v27 = vadd.f32 %v5085_v28, %v7999_v44  ;;  %6378 = vlog2.f32 %v3329_v33  ;;  %v5713_v53 = vadd.f32 -0.5, %v4003_v42  ;;  %v3332_v61 = vmul.f32 -0.5, %v10551_v50 }
 0x2a3   :  { %v3355_v62 = vsel %vm3354_vm2, %v3352_v15, %v3349_v35  ;;  %v4001_v14 = vand.u32 2147483647, %v3937_v24  ;;  %v4129_v0 = vmul.f32 0.5, %v3937_v24  ;;  %vm4449_vm1 = vcmp.gt.f32.partialorder %v10550_v19, 0.0 }
 0x2a4   :  { %v8089_v6 = vadd.f32 %v3355_v62, %v2915_v7  ;;  %v4705_v5 = vsub.f32 1.0, %v5647_v30  ;;  %v4513_v59 = vsel %vm4449_vm1, 1.0, %v10360_v37  ;;  %v3335_v44 = vand.u32 2147483647, %v10551_v50 }
 0x2a5   :  { %vm4065_vm4 = vcmp.lt.f32.partialorder %v4001_v14, 1.0  ;;  %v4193_v46 = vmul.f32 %v4129_v0, %v3937_v24  ;;  %v5711_v45 = vadd.f32 -0.5, %v4001_v14  ;;  %v4577_v1 = vmul.f32 %v5647_v30, %v4513_v59 }
 0x2a6   :  { %v4769_v3 = vmul.f32 %v4705_v5, %v4513_v59  ;;  %v4897_v26 = vsub.f32 1.0, %v4513_v59  ;;  %v5087_v25 = vadd.f32 %v5086_v27, %v3872_v41  ;;  %v5156_v57 = vadd.f32 %v5155_v11, %v4384_v48 }
 0x2a7   :  { %v4321_v42 = vsel %vm4065_vm4, %v4193_v46, %v5711_v45  ;;  %v5225_v7 = vadd.f32 %v8042_v38, %v8020_v31  ;;  %v4641_v15 = vmul.f32 %v4577_v1, %v7127_v32  ;;  %v3333_v19 = vadd.f32 1.0, %v3332_v61  ;;  %v10554_v38 = vld [vmem:[#allocation29_spill] sm:$0xff] }
 0x2a8   :  { %v4385_v34 = vmul.f32 %v4321_v42, %v7148_v49  ;;  %v4833_v12 = vmul.f32 %v4769_v3, %v7127_v32  ;;  %v4961_v28 = vmul.f32 %v5647_v30, %v4897_v26  ;;  %v5294_v13 = vadd.f32 %v8045_v8, %v8053_v63  ;;  %v8138_v42 = vld [vmem:[%s10143_s5] ss:$0 sm:$0xff] }
 0x2a9   :  { %v5363_v10 = vadd.f32 %v5362_v4, %v5024_v58  ;;  %v2056_v33 = vadd.f32 %v7523_v29, %v7775_v43  ;;  %v8107_v31 = vadd.f32 %v5225_v7, %v4641_v15  ;;  %v3356_v48 = vadd.f32 1.0, %v10554_v38  ;;  %v10555_v43 = vld [vmem:[#allocation11_spill] sm:$0xff]  ;;  %v10557_v15 = vld [vmem:[#allocation30_spill] sm:$0xff] }
 0x2aa   :  { %v5025_v11 = vmul.f32 %v4961_v28, %v7127_v32  ;;  %v8105_v41 = vadd.f32 %v5156_v57, %v4385_v34  ;;  %v4323_v35 = vsel %vm8083_vm6, %v4195_v18, %v5713_v53  ;;  %v8112_v30 = vadd.f32 %v5294_v13, %v4833_v12  ;;  %v8122_v18 = vpop.f32.mrb[90].mxu1  ;;  %v10556_v53 = vld [vmem:[#allocation112_spill] sm:$0xff] }
 0x2ab   :  { %vm2596_vm7 = vcmp.gt.f32.partialorder %v2056_v33, 0.0  ;;  %v3359_v8 = vmul.f32 -0.5, %v10554_v38  ;;  %6380 = vlog2.f32 %v3356_v48  ;;  %v3940_v58 = vsub.f32 %v10555_v43, %v2056_v33  ;;  %v10560_v48 = vld [vmem:[#allocation12_spill] sm:$0xff] }
 0x2ac   :  { %v6379_v63 = vpop.eup %6378  ;;  %v8115_v4 = vadd.f32 %v5363_v10, %v5025_v11  ;;  %v5650_v29 = vsel %vm2596_vm7, 1.0, %v10360_v37  ;;  %v3334_v27 = vmul.f32 %v10551_v50, %v3333_v19  ;;  %v2788_v62 = vmax.f32 %v10555_v43, 0.0 }
 0x2ad   :  { %v3331_v24 = vmul.f32 0.6931472, %v6379_v63  ;;  %v2852_v21 = vmul.f32 %v5650_v29, %v10555_v43  ;;  %6382 = vpow2.f32 %v10556_v53  ;;  %vm3336_vm8 = vcmp.lt.f32.partialorder %v3335_v44, 0.0004427343 }
 0x2ae   :  { %vm4452_vm3 = vcmp.gt.f32.partialorder %v10555_v43, 0.0  ;;  %v4708_v14 = vsub.f32 1.0, %v5650_v29  ;;  %v3362_v5 = vand.u32 2147483647, %v10554_v38  ;;  %v8129_v50 = vmul.f32 %v4323_v35, %v7148_v49 }
 0x2af   :  { %v3337_v0 = vsel %vm3336_vm8, %v3334_v27, %v3331_v24  ;;  %v2916_v61 = vsub.f32 %v2788_v62, %v2852_v21  ;;  %v4516_v46 = vsel %vm4452_vm3, 1.0, %v10360_v37  ;;  %v3360_v59 = vadd.f32 1.0, %v3359_v8 }
 0x2b0   :  { %v3809_v45 = vadd.f32 %v3337_v0, %v2913_v51  ;;  %v4132_v1 = vmul.f32 0.5, %v3940_v58  ;;  %v8131_v3 = vmul.f32 %v5650_v29, %v4516_v46  ;;  %v8133_v26 = vmul.f32 %v4708_v14, %v4516_v46 }
 0x2b1   :  { %v4900_v44 = vsub.f32 1.0, %v4516_v46  ;;  %v2048_v57 = vadd.f32 %v8138_v42, %v7780_v22  ;;  %v4643_v7 = vmul.f32 %v8063_v52, %v7127_v32  ;;  %v4835_v51 = vmul.f32 %v8065_v60, %v7127_v32  ;;  %v8161_v60 = vpop.f32.mrb[91].mxu1 }
 0x2b2   :  { %v3873_v34 = vmul.f32 %v3809_v45, %v7127_v32  ;;  %v3338_v12 = vadd.f32 1.0, %v10557_v15  ;;  %v8150_v28 = vmul.f32 %v8077_v2, %v7127_v32  ;;  %vm8152_vm10 = vcmp.lt.f32.partialorder %v3362_v5, 0.0004427343 }
 0x2b3   :  { %v4004_v13 = vand.u32 2147483647, %v3940_v58  ;;  %v8156_v22 = vmul.f32 %v5650_v29, %v4900_v44  ;;  %vm2594_vm5 = vcmp.gt.f32.partialorder %v2048_v57, 0.0  ;;  %v3341_v52 = vmul.f32 -0.5, %v10557_v15 }
 0x2b4   :  { %v8158_v10 = vadd.f32 %v5087_v25, %v3873_v34  ;;  %6384 = vlog2.f32 %v3338_v12  ;;  %v3361_v33 = vmul.f32 %v10554_v38, %v3360_v59  ;;  %v8164_v11 = vmul.f32 %v4132_v1, %v3940_v58  ;;  %v10563_v12 = vld [vmem:[#allocation33_spill] sm:$0xff] }
 0x2b5   :  { %v5648_v2 = vsel %vm2594_vm5, 1.0, %v10360_v37  ;;  %v3938_v35 = vsub.f32 %v10560_v48, %v2048_v57  ;;  %v6381_v8 = vpop.eup %6380  ;;  %v2786_v63 = vmax.f32 %v10560_v48, 0.0  ;;  %vm4450_vm9 = vcmp.gt.f32.partialorder %v10560_v48, 0.0 }
 0x2b6   :  { %v2850_v25 = vmul.f32 %v5648_v2, %v10560_v48  ;;  %v4706_v29 = vsub.f32 1.0, %v5648_v2  ;;  %v3358_v43 = vmul.f32 0.6931472, %v6381_v8  ;;  %vm8171_vm12 = vcmp.lt.f32.partialorder %v4004_v13, 1.0 }
 0x2b7   :  { %v5714_v38 = vadd.f32 -0.5, %v4004_v13  ;;  %v4002_v58 = vand.u32 2147483647, %v3938_v35  ;;  %v2069_v27 = vadd.f32 %v8138_v42, %v7804_v9  ;;  %v8177_v62 = vpop.eup %6382  ;;  %v3342_v53 = vadd.f32 1.0, %v3341_v52 }
 0x2b8   :  { %v2914_v21 = vsub.f32 %v2786_v63, %v2850_v25  ;;  %v4130_v14 = vmul.f32 0.5, %v3938_v35  ;;  %v4514_v0 = vsel %vm4450_vm9, 1.0, %v10360_v37  ;;  %v3364_v5 = vsel %vm8152_vm10, %v3361_v33, %v3358_v43  ;;  %v10564_v43 = vld [vmem:[#allocation13_spill] sm:$0xff] }
 0x2b9   :  { %vm4066_vm11 = vcmp.lt.f32.partialorder %v4002_v58, 1.0  ;;  %v5712_v46 = vadd.f32 -0.5, %v4002_v58  ;;  %v4578_v45 = vmul.f32 %v5648_v2, %v4514_v0  ;;  %v3812_v59 = vadd.f32 %v3364_v5, %v2916_v61 }
 0x2ba   :  { %v4194_v1 = vmul.f32 %v4130_v14, %v3938_v35  ;;  %v4770_v44 = vmul.f32 %v4706_v29, %v4514_v0  ;;  %v4898_v57 = vsub.f32 1.0, %v4514_v0  ;;  %v3344_v34 = vand.u32 2147483647, %v10557_v15 }
 0x2bb   :  { %v4642_v9 = vmul.f32 %v4578_v45, %v7127_v32  ;;  %vm2599_vm14 = vcmp.gt.f32.partialorder %v2069_v27, 0.0  ;;  %v3383_v13 = vadd.f32 1.0, %v10563_v12  ;;  %v3343_v52 = vmul.f32 %v10557_v15, %v3342_v53  ;;  %v8201_v45 = vpop.f32.mrb[92].mxu1 }
 0x2bc   :  { %v4322_v48 = vsel %vm4066_vm11, %v4194_v1, %v5712_v46  ;;  %v4834_v19 = vmul.f32 %v4770_v44, %v7127_v32  ;;  %v4962_v33 = vmul.f32 %v5648_v2, %v4898_v57  ;;  %v5653_v35 = vsel %vm2599_vm14, 1.0, %v10360_v37 }
 0x2bd   :  { %v4386_v8 = vmul.f32 %v4322_v48, %v7148_v49  ;;  %v5227_v61 = vadd.f32 %v8107_v31, %v4642_v9  ;;  %6386 = vlog2.f32 %v3383_v13  ;;  %v2791_v58 = vmax.f32 %v10564_v43, 0.0 }
 0x2be   :  { %v6385_v63 = vpop.eup %6384  ;;  %v5026_v25 = vmul.f32 %v4962_v33, %v7127_v32  ;;  %v5296_v29 = vadd.f32 %v8112_v30, %v4834_v19  ;;  %v2855_v15 = vmul.f32 %v5653_v35, %v10564_v43  ;;  %v3386_v0 = vmul.f32 -0.5, %v10563_v12  ;;  %v10565_v30 = vld [vmem:[#allocation113_spill] sm:$0xff] }
 0x2bf   :  { %v3340_v53 = vmul.f32 0.6931472, %v6385_v63  ;;  %v5158_v14 = vadd.f32 %v8105_v41, %v4386_v8  ;;  %v8195_v2 = vadd.f32 %v5227_v61, %v4643_v7  ;;  %vm3345_vm13 = vcmp.lt.f32.partialorder %v3344_v34, 0.0004427343 }
 0x2c0   :  { %v8198_v31 = vadd.f32 %v5296_v29, %v4835_v51  ;;  %v5365_v5 = vadd.f32 %v8115_v4, %v5026_v25  ;;  %v2919_v46 = vsub.f32 %v2791_v58, %v2855_v15  ;;  %v8204_v1 = vmul.f32 1.442695, %v10565_v30 }
 0x2c1   :  { %v3346_v44 = vsel %vm3345_vm13, %v3343_v52, %v3340_v53  ;;  %v5159_v57 = vadd.f32 %v5158_v14, %v8129_v50  ;;  %v3943_v41 = vsub.f32 %v10564_v43, %v2069_v27  ;;  %v4324_v7 = vsel %vm8171_vm12, %v8164_v11, %v5714_v38  ;;  %v10567_v14 = vld [vmem:[#allocation34_spill] sm:$0xff] }
 0x2c2   :  { %v3810_v34 = vadd.f32 %v3346_v44, %v2914_v21  ;;  %v8212_v51 = vadd.f32 %v5365_v5, %v8150_v28  ;;  %vm4455_vm15 = vcmp.gt.f32.partialorder %v10564_v43, 0.0  ;;  %v3875_v4 = vmul.f32 %v8089_v6, %v7127_v32  ;;  %v8229_v21 = vpop.f32.mrb[93].mxu1 }
 0x2c3   :  { %v3387_v9 = vadd.f32 1.0, %v3386_v0  ;;  %v4519_v13 = vsel %vm4455_vm15, 1.0, %v10360_v37  ;;  %v4711_v52 = vsub.f32 1.0, %v5653_v35  ;;  %v2061_v11 = vadd.f32 %v8138_v42, %v7811_v23 }
 0x2c4   :  { %v3874_v50 = vmul.f32 %v3810_v34, %v7127_v32  ;;  %v8219_v27 = vmul.f32 %v5653_v35, %v4519_v13  ;;  %v4903_v48 = vsub.f32 1.0, %v4519_v13  ;;  %v4388_v28 = vmul.f32 %v4324_v7, %v7148_v49 }
 0x2c5   :  { %v4644_v24 = vmul.f32 %v8131_v3, %v7127_v32  ;;  %v3389_v38 = vand.u32 2147483647, %v10563_v12  ;;  %v8227_v6 = vmul.f32 %v4711_v52, %v4519_v13  ;;  %v4007_v33 = vand.u32 2147483647, %v3943_v41 }
 0x2c6   :  { %v5089_v19 = vadd.f32 %v8158_v10, %v3874_v50  ;;  %v8232_v8 = vmul.f32 %v5653_v35, %v4903_v48  ;;  %vm2597_vm0 = vcmp.gt.f32.partialorder %v2061_v11, 0.0  ;;  %v4836_v23 = vmul.f32 %v8133_v26, %v7127_v32  ;;  %v10566_v35 = vld [vmem:[#allocation14_spill] sm:$0xff] }
 0x2c7   :  { %v6387_v61 = vpop.eup %6386  ;;  %v5028_v63 = vmul.f32 %v8156_v22, %v7127_v32  ;;  %v4135_v3 = vmul.f32 0.5, %v3943_v41  ;;  %v5651_v25 = vsel %vm2597_vm0, 1.0, %v10360_v37  ;;  %v3876_v29 = vmul.f32 %v3812_v59, %v7127_v32 }
 0x2c8   :  { %v5090_v43 = vadd.f32 %v5089_v19, %v3875_v4  ;;  %v3385_v58 = vmul.f32 0.6931472, %v6387_v61  ;;  %v3388_v10 = vmul.f32 %v10563_v12, %v3387_v9  ;;  %vm3390_vm2 = vcmp.lt.f32.partialorder %v3389_v38, 0.0004427343 }
 0x2c9   :  { %v2789_v15 = vmax.f32 %v10566_v35, 0.0  ;;  %v2853_v53 = vmul.f32 %v5651_v25, %v10566_v35  ;;  %v3365_v0 = vadd.f32 1.0, %v10567_v14  ;;  %vm8244_vm6 = vcmp.lt.f32.partialorder %v4007_v33, 1.0 }
 0x2ca   :  { %v3391_v26 = vsel %vm3390_vm2, %v3388_v10, %v3385_v58  ;;  %v3941_v22 = vsub.f32 %v10566_v35, %v2061_v11  ;;  %vm4453_vm1 = vcmp.gt.f32.partialorder %v10566_v35, 0.0  ;;  %v4709_v59 = vsub.f32 1.0, %v5651_v25 }
 0x2cb   :  { %v8250_v30 = vadd.f32 %v3391_v26, %v2919_v46  ;;  %v4199_v12 = vmul.f32 %v4135_v3, %v3943_v41  ;;  %v2917_v44 = vsub.f32 %v2789_v15, %v2853_v53  ;;  %6388 = vlog2.f32 %v3365_v0 }
 0x2cc   :  { %v5717_v7 = vadd.f32 -0.5, %v4007_v33  ;;  %v4005_v34 = vand.u32 2147483647, %v3941_v22  ;;  %v4133_v4 = vmul.f32 0.5, %v3941_v22  ;;  %v4517_v9 = vsel %vm4453_vm1, 1.0, %v10360_v37 }
 0x2cd   :  { %v3368_v13 = vmul.f32 -0.5, %v10567_v14  ;;  %v3371_v52 = vand.u32 2147483647, %v10567_v14  ;;  %v4581_v50 = vmul.f32 %v5651_v25, %v4517_v9  ;;  %v4773_v48 = vmul.f32 %v4709_v59, %v4517_v9 }
 0x2ce   :  { %vm4069_vm4 = vcmp.lt.f32.partialorder %v4005_v34, 1.0  ;;  %v4197_v11 = vmul.f32 %v4133_v4, %v3941_v22  ;;  %v5715_v38 = vadd.f32 -0.5, %v4005_v34  ;;  %v4901_v19 = vsub.f32 1.0, %v4517_v9 }
 0x2cf   :  { %v4645_v46 = vmul.f32 %v4581_v50, %v7127_v32  ;;  %v4837_v41 = vmul.f32 %v4773_v48, %v7127_v32  ;;  %v5091_v61 = vadd.f32 %v5090_v43, %v3876_v29  ;;  %v5160_v33 = vadd.f32 %v5159_v57, %v4388_v28  ;;  %v10570_v57 = vld [vmem:[#allocation37_spill] sm:$0xff] }
 0x2d0   :  { %v4325_v3 = vsel %vm4069_vm4, %v4197_v11, %v5715_v38  ;;  %v4965_v58 = vmul.f32 %v5651_v25, %v4901_v19  ;;  %v5229_v10 = vadd.f32 %v8195_v2, %v4644_v24  ;;  %v5298_v35 = vadd.f32 %v8198_v31, %v4836_v23  ;;  %v10571_v25 = vld [vmem:[#allocation95_spill] sm:$0xff] }
 0x2d1   :  { %v3369_v15 = vadd.f32 1.0, %v3368_v13  ;;  %v4389_v53 = vmul.f32 %v4325_v3, %v7148_v49  ;;  %v5367_v0 = vadd.f32 %v8212_v51, %v5028_v63  ;;  %v2072_v26 = vadd.f32 %v8138_v42, %v7819_v55  ;;  %v10573_v23 = vld [vmem:[#allocation15_spill] sm:$0xff]  ;;  %v8285_v13 = vpop.f32.mrb[94].mxu1 }
 0x2d2   :  { %v5029_v22 = vmul.f32 %v4965_v58, %v7127_v32  ;;  %v8264_v59 = vadd.f32 %v5229_v10, %v4645_v46  ;;  %v8266_v29 = vadd.f32 %v5298_v35, %v4837_v41  ;;  %v3392_v28 = vadd.f32 1.0, %v10570_v57 }
 0x2d3   :  { %v8271_v2 = vadd.f32 %v8138_v42, %v10571_v25  ;;  %v8273_v31 = vadd.f32 %v5160_v33, %v4389_v53  ;;  %vm2600_vm7 = vcmp.gt.f32.partialorder %v2072_v26, 0.0  ;;  %v3395_v51 = vmul.f32 -0.5, %v10570_v57  ;;  %v10574_v53 = vld [vmem:[#allocation39_spill] sm:$0xff] }
 0x2d4   :  { %v8276_v24 = vadd.f32 %v5367_v0, %v5029_v22  ;;  %v5654_v55 = vsel %vm2600_vm7, 1.0, %v10360_v37  ;;  %6390 = vlog2.f32 %v3392_v28  ;;  %v3944_v63 = vsub.f32 %v10573_v23, %v2072_v26  ;;  %v8319_v28 = vpop.f32.mrb[95].mxu1 }
 0x2d5   :  { %10572 = vst [vmem:[#allocation44_spill] sm:$0xff] %v8271_v2  ;;  %v6389_v43 = vpop.eup %6388  ;;  %v4327_v34 = vsel %vm8244_vm6, %v4199_v12, %v5717_v7  ;;  %v2792_v4 = vmax.f32 %v10573_v23, 0.0  ;;  %v2856_v9 = vmul.f32 %v5654_v55, %v10573_v23  ;;  %vm4456_vm8 = vcmp.gt.f32.partialorder %v10573_v23, 0.0  ;;  %v10577_v23 = vld [vmem:[#allocation16_spill] sm:$0xff] }
 0x2d6   :  { %v3367_v50 = vmul.f32 0.6931472, %v6389_v43  ;;  %v3370_v48 = vmul.f32 %v10567_v14, %v3369_v15  ;;  %vm3372_vm3 = vcmp.lt.f32.partialorder %v3371_v52, 0.0004427343  ;;  %v4520_v11 = vsel %vm4456_vm8, 1.0, %v10360_v37 }
 0x2d7   :  { %v2920_v38 = vsub.f32 %v2792_v4, %v2856_v9  ;;  %v3398_v19 = vand.u32 2147483647, %v10570_v57  ;;  %v8290_v46 = vmul.f32 %v5654_v55, %v4520_v11  ;;  %v4712_v5 = vsub.f32 1.0, %v5654_v55 }
 0x2d8   :  { %v8294_v12 = vmul.f32 %v8219_v27, %v7127_v32  ;;  %v8298_v7 = vmul.f32 %v8227_v6, %v7127_v32  ;;  %v3373_v41 = vsel %vm3372_vm3, %v3370_v48, %v3367_v50  ;;  %v3396_v33 = vadd.f32 1.0, %v3395_v51 }
 0x2d9   :  { %v3813_v14 = vadd.f32 %v3373_v41, %v2917_v44  ;;  %v4136_v52 = vmul.f32 0.5, %v3944_v63  ;;  %v8300_v3 = vmul.f32 %v4712_v5, %v4520_v11  ;;  %v4904_v58 = vsub.f32 1.0, %v4520_v11 }
 0x2da   :  { %v4391_v10 = vmul.f32 %v4327_v34, %v7148_v49  ;;  %v4008_v35 = vand.u32 2147483647, %v3944_v63  ;;  %v2064_v15 = vadd.f32 %v8138_v42, %v7829_v39  ;;  %v3374_v27 = vadd.f32 1.0, %v10574_v53 }
 0x2db   :  { %v8308_v0 = vmul.f32 %v8232_v8, %v7127_v32  ;;  %v3877_v6 = vmul.f32 %v3813_v14, %v7127_v32  ;;  %vm8311_vm10 = vcmp.lt.f32.partialorder %v3398_v19, 0.0004427343  ;;  %v8315_v26 = vmul.f32 %v5654_v55, %v4904_v58 }
 0x2dc   :  { %v3397_v22 = vmul.f32 %v10570_v57, %v3396_v33  ;;  %vm2598_vm5 = vcmp.gt.f32.partialorder %v2064_v15, 0.0  ;;  %6392 = vlog2.f32 %v3374_v27  ;;  %v3377_v39 = vmul.f32 -0.5, %v10574_v53 }
 0x2dd   :  { %v8321_v25 = vadd.f32 %v5091_v61, %v3877_v6  ;;  %v8323_v8 = vmul.f32 %v4136_v52, %v3944_v63  ;;  %v5652_v51 = vsel %vm2598_vm5, 1.0, %v10360_v37  ;;  %v3942_v43 = vsub.f32 %v10577_v23, %v2064_v15 }
 0x2de   :  { %v6391_v34 = vpop.eup %6390  ;;  %v8327_v4 = vadd.f32 -0.5, %v4008_v35  ;;  %v2790_v55 = vmax.f32 %v10577_v23, 0.0  ;;  %v2854_v57 = vmul.f32 %v5652_v51, %v10577_v23  ;;  %vm4454_vm9 = vcmp.gt.f32.partialorder %v10577_v23, 0.0 }
 0x2df   :  { %v3394_v9 = vmul.f32 0.6931472, %v6391_v34  ;;  %vm8332_vm12 = vcmp.lt.f32.partialorder %v4008_v35, 1.0  ;;  %v4006_v61 = vand.u32 2147483647, %v3942_v43  ;;  %v4134_v63 = vmul.f32 0.5, %v3942_v43 }
 0x2e0   :  { %v4518_v48 = vsel %vm4454_vm9, 1.0, %v10360_v37  ;;  %v2918_v11 = vsub.f32 %v2790_v55, %v2854_v57  ;;  %v3378_v19 = vadd.f32 1.0, %v3377_v39  ;;  %v4710_v41 = vsub.f32 1.0, %v5652_v51  ;;  %v10580_v39 = vld [vmem:[#allocation42_spill] sm:$0xff] }
 0x2e1   :  { %v4582_v5 = vmul.f32 %v5652_v51, %v4518_v48  ;;  %v3400_v33 = vsel %vm8311_vm10, %v3397_v22, %v3394_v9  ;;  %vm4070_vm11 = vcmp.lt.f32.partialorder %v4006_v61, 1.0  ;;  %v4198_v14 = vmul.f32 %v4134_v63, %v3942_v43  ;;  %v10581_v9 = vld [vmem:[#allocation17_spill] sm:$0xff] }
 0x2e2   :  { %v5716_v52 = vadd.f32 -0.5, %v4006_v61  ;;  %v3816_v58 = vadd.f32 %v3400_v33, %v2920_v38  ;;  %v4774_v15 = vmul.f32 %v4710_v41, %v4518_v48  ;;  %v4902_v27 = vsub.f32 1.0, %v4518_v48 }
 0x2e3   :  { %v4646_v35 = vmul.f32 %v4582_v5, %v7127_v32  ;;  %v3380_v6 = vand.u32 2147483647, %v10574_v53  ;;  %v2085_v34 = vadd.f32 %v8138_v42, %v7869_v17  ;;  %v3419_v55 = vadd.f32 1.0, %v10580_v39 }
 0x2e4   :  { %v4326_v23 = vsel %vm4070_vm11, %v4198_v14, %v5716_v52  ;;  %v3379_v57 = vmul.f32 %v10574_v53, %v3378_v19  ;;  %v4838_v22 = vmul.f32 %v4774_v15, %v7127_v32  ;;  %v4966_v43 = vmul.f32 %v5652_v51, %v4902_v27  ;;  %v8364_v52 = vpop.f32.mrb[96].mxu1 }
 0x2e5   :  { %v4390_v44 = vmul.f32 %v4326_v23, %v7148_v49  ;;  %v5231_v38 = vadd.f32 %v8264_v59, %v4646_v35  ;;  %vm2603_vm14 = vcmp.gt.f32.partialorder %v2085_v34, 0.0  ;;  %v2795_v61 = vmax.f32 %v10581_v9, 0.0 }
 0x2e6   :  { %6394 = vlog2.f32 %v3419_v55  ;;  %v6393_v63 = vpop.eup %6392  ;;  %v5030_v48 = vmul.f32 %v4966_v43, %v7127_v32  ;;  %v5300_v5 = vadd.f32 %v8266_v29, %v4838_v22  ;;  %v5657_v53 = vsel %vm2603_vm14, 1.0, %v10360_v37  ;;  %v10582_v29 = vld [vmem:[#allocation114_spill] sm:$0xff] }
 0x2e7   :  { %v5162_v17 = vadd.f32 %v8273_v31, %v4390_v44  ;;  %v3376_v19 = vmul.f32 0.6931472, %v6393_v63  ;;  %v8354_v41 = vadd.f32 %v5231_v38, %v8294_v12  ;;  %v2859_v51 = vmul.f32 %v5657_v53, %v10581_v9 }
 0x2e8   :  { %v3422_v59 = vmul.f32 -0.5, %v10580_v39  ;;  %vm3381_vm13 = vcmp.lt.f32.partialorder %v3380_v6, 0.0004427343  ;;  %v8361_v14 = vadd.f32 %v5300_v5, %v8298_v7  ;;  %v5369_v31 = vadd.f32 %v8276_v24, %v5030_v48 }
 0x2e9   :  { %v8358_v33 = vadd.f32 %v5162_v17, %v4391_v10  ;;  %6396 = vpow2.f32 %v10582_v29  ;;  %v3382_v35 = vsel %vm3381_vm13, %v3379_v57, %v3376_v19  ;;  %v2923_v15 = vsub.f32 %v2795_v61, %v2859_v51 }
 0x2ea   :  { %v3947_v12 = vsub.f32 %v10581_v9, %v2085_v34  ;;  %v4328_v27 = vsel %vm8332_vm12, %v8323_v8, %v8327_v4  ;;  %v3814_v10 = vadd.f32 %v3382_v35, %v2918_v11  ;;  %v8373_v6 = vadd.f32 %v5369_v31, %v8308_v0  ;;  %v8390_v11 = vpop.f32.mrb[97].mxu1 }
 0x2eb   :  { %vm4459_vm15 = vcmp.gt.f32.partialorder %v10581_v9, 0.0  ;;  %v3879_v24 = vmul.f32 %v8250_v30, %v7127_v32  ;;  %v3423_v7 = vadd.f32 1.0, %v3422_v59  ;;  %v4715_v55 = vsub.f32 1.0, %v5657_v53  ;;  %v10584_v59 = vld [vmem:[#allocation43_spill] sm:$0xff] }
 0x2ec   :  { %v4523_v23 = vsel %vm4459_vm15, 1.0, %v10360_v37  ;;  %v3878_v34 = vmul.f32 %v3814_v10, %v7127_v32  ;;  %v2077_v8 = vadd.f32 %v8138_v42, %v7892_v16  ;;  %v4392_v0 = vmul.f32 %v4328_v27, %v7148_v49 }
 0x2ed   :  { %v8380_v57 = vmul.f32 %v5657_v53, %v4523_v23  ;;  %v4907_v44 = vsub.f32 1.0, %v4523_v23  ;;  %v4648_v4 = vmul.f32 %v8290_v46, %v7127_v32  ;;  %v3425_v50 = vand.u32 2147483647, %v10580_v39 }
 0x2ee   :  { %v8388_v30 = vmul.f32 %v4715_v55, %v4523_v23  ;;  %v5093_v22 = vadd.f32 %v8321_v25, %v3878_v34  ;;  %v4011_v43 = vand.u32 2147483647, %v3947_v12  ;;  %vm2601_vm0 = vcmp.gt.f32.partialorder %v2077_v8, 0.0 }
 0x2ef   :  { %v8393_v38 = vmul.f32 %v5657_v53, %v4907_v44  ;;  %v4840_v16 = vmul.f32 %v8300_v3, %v7127_v32  ;;  %v5032_v61 = vmul.f32 %v8315_v26, %v7127_v32  ;;  %v4139_v46 = vmul.f32 0.5, %v3947_v12  ;;  %v10583_v53 = vld [vmem:[#allocation18_spill] sm:$0xff] }
 0x2f0   :  { %v6395_v9 = vpop.eup %6394  ;;  %v5655_v63 = vsel %vm2601_vm0, 1.0, %v10360_v37  ;;  %v3880_v48 = vmul.f32 %v3816_v58, %v7127_v32  ;;  %v5094_v17 = vadd.f32 %v5093_v22, %v3879_v24  ;;  %v3424_v25 = vmul.f32 %v10580_v39, %v3423_v7 }
 0x2f1   :  { %v3421_v5 = vmul.f32 0.6931472, %v6395_v9  ;;  %vm3426_vm2 = vcmp.lt.f32.partialorder %v3425_v50, 0.0004427343  ;;  %v2793_v19 = vmax.f32 %v10583_v53, 0.0  ;;  %v2857_v51 = vmul.f32 %v5655_v63, %v10583_v53 }
 0x2f2   :  { %v3401_v31 = vadd.f32 1.0, %v10584_v59  ;;  %vm8405_vm6 = vcmp.lt.f32.partialorder %v4011_v43, 1.0  ;;  %v3945_v26 = vsub.f32 %v10583_v53, %v2077_v8  ;;  %vm4457_vm1 = vcmp.gt.f32.partialorder %v10583_v53, 0.0 }
 0x2f3   :  { %v3427_v3 = vsel %vm3426_vm2, %v3424_v25, %v3421_v5  ;;  %v4713_v58 = vsub.f32 1.0, %v5655_v63  ;;  %v8411_v35 = vpop.eup %6396  ;;  %v4203_v27 = vmul.f32 %v4139_v46, %v3947_v12  ;;  %v2921_v10 = vsub.f32 %v2793_v19, %v2857_v51 }
 0x2f4   :  { %10587 = vst [vmem:[#allocation2_spill] sm:$0xff] %v8411_v35  ;;  %v8413_v39 = vadd.f32 %v3427_v3, %v2923_v15  ;;  %6398 = vlog2.f32 %v3401_v31  ;;  %v5721_v24 = vadd.f32 -0.5, %v4011_v43  ;;  %v4009_v7 = vand.u32 2147483647, %v3945_v26 }
 0x2f5   :  { %v4137_v23 = vmul.f32 0.5, %v3945_v26  ;;  %v4521_v55 = vsel %vm4457_vm1, 1.0, %v10360_v37  ;;  %v3404_v34 = vmul.f32 -0.5, %v10584_v59  ;;  %v3407_v44 = vand.u32 2147483647, %v10584_v59 }
 0x2f6   :  { %v4585_v8 = vmul.f32 %v5655_v63, %v4521_v55  ;;  %v4777_v50 = vmul.f32 %v4713_v58, %v4521_v55  ;;  %vm4073_vm4 = vcmp.lt.f32.partialorder %v4009_v7, 1.0  ;;  %v5719_v9 = vadd.f32 -0.5, %v4009_v7 }
 0x2f7   :  { %v4201_v22 = vmul.f32 %v4137_v23, %v3945_v26  ;;  %v4905_v5 = vsub.f32 1.0, %v4521_v55  ;;  %v5095_v46 = vadd.f32 %v5094_v17, %v3880_v48  ;;  %v5164_v43 = vadd.f32 %v8358_v33, %v4392_v0  ;;  %v10588_v33 = vld [vmem:[#allocation45_spill] sm:$0xff] }
 0x2f8   :  { %v4649_v15 = vmul.f32 %v4585_v8, %v7127_v32  ;;  %v4841_v12 = vmul.f32 %v4777_v50, %v7127_v32  ;;  %v5233_v19 = vadd.f32 %v8354_v41, %v4648_v4  ;;  %v5302_v51 = vadd.f32 %v8361_v14, %v4840_v16  ;;  %v10589_v16 = vld [vmem:[#allocation19_spill] sm:$0xff] }
 0x2f9   :  { %v4329_v25 = vsel %vm4073_vm4, %v4201_v22, %v5719_v9  ;;  %v4969_v53 = vmul.f32 %v5655_v63, %v4905_v5  ;;  %v3405_v31 = vadd.f32 1.0, %v3404_v34  ;;  %v5371_v26 = vadd.f32 %v8373_v6, %v5032_v61  ;;  %v8448_v34 = vpop.f32.mrb[98].mxu1 }
 0x2fa   :  { %v4393_v3 = vmul.f32 %v4329_v25, %v7148_v49  ;;  %v2088_v58 = vadd.f32 %v8138_v42, %v7962_v47  ;;  %v8428_v23 = vadd.f32 %v5233_v19, %v4649_v15  ;;  %v8430_v48 = vadd.f32 %v5302_v51, %v4841_v12 }
 0x2fb   :  { %v5033_v7 = vmul.f32 %v4969_v53, %v7127_v32  ;;  %v3428_v0 = vadd.f32 1.0, %v10588_v33  ;;  %v8434_v41 = vmul.f32 1.442695, %v7995_v56  ;;  %v3431_v4 = vmul.f32 -0.5, %v10588_v33 }
 0x2fc   :  { %v8436_v14 = vadd.f32 %v5164_v43, %v4393_v3  ;;  %vm2604_vm7 = vcmp.gt.f32.partialorder %v2088_v58, 0.0  ;;  %v3948_v61 = vsub.f32 %v10589_v16, %v2088_v58  ;;  %v4331_v17 = vsel %vm8405_vm6, %v4203_v27, %v5721_v24  ;;  %v10590_v3 = vld [vmem:[#allocation47_spill] sm:$0xff] }
 0x2fd   :  { %v8439_v6 = vadd.f32 %v5371_v26, %v5033_v7  ;;  %v5658_v47 = vsel %vm2604_vm7, 1.0, %v10360_v37  ;;  %6400 = vlog2.f32 %v3428_v0  ;;  %v2796_v55 = vmax.f32 %v10589_v16, 0.0  ;;  %v8482_v0 = vpop.f32.mrb[99].mxu1 }
 0x2fe   :  { %v6399_v63 = vpop.eup %6398  ;;  %v2860_v56 = vmul.f32 %v5658_v47, %v10589_v16  ;;  %vm4460_vm8 = vcmp.gt.f32.partialorder %v10589_v16, 0.0  ;;  %v3406_v50 = vmul.f32 %v10584_v59, %v3405_v31  ;;  %vm3408_vm3 = vcmp.lt.f32.partialorder %v3407_v44, 0.0004427343 }
 0x2ff   :  { %v3403_v8 = vmul.f32 0.6931472, %v6399_v63  ;;  %v4524_v22 = vsel %vm4460_vm8, 1.0, %v10360_v37  ;;  %v3434_v5 = vand.u32 2147483647, %v10588_v33  ;;  %v4716_v29 = vsub.f32 1.0, %v5658_v47 }
 0x300   :  { %v2924_v9 = vsub.f32 %v2796_v55, %v2860_v56  ;;  %v8453_v15 = vmul.f32 %v5658_v47, %v4524_v22  ;;  %v8457_v27 = vmul.f32 %v8380_v57, %v7127_v32  ;;  %v8461_v24 = vmul.f32 %v8388_v30, %v7127_v32  ;;  %v10593_v63 = vld [vmem:[#allocation20_spill] sm:$0xff] }
 0x301   :  { %v3409_v12 = vsel %vm3408_vm3, %v3406_v50, %v3403_v8  ;;  %v3432_v43 = vadd.f32 1.0, %v3431_v4  ;;  %v4140_v44 = vmul.f32 0.5, %v3948_v61  ;;  %v8463_v25 = vmul.f32 %v4716_v29, %v4524_v22 }
 0x302   :  { %v3817_v59 = vadd.f32 %v3409_v12, %v2921_v10  ;;  %v4908_v53 = vsub.f32 1.0, %v4524_v22  ;;  %v4395_v19 = vmul.f32 %v4331_v17, %v7148_v49  ;;  %v4012_v51 = vand.u32 2147483647, %v3948_v61 }
 0x303   :  { %v2080_v31 = vadd.f32 %v8138_v42, %v8008_v40  ;;  %v3410_v57 = vadd.f32 1.0, %v10590_v3  ;;  %v8471_v26 = vmul.f32 %v8393_v38, %v7127_v32  ;;  %vm8474_vm10 = vcmp.lt.f32.partialorder %v3434_v5, 0.0004427343 }
 0x304   :  { %v3881_v30 = vmul.f32 %v3817_v59, %v7127_v32  ;;  %v8478_v58 = vmul.f32 %v5658_v47, %v4908_v53  ;;  %v3433_v7 = vmul.f32 %v10588_v33, %v3432_v43  ;;  %v3413_v40 = vmul.f32 -0.5, %v10590_v3 }
 0x305   :  { %vm2602_vm5 = vcmp.gt.f32.partialorder %v2080_v31, 0.0  ;;  %6402 = vlog2.f32 %v3410_v57  ;;  %v8486_v38 = vmul.f32 %v4140_v44, %v3948_v61  ;;  %v3946_v17 = vsub.f32 %v10593_v63, %v2080_v31 }
 0x306   :  { %v8484_v4 = vadd.f32 %v5095_v46, %v3881_v30  ;;  %v5656_v16 = vsel %vm2602_vm5, 1.0, %v10360_v37  ;;  %v8490_v56 = vadd.f32 -0.5, %v4012_v51  ;;  %v2794_v47 = vmax.f32 %v10593_v63, 0.0 }
 0x307   :  { %v6401_v55 = vpop.eup %6400  ;;  %v2858_v33 = vmul.f32 %v5656_v16, %v10593_v63  ;;  %vm4458_vm9 = vcmp.gt.f32.partialorder %v10593_v63, 0.0  ;;  %vm8495_vm12 = vcmp.lt.f32.partialorder %v4012_v51, 1.0  ;;  %v4010_v46 = vand.u32 2147483647, %v3946_v17 }
 0x308   :  { %v3430_v8 = vmul.f32 0.6931472, %v6401_v55  ;;  %v4138_v61 = vmul.f32 0.5, %v3946_v17  ;;  %v4522_v22 = vsel %vm4458_vm9, 1.0, %v10360_v37  ;;  %v3414_v29 = vadd.f32 1.0, %v3413_v40  ;;  %v10596_v40 = vld [vmem:[#allocation49_spill] sm:$0xff] }
 0x309   :  { %v2922_v5 = vsub.f32 %v2794_v47, %v2858_v33  ;;  %v4586_v12 = vmul.f32 %v5656_v16, %v4522_v22  ;;  %v4714_v43 = vsub.f32 1.0, %v5656_v16  ;;  %vm4074_vm11 = vcmp.lt.f32.partialorder %v4010_v46, 1.0 }
 0x30a   :  { %v3436_v59 = vsel %vm8474_vm10, %v3433_v7, %v3430_v8  ;;  %v4202_v44 = vmul.f32 %v4138_v61, %v3946_v17  ;;  %v5720_v53 = vadd.f32 -0.5, %v4010_v46  ;;  %v4906_v30 = vsub.f32 1.0, %v4522_v22  ;;  %v10597_v8 = vld [vmem:[#allocation22_spill] sm:$0xff] }
 0x30b   :  { %v3820_v31 = vadd.f32 %v3436_v59, %v2924_v9  ;;  %v4650_v51 = vmul.f32 %v4586_v12, %v7127_v32  ;;  %v4778_v57 = vmul.f32 %v4714_v43, %v4522_v22  ;;  %v3416_v63 = vand.u32 2147483647, %v10590_v3 }
 0x30c   :  { %v4330_v55 = vsel %vm4074_vm11, %v4202_v44, %v5720_v53  ;;  %v2101_v47 = vadd.f32 %v8138_v42, %v8049_v36  ;;  %v3455_v33 = vadd.f32 1.0, %v10596_v40  ;;  %v3415_v20 = vmul.f32 %v10590_v3, %v3414_v29  ;;  %v8527_v53 = vpop.f32.mrb[100].mxu1 }
 0x30d   :  { %v4394_v10 = vmul.f32 %v4330_v55, %v7148_v49  ;;  %v4842_v7 = vmul.f32 %v4778_v57, %v7127_v32  ;;  %v4970_v17 = vmul.f32 %v5656_v16, %v4906_v30  ;;  %v5235_v9 = vadd.f32 %v8428_v23, %v4650_v51 }
 0x30e   :  { %vm2607_vm14 = vcmp.gt.f32.partialorder %v2101_v47, 0.0  ;;  %v2799_v46 = vmax.f32 %v10597_v8, 0.0  ;;  %6404 = vlog2.f32 %v3455_v33  ;;  %v3458_v23 = vmul.f32 -0.5, %v10596_v40 }
 0x30f   :  { %v6403_v61 = vpop.eup %6402  ;;  %v5034_v22 = vmul.f32 %v4970_v17, %v7127_v32  ;;  %v5166_v36 = vadd.f32 %v8436_v14, %v4394_v10  ;;  %v5304_v12 = vadd.f32 %v8430_v48, %v4842_v7  ;;  %v5661_v3 = vsel %vm2607_vm14, 1.0, %v10360_v37  ;;  %v10598_v48 = vld [vmem:[#allocation97_spill] sm:$0xff] }
 0x310   :  { %v3412_v29 = vmul.f32 0.6931472, %v6403_v61  ;;  %v8517_v43 = vadd.f32 %v5235_v9, %v8457_v27  ;;  %v2863_v16 = vmul.f32 %v5661_v3, %v10597_v8  ;;  %vm3417_vm13 = vcmp.lt.f32.partialorder %v3416_v63, 0.0004427343 }
 0x311   :  { %v8521_v59 = vadd.f32 %v5166_v36, %v4395_v19  ;;  %v8524_v44 = vadd.f32 %v5304_v12, %v8461_v24  ;;  %v5373_v14 = vadd.f32 %v8439_v6, %v5034_v22  ;;  %v8531_v51 = vadd.f32 %v8138_v42, %v10598_v48 }
 0x312   :  { %v3418_v27 = vsel %vm3417_vm13, %v3415_v20, %v3412_v29  ;;  %v2927_v57 = vsub.f32 %v2799_v46, %v2863_v16  ;;  %v3951_v30 = vsub.f32 %v10597_v8, %v2101_v47  ;;  %v4332_v19 = vsel %vm8495_vm12, %v8486_v38, %v8490_v56 }
 0x313   :  { %10599 = vst [vmem:[#allocation58_spill] sm:$0xff] %v8531_v51  ;;  %v3818_v63 = vadd.f32 %v3418_v27, %v2922_v5  ;;  %v8539_v24 = vadd.f32 %v5373_v14, %v8471_v26  ;;  %vm4463_vm15 = vcmp.gt.f32.partialorder %v10597_v8, 0.0  ;;  %v3883_v6 = vmul.f32 %v8413_v39, %v7127_v32  ;;  %v8556_v5 = vpop.f32.mrb[101].mxu1  ;;  %v10601_v14 = vld [vmem:[#allocation51_spill] sm:$0xff] }
 0x314   :  { %v3459_v55 = vadd.f32 1.0, %v3458_v23  ;;  %v4527_v20 = vsel %vm4463_vm15, 1.0, %v10360_v37  ;;  %v4719_v33 = vsub.f32 1.0, %v5661_v3  ;;  %v2093_v38 = vadd.f32 %v8138_v42, %v8067_v54 }
 0x315   :  { %v3882_v47 = vmul.f32 %v3818_v63, %v7127_v32  ;;  %v8546_v10 = vmul.f32 %v5661_v3, %v4527_v20  ;;  %v4911_v7 = vsub.f32 1.0, %v4527_v20  ;;  %v4396_v26 = vmul.f32 %v4332_v19, %v7148_v49 }
 0x316   :  { %v4652_v56 = vmul.f32 %v8453_v15, %v7127_v32  ;;  %v3461_v50 = vand.u32 2147483647, %v10596_v40  ;;  %v8554_v39 = vmul.f32 %v4719_v33, %v4527_v20  ;;  %v4015_v9 = vand.u32 2147483647, %v3951_v30 }
 0x317   :  { %v5097_v17 = vadd.f32 %v8484_v4, %v3882_v47  ;;  %v8559_v8 = vmul.f32 %v5661_v3, %v4911_v7  ;;  %vm2605_vm0 = vcmp.gt.f32.partialorder %v2093_v38, 0.0  ;;  %v4844_v54 = vmul.f32 %v8463_v25, %v7127_v32  ;;  %v10600_v3 = vld [vmem:[#allocation23_spill] sm:$0xff] }
 0x318   :  { %v6405_v46 = vpop.eup %6404  ;;  %v5036_v61 = vmul.f32 %v8478_v58, %v7127_v32  ;;  %v4143_v15 = vmul.f32 0.5, %v3951_v30  ;;  %v5659_v22 = vsel %vm2605_vm0, 1.0, %v10360_v37  ;;  %v3884_v36 = vmul.f32 %v3820_v31, %v7127_v32 }
 0x319   :  { %v5098_v12 = vadd.f32 %v5097_v17, %v3883_v6  ;;  %v3457_v29 = vmul.f32 0.6931472, %v6405_v46  ;;  %v3460_v4 = vmul.f32 %v10596_v40, %v3459_v55  ;;  %vm3462_vm2 = vcmp.lt.f32.partialorder %v3461_v50, 0.0004427343 }
 0x31a   :  { %v2797_v16 = vmax.f32 %v10600_v3, 0.0  ;;  %v2861_v23 = vmul.f32 %v5659_v22, %v10600_v3  ;;  %v3437_v48 = vadd.f32 1.0, %v10601_v14  ;;  %vm8571_vm6 = vcmp.lt.f32.partialorder %v4015_v9, 1.0 }
 0x31b   :  { %v3463_v25 = vsel %vm3462_vm2, %v3460_v4, %v3457_v29  ;;  %v3949_v58 = vsub.f32 %v10600_v3, %v2093_v38  ;;  %vm4461_vm1 = vcmp.gt.f32.partialorder %v10600_v3, 0.0  ;;  %v4717_v31 = vsub.f32 1.0, %v5659_v22 }
 0x31c   :  { %v8577_v19 = vadd.f32 %v3463_v25, %v2927_v57  ;;  %v4207_v40 = vmul.f32 %v4143_v15, %v3951_v30  ;;  %v2925_v63 = vsub.f32 %v2797_v16, %v2861_v23  ;;  %6406 = vlog2.f32 %v3437_v48 }
 0x31d   :  { %v5725_v6 = vadd.f32 -0.5, %v4015_v9  ;;  %v4013_v55 = vand.u32 2147483647, %v3949_v58  ;;  %v4141_v20 = vmul.f32 0.5, %v3949_v58  ;;  %v4525_v33 = vsel %vm4461_vm1, 1.0, %v10360_v37 }
 0x31e   :  { %v3440_v47 = vmul.f32 -0.5, %v10601_v14  ;;  %v3443_v7 = vand.u32 2147483647, %v10601_v14  ;;  %v4589_v50 = vmul.f32 %v5659_v22, %v4525_v33  ;;  %v4781_v17 = vmul.f32 %v4717_v31, %v4525_v33 }
 0x31f   :  { %vm4077_vm4 = vcmp.lt.f32.partialorder %v4013_v55, 1.0  ;;  %v4205_v38 = vmul.f32 %v4141_v20, %v3949_v58  ;;  %v5723_v46 = vadd.f32 -0.5, %v4013_v55  ;;  %v4909_v29 = vsub.f32 1.0, %v4525_v33 }
 0x320   :  { %v4653_v57 = vmul.f32 %v4589_v50, %v7127_v32  ;;  %v4845_v30 = vmul.f32 %v4781_v17, %v7127_v32  ;;  %v5099_v15 = vadd.f32 %v5098_v12, %v3884_v36  ;;  %v5168_v9 = vadd.f32 %v8521_v59, %v4396_v26  ;;  %v10604_v59 = vld [vmem:[#allocation54_spill] sm:$0xff]  ;;  %v8610_v12 = vpop.f32.mrb[102].mxu1 }
 0x321   :  { %v4333_v4 = vsel %vm4077_vm4, %v4205_v38, %v5723_v46  ;;  %v4973_v3 = vmul.f32 %v5659_v22, %v4909_v29  ;;  %v5237_v16 = vadd.f32 %v8517_v43, %v4652_v56  ;;  %v5306_v23 = vadd.f32 %v8524_v44, %v4844_v54 }
 0x322   :  { %v3441_v48 = vadd.f32 1.0, %v3440_v47  ;;  %v4397_v25 = vmul.f32 %v4333_v4, %v7148_v49  ;;  %v5375_v58 = vadd.f32 %v8539_v24, %v5036_v61  ;;  %v2104_v31 = vadd.f32 %v8138_v42, %v8122_v18  ;;  %v10605_v18 = vld [vmem:[#allocation26_spill] sm:$0xff] }
 0x323   :  { %v5037_v55 = vmul.f32 %v4973_v3, %v7127_v32  ;;  %v8592_v20 = vadd.f32 %v5237_v16, %v4653_v57  ;;  %v8594_v36 = vadd.f32 %v5306_v23, %v4845_v30  ;;  %v3464_v26 = vadd.f32 1.0, %v10604_v59  ;;  %v10606_v16 = vld [vmem:[#allocation55_spill] sm:$0xff] }
 0x324   :  { %6408 = vpow2.f32 %v8204_v1  ;;  %v8598_v43 = vadd.f32 %v5168_v9, %v4397_v25  ;;  %vm2608_vm7 = vcmp.gt.f32.partialorder %v2104_v31, 0.0  ;;  %v3467_v44 = vmul.f32 -0.5, %v10604_v59 }
 0x325   :  { %v8601_v56 = vadd.f32 %v5375_v58, %v5037_v55  ;;  %v5662_v24 = vsel %vm2608_vm7, 1.0, %v10360_v37  ;;  %6410 = vlog2.f32 %v3464_v26  ;;  %v3952_v42 = vsub.f32 %v10605_v18, %v2104_v31  ;;  %v8651_v55 = vpop.f32.mrb[103].mxu1 }
 0x326   :  { %v6407_v54 = vpop.eup %6406  ;;  %v4335_v61 = vsel %vm8571_vm6, %v4207_v40, %v5725_v6  ;;  %v2800_v22 = vmax.f32 %v10605_v18, 0.0  ;;  %v2864_v1 = vmul.f32 %v5662_v24, %v10605_v18  ;;  %vm4464_vm8 = vcmp.gt.f32.partialorder %v10605_v18, 0.0 }
 0x327   :  { %v3439_v33 = vmul.f32 0.6931472, %v6407_v54  ;;  %v3442_v47 = vmul.f32 %v10601_v14, %v3441_v48  ;;  %vm3444_vm3 = vcmp.lt.f32.partialorder %v3443_v7, 0.0004427343  ;;  %v4528_v50 = vsel %vm4464_vm8, 1.0, %v10360_v37  ;;  %v10610_v54 = vld [vmem:[#allocation27_spill] sm:$0xff] }
 0x328   :  { %v2928_v17 = vsub.f32 %v2800_v22, %v2864_v1  ;;  %v3470_v38 = vand.u32 2147483647, %v10604_v59  ;;  %v8615_v46 = vmul.f32 %v5662_v24, %v4528_v50  ;;  %v4720_v27 = vsub.f32 1.0, %v5662_v24 }
 0x329   :  { %v8619_v40 = vmul.f32 %v8546_v10, %v7127_v32  ;;  %v8623_v6 = vmul.f32 %v8554_v39, %v7127_v32  ;;  %v3445_v29 = vsel %vm3444_vm3, %v3442_v47, %v3439_v33  ;;  %v3468_v57 = vadd.f32 1.0, %v3467_v44  ;;  %v8633_v10 = vld [vmem:[%s10143_s5] ss:$0 sm:$0xff] }
 0x32a   :  { %v3821_v14 = vadd.f32 %v3445_v29, %v2925_v63  ;;  %v4144_v7 = vmul.f32 0.5, %v3952_v42  ;;  %v8625_v30 = vmul.f32 %v4720_v27, %v4528_v50  ;;  %v4912_v9 = vsub.f32 1.0, %v4528_v50 }
 0x32b   :  { %v8628_v4 = vmul.f32 %v4335_v61, %v7148_v49  ;;  %v4016_v3 = vand.u32 2147483647, %v3952_v42  ;;  %v2096_v39 = vadd.f32 %v8633_v10, %v8161_v60  ;;  %v3446_v23 = vadd.f32 1.0, %v10606_v16 }
 0x32c   :  { %v8640_v63 = vmul.f32 %v8559_v8, %v7127_v32  ;;  %v3885_v48 = vmul.f32 %v3821_v14, %v7127_v32  ;;  %vm8643_vm10 = vcmp.lt.f32.partialorder %v3470_v38, 0.0004427343  ;;  %v8647_v58 = vmul.f32 %v5662_v24, %v4912_v9 }
 0x32d   :  { %v3469_v31 = vmul.f32 %v10604_v59, %v3468_v57  ;;  %vm2606_vm5 = vcmp.gt.f32.partialorder %v2096_v39, 0.0  ;;  %6412 = vlog2.f32 %v3446_v23  ;;  %v3449_v60 = vmul.f32 -0.5, %v10606_v16 }
 0x32e   :  { %v8653_v26 = vpop.eup %6408  ;;  %v8655_v8 = vadd.f32 %v5099_v15, %v3885_v48  ;;  %v8657_v44 = vmul.f32 %v4144_v7, %v3952_v42  ;;  %v5660_v18 = vsel %vm2606_vm5, 1.0, %v10360_v37  ;;  %v3950_v61 = vsub.f32 %v10610_v54, %v2096_v39 }
 0x32f   :  { %10609 = vst [vmem:[#allocation3_spill] sm:$0xff] %v8653_v26  ;;  %v6411_v24 = vpop.eup %6410  ;;  %v8661_v22 = vadd.f32 -0.5, %v4016_v3  ;;  %v2798_v59 = vmax.f32 %v10610_v54, 0.0  ;;  %v2862_v1 = vmul.f32 %v5660_v18, %v10610_v54  ;;  %vm4462_vm9 = vcmp.gt.f32.partialorder %v10610_v54, 0.0 }
 0x330   :  { %v3466_v33 = vmul.f32 0.6931472, %v6411_v24  ;;  %vm8666_vm12 = vcmp.lt.f32.partialorder %v4016_v3, 1.0  ;;  %v4014_v15 = vand.u32 2147483647, %v3950_v61  ;;  %v4142_v42 = vmul.f32 0.5, %v3950_v61 }
 0x331   :  { %v4526_v50 = vsel %vm4462_vm9, 1.0, %v10360_v37  ;;  %v2926_v38 = vsub.f32 %v2798_v59, %v2862_v1  ;;  %v3450_v27 = vadd.f32 1.0, %v3449_v60  ;;  %v4718_v57 = vsub.f32 1.0, %v5660_v18  ;;  %v10613_v60 = vld [vmem:[#allocation59_spill] sm:$0xff] }
 0x332   :  { %v4590_v29 = vmul.f32 %v5660_v18, %v4526_v50  ;;  %v3472_v14 = vsel %vm8643_vm10, %v3469_v31, %v3466_v33  ;;  %vm4078_vm11 = vcmp.lt.f32.partialorder %v4014_v15, 1.0  ;;  %v4206_v7 = vmul.f32 %v4142_v42, %v3950_v61  ;;  %v10614_v33 = vld [vmem:[#allocation31_spill] sm:$0xff] }
 0x333   :  { %v5724_v9 = vadd.f32 -0.5, %v4014_v15  ;;  %v3824_v39 = vadd.f32 %v3472_v14, %v2928_v17  ;;  %v4782_v23 = vmul.f32 %v4718_v57, %v4526_v50  ;;  %v4910_v48 = vsub.f32 1.0, %v4526_v50 }
 0x334   :  { %v4654_v3 = vmul.f32 %v4590_v29, %v7127_v32  ;;  %v3452_v54 = vand.u32 2147483647, %v10606_v16  ;;  %v2117_v59 = vadd.f32 %v8633_v10, %v8201_v45  ;;  %v3491_v1 = vadd.f32 1.0, %v10613_v60 }
 0x335   :  { %v4334_v24 = vsel %vm4078_vm11, %v4206_v7, %v5724_v9  ;;  %v3451_v26 = vmul.f32 %v10606_v16, %v3450_v27  ;;  %v4846_v31 = vmul.f32 %v4782_v23, %v7127_v32  ;;  %v4974_v61 = vmul.f32 %v5660_v18, %v4910_v48 }
 0x336   :  { %v4398_v25 = vmul.f32 %v4334_v24, %v7148_v49  ;;  %v5239_v17 = vadd.f32 %v8592_v20, %v4654_v3  ;;  %vm2611_vm14 = vcmp.gt.f32.partialorder %v2117_v59, 0.0  ;;  %v2803_v15 = vmax.f32 %v10614_v33, 0.0 }
 0x337   :  { %6414 = vlog2.f32 %v3491_v1  ;;  %v6413_v42 = vpop.eup %6412  ;;  %v5038_v50 = vmul.f32 %v4974_v61, %v7127_v32  ;;  %v5308_v29 = vadd.f32 %v8594_v36, %v4846_v31  ;;  %v5665_v16 = vsel %vm2611_vm14, 1.0, %v10360_v37  ;;  %v8699_v36 = vpop.f32.mrb[104].mxu1 }
 0x338   :  { %v5170_v45 = vadd.f32 %v8598_v43, %v4398_v25  ;;  %v3448_v27 = vmul.f32 0.6931472, %v6413_v42  ;;  %v8688_v57 = vadd.f32 %v5239_v17, %v8619_v40  ;;  %v2867_v18 = vmul.f32 %v5665_v16, %v10614_v33 }
 0x339   :  { %v3494_v20 = vmul.f32 -0.5, %v10613_v60  ;;  %vm3453_vm13 = vcmp.lt.f32.partialorder %v3452_v54, 0.0004427343  ;;  %v8696_v7 = vadd.f32 %v5308_v29, %v8623_v6  ;;  %v5377_v43 = vadd.f32 %v8601_v56, %v5038_v50 }
 0x33a   :  { %v8693_v14 = vadd.f32 %v5170_v45, %v8628_v4  ;;  %v3454_v3 = vsel %vm3453_vm13, %v3451_v26, %v3448_v27  ;;  %v2931_v40 = vsub.f32 %v2803_v15, %v2867_v18  ;;  %v3955_v23 = vsub.f32 %v10614_v33, %v2117_v59 }
 0x33b   :  { %v4336_v48 = vsel %vm8666_vm12, %v8657_v44, %v8661_v22  ;;  %v3822_v4 = vadd.f32 %v3454_v3, %v2926_v38  ;;  %v8708_v54 = vadd.f32 %v5377_v43, %v8640_v63  ;;  %vm4467_vm15 = vcmp.gt.f32.partialorder %v10614_v33, 0.0  ;;  %v8725_v38 = vpop.f32.mrb[105].mxu1 }
 0x33c   :  { %v3887_v56 = vmul.f32 %v8577_v19, %v7127_v32  ;;  %v3495_v6 = vadd.f32 1.0, %v3494_v20  ;;  %v4531_v26 = vsel %vm4467_vm15, 1.0, %v10360_v37  ;;  %v4723_v24 = vsub.f32 1.0, %v5665_v16  ;;  %v10616_v20 = vld [vmem:[#allocation62_spill] sm:$0xff] }
 0x33d   :  { %v3886_v59 = vmul.f32 %v3822_v4, %v7127_v32  ;;  %v8715_v1 = vmul.f32 %v5665_v16, %v4531_v26  ;;  %v4915_v25 = vsub.f32 1.0, %v4531_v26  ;;  %v2109_v44 = vadd.f32 %v8633_v10, %v8229_v21 }
 0x33e   :  { %v4400_v63 = vmul.f32 %v4336_v48, %v7148_v49  ;;  %v4656_v22 = vmul.f32 %v8615_v46, %v7127_v32  ;;  %v3497_v47 = vand.u32 2147483647, %v10613_v60  ;;  %v8723_v19 = vmul.f32 %v4723_v24, %v4531_v26 }
 0x33f   :  { %v5101_v31 = vadd.f32 %v8655_v8, %v3886_v59  ;;  %v4019_v61 = vand.u32 2147483647, %v3955_v23  ;;  %v8728_v17 = vmul.f32 %v5665_v16, %v4915_v25  ;;  %vm2609_vm0 = vcmp.gt.f32.partialorder %v2109_v44, 0.0  ;;  %v10615_v16 = vld [vmem:[#allocation32_spill] sm:$0xff] }
 0x340   :  { %v4848_v21 = vmul.f32 %v8625_v30, %v7127_v32  ;;  %v5040_v15 = vmul.f32 %v8647_v58, %v7127_v32  ;;  %v4147_v46 = vmul.f32 0.5, %v3955_v23  ;;  %v5663_v42 = vsel %vm2609_vm0, 1.0, %v10360_v37 }
 0x341   :  { %v6415_v33 = vpop.eup %6414  ;;  %v3888_v50 = vmul.f32 %v3824_v39, %v7127_v32  ;;  %v5102_v45 = vadd.f32 %v5101_v31, %v3887_v56  ;;  %v3496_v8 = vmul.f32 %v10613_v60, %v3495_v6  ;;  %vm3498_vm2 = vcmp.lt.f32.partialorder %v3497_v47, 0.0004427343 }
 0x342   :  { %v3493_v29 = vmul.f32 0.6931472, %v6415_v33  ;;  %v2801_v27 = vmax.f32 %v10615_v16, 0.0  ;;  %v2865_v18 = vmul.f32 %v5663_v42, %v10615_v16  ;;  %v3473_v43 = vadd.f32 1.0, %v10616_v20 }
 0x343   :  { %vm8740_vm6 = vcmp.lt.f32.partialorder %v4019_v61, 1.0  ;;  %v3953_v58 = vsub.f32 %v10615_v16, %v2109_v44  ;;  %vm4465_vm1 = vcmp.gt.f32.partialorder %v10615_v16, 0.0  ;;  %v4721_v39 = vsub.f32 1.0, %v5663_v42 }
 0x344   :  { %v3499_v30 = vsel %vm3498_vm2, %v3496_v8, %v3493_v29  ;;  %v4211_v60 = vmul.f32 %v4147_v46, %v3955_v23  ;;  %v2929_v4 = vsub.f32 %v2801_v27, %v2865_v18  ;;  %6416 = vlog2.f32 %v3473_v43 }
 0x345   :  { %v8746_v48 = vadd.f32 %v3499_v30, %v2931_v40  ;;  %v5729_v56 = vadd.f32 -0.5, %v4019_v61  ;;  %v4017_v6 = vand.u32 2147483647, %v3953_v58  ;;  %v4145_v26 = vmul.f32 0.5, %v3953_v58 }
 0x346   :  { %v4529_v24 = vsel %vm4465_vm1, 1.0, %v10360_v37  ;;  %v3476_v59 = vmul.f32 -0.5, %v10616_v20  ;;  %v3479_v25 = vand.u32 2147483647, %v10616_v20  ;;  %v5103_v46 = vadd.f32 %v5102_v45, %v3888_v50 }
 0x347   :  { %v4593_v47 = vmul.f32 %v5663_v42, %v4529_v24  ;;  %v4785_v31 = vmul.f32 %v4721_v39, %v4529_v24  ;;  %vm4081_vm4 = vcmp.lt.f32.partialorder %v4017_v6, 1.0  ;;  %v4209_v44 = vmul.f32 %v4145_v26, %v3953_v58 }
 0x348   :  { %v5727_v33 = vadd.f32 -0.5, %v4017_v6  ;;  %v4913_v29 = vsub.f32 1.0, %v4529_v24  ;;  %v5172_v61 = vadd.f32 %v8693_v14, %v4400_v63  ;;  %v5241_v27 = vadd.f32 %v8688_v57, %v4656_v22  ;;  %v10619_v14 = vld [vmem:[#allocation63_spill] sm:$0xff] }
 0x349   :  { %v4657_v40 = vmul.f32 %v4593_v47, %v7127_v32  ;;  %v4849_v23 = vmul.f32 %v4785_v31, %v7127_v32  ;;  %v5310_v18 = vadd.f32 %v8696_v7, %v4848_v21  ;;  %v3477_v43 = vadd.f32 1.0, %v3476_v59  ;;  %v10621_v21 = vld [vmem:[#allocation35_spill] sm:$0xff]  ;;  %v8782_v31 = vpop.f32.mrb[106].mxu1 }
 0x34a   :  { %v4337_v8 = vsel %vm4081_vm4, %v4209_v44, %v5727_v33  ;;  %v4977_v16 = vmul.f32 %v5663_v42, %v4913_v29  ;;  %v5379_v58 = vadd.f32 %v8708_v54, %v5040_v15  ;;  %v2120_v39 = vadd.f32 %v8633_v10, %v8285_v13  ;;  %v10620_v42 = vld [vmem:[#allocation99_spill] sm:$0xff] }
 0x34b   :  { %v4401_v30 = vmul.f32 %v4337_v8, %v7148_v49  ;;  %v8761_v26 = vadd.f32 %v5241_v27, %v4657_v40  ;;  %v8763_v50 = vadd.f32 %v5310_v18, %v4849_v23  ;;  %v3500_v63 = vadd.f32 1.0, %v10619_v14 }
 0x34c   :  { %v5041_v6 = vmul.f32 %v4977_v16, %v7127_v32  ;;  %v8768_v57 = vadd.f32 %v8633_v10, %v10620_v42  ;;  %vm2612_vm7 = vcmp.gt.f32.partialorder %v2120_v39, 0.0  ;;  %v3503_v54 = vmul.f32 -0.5, %v10619_v14 }
 0x34d   :  { %v8770_v7 = vadd.f32 %v5172_v61, %v4401_v30  ;;  %v5666_v13 = vsel %vm2612_vm7, 1.0, %v10360_v37  ;;  %6418 = vlog2.f32 %v3500_v63  ;;  %v3956_v15 = vsub.f32 %v10621_v21, %v2120_v39  ;;  %v10622_v39 = vld [vmem:[#allocation64_spill] sm:$0xff] }
 0x34e   :  { %v8773_v22 = vadd.f32 %v5379_v58, %v5041_v6  ;;  %v6417_v45 = vpop.eup %6416  ;;  %v4339_v24 = vsel %vm8740_vm6, %v4211_v60, %v5729_v56  ;;  %v2804_v59 = vmax.f32 %v10621_v21, 0.0  ;;  %v2868_v47 = vmul.f32 %v5666_v13, %v10621_v21 }
 0x34f   :  { %vm4468_vm8 = vcmp.gt.f32.partialorder %v10621_v21, 0.0  ;;  %v3475_v44 = vmul.f32 0.6931472, %v6417_v45  ;;  %v3478_v33 = vmul.f32 %v10616_v20, %v3477_v43  ;;  %vm3480_vm3 = vcmp.lt.f32.partialorder %v3479_v25, 0.0004427343 }
 0x350   :  { %v4532_v29 = vsel %vm4468_vm8, 1.0, %v10360_v37  ;;  %v2932_v40 = vsub.f32 %v2804_v59, %v2868_v47  ;;  %v3506_v23 = vand.u32 2147483647, %v10619_v14  ;;  %v4724_v3 = vsub.f32 1.0, %v5666_v13 }
 0x351   :  { %v8787_v61 = vmul.f32 %v5666_v13, %v4532_v29  ;;  %v8791_v60 = vmul.f32 %v8715_v1, %v7127_v32  ;;  %v8795_v56 = vmul.f32 %v8723_v19, %v7127_v32  ;;  %v3481_v8 = vsel %vm3480_vm3, %v3478_v33, %v3475_v44 }
 0x352   :  { %v3504_v16 = vadd.f32 1.0, %v3503_v54  ;;  %v3825_v20 = vadd.f32 %v3481_v8, %v2929_v4  ;;  %v4148_v25 = vmul.f32 0.5, %v3956_v15  ;;  %v8797_v27 = vmul.f32 %v4724_v3, %v4532_v29  ;;  %v8816_v54 = vpop.f32.mrb[107].mxu1 }
 0x353   :  { %v4916_v18 = vsub.f32 1.0, %v4532_v29  ;;  %v4403_v43 = vmul.f32 %v4339_v24, %v7148_v49  ;;  %v4020_v30 = vand.u32 2147483647, %v3956_v15  ;;  %v2112_v58 = vadd.f32 %v8633_v10, %v8319_v28  ;;  %v10625_v24 = vld [vmem:[#allocation36_spill] sm:$0xff] }
 0x354   :  { %v3482_v1 = vadd.f32 1.0, %v10622_v39  ;;  %v8805_v6 = vmul.f32 %v8728_v17, %v7127_v32  ;;  %v3889_v19 = vmul.f32 %v3825_v20, %v7127_v32  ;;  %vm8808_vm10 = vcmp.lt.f32.partialorder %v3506_v23, 0.0004427343 }
 0x355   :  { %v8812_v63 = vmul.f32 %v5666_v13, %v4916_v18  ;;  %v3505_v42 = vmul.f32 %v10619_v14, %v3504_v16  ;;  %vm2610_vm5 = vcmp.gt.f32.partialorder %v2112_v58, 0.0  ;;  %v3485_v28 = vmul.f32 -0.5, %v10622_v39 }
 0x356   :  { %6420 = vlog2.f32 %v3482_v1  ;;  %v8818_v21 = vadd.f32 %v5103_v46, %v3889_v19  ;;  %v8820_v17 = vmul.f32 %v4148_v25, %v3956_v15  ;;  %v5664_v45 = vsel %vm2610_vm5, 1.0, %v10360_v37 }
 0x357   :  { %v3954_v59 = vsub.f32 %v10625_v24, %v2112_v58  ;;  %v6419_v47 = vpop.eup %6418  ;;  %v8824_v44 = vadd.f32 -0.5, %v4020_v30  ;;  %v2802_v13 = vmax.f32 %v10625_v24, 0.0  ;;  %v2866_v14 = vmul.f32 %v5664_v45, %v10625_v24 }
 0x358   :  { %vm4466_vm9 = vcmp.gt.f32.partialorder %v10625_v24, 0.0  ;;  %v3502_v33 = vmul.f32 0.6931472, %v6419_v47  ;;  %vm8829_vm12 = vcmp.lt.f32.partialorder %v4020_v30, 1.0  ;;  %v3486_v8 = vadd.f32 1.0, %v3485_v28  ;;  %v10628_v28 = vld [vmem:[#allocation66_spill] sm:$0xff] }
 0x359   :  { %v4018_v46 = vand.u32 2147483647, %v3954_v59  ;;  %v4146_v15 = vmul.f32 0.5, %v3954_v59  ;;  %v4530_v23 = vsel %vm4466_vm9, 1.0, %v10360_v37  ;;  %v2930_v3 = vsub.f32 %v2802_v13, %v2866_v14 }
 0x35a   :  { %v4594_v16 = vmul.f32 %v5664_v45, %v4530_v23  ;;  %v4722_v20 = vsub.f32 1.0, %v5664_v45  ;;  %v3508_v25 = vsel %vm8808_vm10, %v3505_v42, %v3502_v33  ;;  %v4914_v24 = vsub.f32 1.0, %v4530_v23  ;;  %v10629_v33 = vld [vmem:[#allocation38_spill] sm:$0xff] }
 0x35b   :  { %vm4082_vm11 = vcmp.lt.f32.partialorder %v4018_v46, 1.0  ;;  %v4210_v18 = vmul.f32 %v4146_v15, %v3954_v59  ;;  %v5728_v58 = vadd.f32 -0.5, %v4018_v46  ;;  %v3828_v1 = vadd.f32 %v3508_v25, %v2932_v40 }
 0x35c   :  { %v4658_v30 = vmul.f32 %v4594_v16, %v7127_v32  ;;  %v4786_v19 = vmul.f32 %v4722_v20, %v4530_v23  ;;  %v3488_v47 = vand.u32 2147483647, %v10622_v39  ;;  %v2133_v13 = vadd.f32 %v8633_v10, %v8364_v52 }
 0x35d   :  { %v4338_v9 = vsel %vm4082_vm11, %v4210_v18, %v5728_v58  ;;  %v3527_v14 = vadd.f32 1.0, %v10628_v28  ;;  %v3487_v35 = vmul.f32 %v10622_v39, %v3486_v8  ;;  %v4978_v59 = vmul.f32 %v5664_v45, %v4914_v24  ;;  %v8861_v18 = vpop.f32.mrb[108].mxu1 }
 0x35e   :  { %v4402_v4 = vmul.f32 %v4338_v9, %v7148_v49  ;;  %v4850_v42 = vmul.f32 %v4786_v19, %v7127_v32  ;;  %v5243_v40 = vadd.f32 %v8761_v26, %v4658_v30  ;;  %vm2615_vm14 = vcmp.gt.f32.partialorder %v2133_v13, 0.0 }
 0x35f   :  { %v2807_v46 = vmax.f32 %v10629_v33, 0.0  ;;  %6422 = vlog2.f32 %v3527_v14  ;;  %v5042_v23 = vmul.f32 %v4978_v59, %v7127_v32  ;;  %v5669_v39 = vsel %vm2615_vm14, 1.0, %v10360_v37 }
 0x360   :  { %v6421_v15 = vpop.eup %6420  ;;  %v5174_v52 = vadd.f32 %v8770_v7, %v4402_v4  ;;  %v5312_v16 = vadd.f32 %v8763_v50, %v4850_v42  ;;  %v8851_v9 = vadd.f32 %v5243_v40, %v8791_v60  ;;  %v2871_v45 = vmul.f32 %v5669_v39, %v10629_v33 }
 0x361   :  { %v3484_v8 = vmul.f32 0.6931472, %v6421_v15  ;;  %v3530_v26 = vmul.f32 -0.5, %v10628_v28  ;;  %vm3489_vm13 = vcmp.lt.f32.partialorder %v3488_v47, 0.0004427343  ;;  %v5381_v7 = vadd.f32 %v8773_v22, %v5042_v23 }
 0x362   :  { %v8855_v20 = vadd.f32 %v5174_v52, %v4403_v43  ;;  %v8858_v25 = vadd.f32 %v5312_v16, %v8795_v56  ;;  %6424 = vpow2.f32 %v8434_v41  ;;  %v2935_v58 = vsub.f32 %v2807_v46, %v2871_v45  ;;  %v10630_v52 = vld [vmem:[#allocation40_spill] sm:$0xff] }
 0x363   :  { %v3490_v50 = vsel %vm3489_vm13, %v3487_v35, %v3484_v8  ;;  %v3959_v60 = vsub.f32 %v10629_v33, %v2133_v13  ;;  %v4340_v30 = vsel %vm8829_vm12, %v8820_v17, %v8824_v44  ;;  %v8870_v19 = vadd.f32 %v5381_v7, %v8805_v6  ;;  %v10631_v8 = vld [vmem:[#allocation69_spill] sm:$0xff] }
 0x364   :  { %v3826_v43 = vadd.f32 %v3490_v50, %v2930_v3  ;;  %vm4471_vm15 = vcmp.gt.f32.partialorder %v10629_v33, 0.0  ;;  %v3891_v22 = vmul.f32 %v8746_v48, %v7127_v32  ;;  %v3531_v56 = vadd.f32 1.0, %v3530_v26  ;;  %v8887_v3 = vpop.f32.mrb[109].mxu1 }
 0x365   :  { %v4535_v35 = vsel %vm4471_vm15, 1.0, %v10360_v37  ;;  %v4727_v41 = vsub.f32 1.0, %v5669_v39  ;;  %v2125_v17 = vadd.f32 %v8633_v10, %v8390_v11  ;;  %v4404_v6 = vmul.f32 %v4340_v30, %v7148_v49 }
 0x366   :  { %v3890_v24 = vmul.f32 %v3826_v43, %v7127_v32  ;;  %v8877_v47 = vmul.f32 %v5669_v39, %v4535_v35  ;;  %v4919_v13 = vsub.f32 1.0, %v4535_v35  ;;  %v4660_v44 = vmul.f32 %v8787_v61, %v7127_v32 }
 0x367   :  { %v3533_v29 = vand.u32 2147483647, %v10628_v28  ;;  %v8885_v48 = vmul.f32 %v4727_v41, %v4535_v35  ;;  %v4023_v4 = vand.u32 2147483647, %v3959_v60  ;;  %vm2613_vm0 = vcmp.gt.f32.partialorder %v2125_v17, 0.0 }
 0x368   :  { %v5105_v14 = vadd.f32 %v8818_v21, %v3890_v24  ;;  %v8890_v42 = vmul.f32 %v5669_v39, %v4919_v13  ;;  %v4852_v11 = vmul.f32 %v8797_v27, %v7127_v32  ;;  %v5044_v40 = vmul.f32 %v8812_v63, %v7127_v32 }
 0x369   :  { %v6423_v59 = vpop.eup %6422  ;;  %v4151_v61 = vmul.f32 0.5, %v3959_v60  ;;  %v5667_v33 = vsel %vm2613_vm0, 1.0, %v10360_v37  ;;  %v3892_v46 = vmul.f32 %v3828_v1, %v7127_v32  ;;  %v3532_v21 = vmul.f32 %v10628_v28, %v3531_v56 }
 0x36a   :  { %v5106_v15 = vadd.f32 %v5105_v14, %v3891_v22  ;;  %v3529_v23 = vmul.f32 0.6931472, %v6423_v59  ;;  %vm3534_vm2 = vcmp.lt.f32.partialorder %v3533_v29, 0.0004427343  ;;  %v2805_v16 = vmax.f32 %v10630_v52, 0.0 }
 0x36b   :  { %v2869_v39 = vmul.f32 %v5667_v33, %v10630_v52  ;;  %v3509_v45 = vadd.f32 1.0, %v10631_v8  ;;  %vm8902_vm6 = vcmp.lt.f32.partialorder %v4023_v4, 1.0  ;;  %v3957_v63 = vsub.f32 %v10630_v52, %v2125_v17 }
 0x36c   :  { %v3535_v27 = vsel %vm3534_vm2, %v3532_v21, %v3529_v23  ;;  %vm4469_vm1 = vcmp.gt.f32.partialorder %v10630_v52, 0.0  ;;  %v4725_v1 = vsub.f32 1.0, %v5667_v33  ;;  %v8908_v7 = vpop.eup %6424  ;;  %v4215_v50 = vmul.f32 %v4151_v61, %v3959_v60 }
 0x36d   :  { %10634 = vst [vmem:[#allocation4_spill] sm:$0xff] %v8908_v7  ;;  %v8910_v28 = vadd.f32 %v3535_v27, %v2935_v58  ;;  %v2933_v30 = vsub.f32 %v2805_v16, %v2869_v39  ;;  %6426 = vlog2.f32 %v3509_v45  ;;  %v5733_v43 = vadd.f32 -0.5, %v4023_v4 }
 0x36e   :  { %v4021_v22 = vand.u32 2147483647, %v3957_v63  ;;  %v4149_v56 = vmul.f32 0.5, %v3957_v63  ;;  %v4533_v35 = vsel %vm4469_vm1, 1.0, %v10360_v37  ;;  %v3512_v41 = vmul.f32 -0.5, %v10631_v8 }
 0x36f   :  { %v3515_v24 = vand.u32 2147483647, %v10631_v8  ;;  %v4597_v13 = vmul.f32 %v5667_v33, %v4533_v35  ;;  %v4789_v17 = vmul.f32 %v4725_v1, %v4533_v35  ;;  %v4917_v59 = vsub.f32 1.0, %v4533_v35 }
 0x370   :  { %vm4085_vm4 = vcmp.lt.f32.partialorder %v4021_v22, 1.0  ;;  %v4213_v29 = vmul.f32 %v4149_v56, %v3957_v63  ;;  %v5731_v14 = vadd.f32 -0.5, %v4021_v22  ;;  %v5107_v61 = vadd.f32 %v5106_v15, %v3892_v46 }
 0x371   :  { %v4661_v58 = vmul.f32 %v4597_v13, %v7127_v32  ;;  %v4853_v60 = vmul.f32 %v4789_v17, %v7127_v32  ;;  %v5176_v4 = vadd.f32 %v8855_v20, %v4404_v6  ;;  %v4981_v21 = vmul.f32 %v5667_v33, %v4917_v59  ;;  %v10635_v20 = vld [vmem:[#allocation73_spill] sm:$0xff] }
 0x372   :  { %v4341_v23 = vsel %vm4085_vm4, %v4213_v29, %v5731_v14  ;;  %v5245_v52 = vadd.f32 %v8851_v9, %v4660_v44  ;;  %v5314_v16 = vadd.f32 %v8858_v25, %v4852_v11  ;;  %v3513_v39 = vadd.f32 1.0, %v3512_v41  ;;  %v8943_v41 = vpop.f32.mrb[110].mxu1 }
 0x373   :  { %v4405_v45 = vmul.f32 %v4341_v23, %v7148_v49  ;;  %v5383_v27 = vadd.f32 %v8870_v19, %v5044_v40  ;;  %v2136_v63 = vadd.f32 %v8633_v10, %v8448_v34  ;;  %v5045_v1 = vmul.f32 %v4981_v21, %v7127_v32  ;;  %v10636_v34 = vld [vmem:[#allocation41_spill] sm:$0xff] }
 0x374   :  { %v8925_v22 = vadd.f32 %v5245_v52, %v4661_v58  ;;  %v8927_v46 = vadd.f32 %v5314_v16, %v4853_v60  ;;  %v3536_v6 = vadd.f32 1.0, %v10635_v20  ;;  %v3539_v25 = vmul.f32 -0.5, %v10635_v20 }
 0x375   :  { %v8931_v44 = vadd.f32 %v5176_v4, %v4405_v45  ;;  %vm2616_vm7 = vcmp.gt.f32.partialorder %v2136_v63, 0.0  ;;  %v8934_v11 = vadd.f32 %v5383_v27, %v5045_v1  ;;  %v3960_v40 = vsub.f32 %v10636_v34, %v2136_v63  ;;  %v10637_v45 = vld [vmem:[#allocation77_spill] sm:$0xff] }
 0x376   :  { %v5670_v19 = vsel %vm2616_vm7, 1.0, %v10360_v37  ;;  %6428 = vlog2.f32 %v3536_v6  ;;  %v4343_v15 = vsel %vm8902_vm6, %v4215_v50, %v5733_v43  ;;  %v2808_v56 = vmax.f32 %v10636_v34, 0.0  ;;  %v8977_v6 = vpop.f32.mrb[111].mxu1 }
 0x377   :  { %v6427_v33 = vpop.eup %6426  ;;  %v2872_v35 = vmul.f32 %v5670_v19, %v10636_v34  ;;  %vm4472_vm8 = vcmp.gt.f32.partialorder %v10636_v34, 0.0  ;;  %v3514_v17 = vmul.f32 %v10631_v8, %v3513_v39  ;;  %vm3516_vm3 = vcmp.lt.f32.partialorder %v3515_v24, 0.0004427343 }
 0x378   :  { %v3511_v13 = vmul.f32 0.6931472, %v6427_v33  ;;  %v4536_v29 = vsel %vm4472_vm8, 1.0, %v10360_v37  ;;  %v3542_v59 = vand.u32 2147483647, %v10635_v20  ;;  %v4728_v26 = vsub.f32 1.0, %v5670_v19 }
 0x379   :  { %v2936_v14 = vsub.f32 %v2808_v56, %v2872_v35  ;;  %v8948_v58 = vmul.f32 %v5670_v19, %v4536_v29  ;;  %v8952_v50 = vmul.f32 %v8877_v47, %v7127_v32  ;;  %v8956_v43 = vmul.f32 %v8885_v48, %v7127_v32  ;;  %v10640_v33 = vld [vmem:[#allocation46_spill] sm:$0xff] }
 0x37a   :  { %v3517_v60 = vsel %vm3516_vm3, %v3514_v17, %v3511_v13  ;;  %v3540_v4 = vadd.f32 1.0, %v3539_v25  ;;  %v4152_v24 = vmul.f32 0.5, %v3960_v40  ;;  %v8958_v23 = vmul.f32 %v4728_v26, %v4536_v29 }
 0x37b   :  { %v3829_v8 = vadd.f32 %v3517_v60, %v2933_v30  ;;  %v4920_v21 = vsub.f32 1.0, %v4536_v29  ;;  %v4407_v52 = vmul.f32 %v4343_v15, %v7148_v49  ;;  %v4024_v16 = vand.u32 2147483647, %v3960_v40 }
 0x37c   :  { %v2128_v39 = vadd.f32 %v8633_v10, %v8482_v0  ;;  %v3518_v47 = vadd.f32 1.0, %v10637_v45  ;;  %v8966_v27 = vmul.f32 %v8890_v42, %v7127_v32  ;;  %vm8969_vm10 = vcmp.lt.f32.partialorder %v3542_v59, 0.0004427343 }
 0x37d   :  { %v3893_v48 = vmul.f32 %v3829_v8, %v7127_v32  ;;  %v8973_v63 = vmul.f32 %v5670_v19, %v4920_v21  ;;  %v3541_v1 = vmul.f32 %v10635_v20, %v3540_v4  ;;  %v3521_v0 = vmul.f32 -0.5, %v10637_v45 }
 0x37e   :  { %vm2614_vm5 = vcmp.gt.f32.partialorder %v2128_v39, 0.0  ;;  %6430 = vlog2.f32 %v3518_v47  ;;  %v8981_v42 = vmul.f32 %v4152_v24, %v3960_v40  ;;  %v3958_v15 = vsub.f32 %v10640_v33, %v2128_v39 }
 0x37f   :  { %v8979_v25 = vadd.f32 %v5107_v61, %v3893_v48  ;;  %v5668_v34 = vsel %vm2614_vm5, 1.0, %v10360_v37  ;;  %v8985_v35 = vadd.f32 -0.5, %v4024_v16  ;;  %v2806_v19 = vmax.f32 %v10640_v33, 0.0 }
 0x380   :  { %v6429_v56 = vpop.eup %6428  ;;  %v2870_v20 = vmul.f32 %v5668_v34, %v10640_v33  ;;  %vm4470_vm9 = vcmp.gt.f32.partialorder %v10640_v33, 0.0  ;;  %vm8990_vm12 = vcmp.lt.f32.partialorder %v4024_v16, 1.0  ;;  %v4022_v61 = vand.u32 2147483647, %v3958_v15 }
 0x381   :  { %v3538_v13 = vmul.f32 0.6931472, %v6429_v56  ;;  %v4150_v40 = vmul.f32 0.5, %v3958_v15  ;;  %v4534_v29 = vsel %vm4470_vm9, 1.0, %v10360_v37  ;;  %v3522_v26 = vadd.f32 1.0, %v3521_v0  ;;  %v10643_v0 = vld [vmem:[#allocation78_spill] sm:$0xff] }
 0x382   :  { %v2934_v59 = vsub.f32 %v2806_v19, %v2870_v20  ;;  %v4598_v60 = vmul.f32 %v5668_v34, %v4534_v29  ;;  %v4726_v4 = vsub.f32 1.0, %v5668_v34  ;;  %vm4086_vm11 = vcmp.lt.f32.partialorder %v4022_v61, 1.0 }
 0x383   :  { %v3544_v8 = vsel %vm8969_vm10, %v3541_v1, %v3538_v13  ;;  %v4214_v24 = vmul.f32 %v4150_v40, %v3958_v15  ;;  %v5732_v21 = vadd.f32 -0.5, %v4022_v61  ;;  %v4918_v48 = vsub.f32 1.0, %v4534_v29  ;;  %v10644_v13 = vld [vmem:[#allocation48_spill] sm:$0xff] }
 0x384   :  { %v3832_v39 = vadd.f32 %v3544_v8, %v2936_v14  ;;  %v4662_v16 = vmul.f32 %v4598_v60, %v7127_v32  ;;  %v4790_v47 = vmul.f32 %v4726_v4, %v4534_v29  ;;  %v3524_v33 = vand.u32 2147483647, %v10637_v45 }
 0x385   :  { %v4342_v56 = vsel %vm4086_vm11, %v4214_v24, %v5732_v21  ;;  %v2149_v19 = vadd.f32 %v8633_v10, %v8527_v53  ;;  %v3563_v20 = vadd.f32 1.0, %v10643_v0  ;;  %v3523_v9 = vmul.f32 %v10637_v45, %v3522_v26  ;;  %v9022_v21 = vpop.f32.mrb[112].mxu1 }
 0x386   :  { %v4406_v30 = vmul.f32 %v4342_v56, %v7148_v49  ;;  %v4854_v1 = vmul.f32 %v4790_v47, %v7127_v32  ;;  %v4982_v15 = vmul.f32 %v5668_v34, %v4918_v48  ;;  %v5247_v14 = vadd.f32 %v8925_v22, %v4662_v16 }
 0x387   :  { %vm2619_vm14 = vcmp.gt.f32.partialorder %v2149_v19, 0.0  ;;  %v2811_v61 = vmax.f32 %v10644_v13, 0.0  ;;  %6432 = vlog2.f32 %v3563_v20  ;;  %v3566_v22 = vmul.f32 -0.5, %v10643_v0 }
 0x388   :  { %v6431_v40 = vpop.eup %6430  ;;  %v5046_v29 = vmul.f32 %v4982_v15, %v7127_v32  ;;  %v5178_v53 = vadd.f32 %v8931_v44, %v4406_v30  ;;  %v5316_v60 = vadd.f32 %v8927_v46, %v4854_v1  ;;  %v5673_v45 = vsel %vm2619_vm14, 1.0, %v10360_v37  ;;  %v10645_v46 = vld [vmem:[#allocation102_spill] sm:$0xff] }
 0x389   :  { %v3520_v26 = vmul.f32 0.6931472, %v6431_v40  ;;  %v9012_v4 = vadd.f32 %v5247_v14, %v8952_v50  ;;  %v2875_v34 = vmul.f32 %v5673_v45, %v10644_v13  ;;  %vm3525_vm13 = vcmp.lt.f32.partialorder %v3524_v33, 0.0004427343 }
 0x38a   :  { %v9016_v8 = vadd.f32 %v5178_v53, %v4407_v52  ;;  %v9019_v24 = vadd.f32 %v5316_v60, %v8956_v43  ;;  %v5385_v44 = vadd.f32 %v8934_v11, %v5046_v29  ;;  %v9026_v16 = vadd.f32 %v8633_v10, %v10645_v46 }
 0x38b   :  { %v3526_v50 = vsel %vm3525_vm13, %v3523_v9, %v3520_v26  ;;  %v2939_v47 = vsub.f32 %v2811_v61, %v2875_v34  ;;  %v3963_v48 = vsub.f32 %v10644_v13, %v2149_v19  ;;  %v4344_v52 = vsel %vm8990_vm12, %v8981_v42, %v8985_v35 }
 0x38c   :  { %v3830_v33 = vadd.f32 %v3526_v50, %v2934_v59  ;;  %v9034_v43 = vadd.f32 %v5385_v44, %v8966_v27  ;;  %vm4475_vm15 = vcmp.gt.f32.partialorder %v10644_v13, 0.0  ;;  %v3895_v11 = vmul.f32 %v8910_v28, %v7127_v32  ;;  %v9051_v59 = vpop.f32.mrb[113].mxu1  ;;  %v10647_v44 = vld [vmem:[#allocation81_spill] sm:$0xff] }
 0x38d   :  { %v3567_v56 = vadd.f32 1.0, %v3566_v22  ;;  %v4539_v9 = vsel %vm4475_vm15, 1.0, %v10360_v37  ;;  %v4731_v20 = vsub.f32 1.0, %v5673_v45  ;;  %v2141_v42 = vadd.f32 %v8633_v10, %v8556_v5 }
 0x38e   :  { %v3894_v19 = vmul.f32 %v3830_v33, %v7127_v32  ;;  %v9041_v30 = vmul.f32 %v5673_v45, %v4539_v9  ;;  %v4923_v1 = vsub.f32 1.0, %v4539_v9  ;;  %v4408_v27 = vmul.f32 %v4344_v52, %v7148_v49 }
 0x38f   :  { %v4664_v35 = vmul.f32 %v8948_v58, %v7127_v32  ;;  %v3569_v17 = vand.u32 2147483647, %v10643_v0  ;;  %v9049_v28 = vmul.f32 %v4731_v20, %v4539_v9  ;;  %v4027_v14 = vand.u32 2147483647, %v3963_v48 }
 0x390   :  { %v5109_v15 = vadd.f32 %v8979_v25, %v3894_v19  ;;  %v9054_v13 = vmul.f32 %v5673_v45, %v4923_v1  ;;  %vm2617_vm0 = vcmp.gt.f32.partialorder %v2141_v42, 0.0  ;;  %v4856_v5 = vmul.f32 %v8958_v23, %v7127_v32  ;;  %v10646_v45 = vld [vmem:[#allocation50_spill] sm:$0xff] }
 0x391   :  { %v6433_v61 = vpop.eup %6432  ;;  %v5048_v40 = vmul.f32 %v8973_v63, %v7127_v32  ;;  %v4155_v58 = vmul.f32 0.5, %v3963_v48  ;;  %v5671_v29 = vsel %vm2617_vm0, 1.0, %v10360_v37  ;;  %v3896_v53 = vmul.f32 %v3832_v39, %v7127_v32 }
 0x392   :  { %v5110_v60 = vadd.f32 %v5109_v15, %v3895_v11  ;;  %v3565_v26 = vmul.f32 0.6931472, %v6433_v61  ;;  %v3568_v25 = vmul.f32 %v10643_v0, %v3567_v56  ;;  %vm3570_vm2 = vcmp.lt.f32.partialorder %v3569_v17, 0.0004427343 }
 0x393   :  { %v2809_v34 = vmax.f32 %v10646_v45, 0.0  ;;  %v2873_v22 = vmul.f32 %v5671_v29, %v10646_v45  ;;  %v3545_v46 = vadd.f32 1.0, %v10647_v44  ;;  %vm9066_vm6 = vcmp.lt.f32.partialorder %v4027_v14, 1.0 }
 0x394   :  { %v3571_v23 = vsel %vm3570_vm2, %v3568_v25, %v3565_v26  ;;  %v3961_v63 = vsub.f32 %v10646_v45, %v2141_v42  ;;  %vm4473_vm1 = vcmp.gt.f32.partialorder %v10646_v45, 0.0  ;;  %v4729_v39 = vsub.f32 1.0, %v5671_v29 }
 0x395   :  { %v9072_v52 = vadd.f32 %v3571_v23, %v2939_v47  ;;  %v4219_v0 = vmul.f32 %v4155_v58, %v3963_v48  ;;  %v2937_v33 = vsub.f32 %v2809_v34, %v2873_v22  ;;  %6434 = vlog2.f32 %v3545_v46 }
 0x396   :  { %v5737_v11 = vadd.f32 -0.5, %v4027_v14  ;;  %v4025_v56 = vand.u32 2147483647, %v3961_v63  ;;  %v4153_v9 = vmul.f32 0.5, %v3961_v63  ;;  %v4537_v20 = vsel %vm4473_vm1, 1.0, %v10360_v37 }
 0x397   :  { %v3548_v19 = vmul.f32 -0.5, %v10647_v44  ;;  %v3551_v1 = vand.u32 2147483647, %v10647_v44  ;;  %v4601_v17 = vmul.f32 %v5671_v29, %v4537_v20  ;;  %v4793_v15 = vmul.f32 %v4729_v39, %v4537_v20 }
 0x398   :  { %vm4089_vm4 = vcmp.lt.f32.partialorder %v4025_v56, 1.0  ;;  %v4217_v42 = vmul.f32 %v4153_v9, %v3961_v63  ;;  %v5735_v61 = vadd.f32 -0.5, %v4025_v56  ;;  %v4921_v26 = vsub.f32 1.0, %v4537_v20 }
 0x399   :  { %v4665_v47 = vmul.f32 %v4601_v17, %v7127_v32  ;;  %v4857_v48 = vmul.f32 %v4793_v15, %v7127_v32  ;;  %v5111_v58 = vadd.f32 %v5110_v60, %v3896_v53  ;;  %v5180_v14 = vadd.f32 %v9016_v8, %v4408_v27  ;;  %v10650_v8 = vld [vmem:[#allocation83_spill] sm:$0xff]  ;;  %v9108_v17 = vpop.f32.mrb[114].mxu1 }
 0x39a   :  { %v4345_v25 = vsel %vm4089_vm4, %v4217_v42, %v5735_v61  ;;  %v4985_v45 = vmul.f32 %v5671_v29, %v4921_v26  ;;  %v5249_v34 = vadd.f32 %v9012_v4, %v4664_v35  ;;  %v5318_v22 = vadd.f32 %v9019_v24, %v4856_v5 }
 0x39b   :  { %v3549_v46 = vadd.f32 1.0, %v3548_v19  ;;  %v4409_v23 = vmul.f32 %v4345_v25, %v7148_v49  ;;  %v5387_v63 = vadd.f32 %v9034_v43, %v5048_v40  ;;  %v2152_v39 = vadd.f32 %v8633_v10, %v8610_v12  ;;  %v10652_v10 = vld [vmem:[#allocation52_spill] sm:$0xff] }
 0x39c   :  { %v5049_v56 = vmul.f32 %v4985_v45, %v7127_v32  ;;  %v9087_v9 = vadd.f32 %v5249_v34, %v4665_v47  ;;  %v9089_v53 = vadd.f32 %v5318_v22, %v4857_v48  ;;  %v3572_v27 = vadd.f32 1.0, %v10650_v8 }
 0x39d   :  { %v10651_v4 = vand.u32 2147483647, %v8271_v2  ;;  %v9096_v24 = vadd.f32 %v5180_v14, %v4409_v23  ;;  %vm2620_vm7 = vcmp.gt.f32.partialorder %v2152_v39, 0.0  ;;  %v3575_v43 = vmul.f32 -0.5, %v10650_v8  ;;  %v9129_v23 = vld [vmem:[%s10143_s5] ss:$0 sm:$0xff] }
 0x39e   :  { %v9099_v5 = vadd.f32 %v5387_v63, %v5049_v56  ;;  %v5674_v12 = vsel %vm2620_vm7, 1.0, %v10360_v37  ;;  %6436 = vlog2.f32 %v3572_v27  ;;  %v3964_v40 = vsub.f32 %v10652_v10, %v2152_v39 }
 0x39f   :  { %v9094_v35 = vsub.f32 0.0, %v10651_v4  ;;  %v6435_v29 = vpop.eup %6434  ;;  %v4347_v60 = vsel %vm9066_vm6, %v4219_v0, %v5737_v11  ;;  %v2812_v20 = vmax.f32 %v10652_v10, 0.0  ;;  %v2876_v19 = vmul.f32 %v5674_v12, %v10652_v10 }
 0x3a0   :  { %vm4476_vm8 = vcmp.gt.f32.partialorder %v10652_v10, 0.0  ;;  %v3547_v15 = vmul.f32 0.6931472, %v6435_v29  ;;  %v3550_v42 = vmul.f32 %v10647_v44, %v3549_v46  ;;  %vm3552_vm3 = vcmp.lt.f32.partialorder %v3551_v1, 0.0004427343 }
 0x3a1   :  { %v4540_v61 = vsel %vm4476_vm8, 1.0, %v10360_v37  ;;  %v2940_v26 = vsub.f32 %v2812_v20, %v2876_v19  ;;  %v3578_v47 = vand.u32 2147483647, %v10650_v8  ;;  %v4732_v50 = vsub.f32 1.0, %v5674_v12 }
 0x3a2   :  { %v9113_v48 = vmul.f32 %v5674_v12, %v4540_v61  ;;  %v9117_v0 = vmul.f32 %v9041_v30, %v7127_v32  ;;  %v9121_v11 = vmul.f32 %v9049_v28, %v7127_v32  ;;  %v3553_v14 = vsel %vm3552_vm3, %v3550_v42, %v3547_v15  ;;  %v10653_v28 = vld [vmem:[#allocation84_spill] sm:$0xff] }
 0x3a3   :  { %v3576_v25 = vadd.f32 1.0, %v3575_v43  ;;  %v3833_v44 = vadd.f32 %v3553_v14, %v2937_v33  ;;  %v4156_v1 = vmul.f32 0.5, %v3964_v40  ;;  %v9123_v45 = vmul.f32 %v4732_v50, %v4540_v61  ;;  %v9147_v43 = vpop.f32.mrb[115].mxu1 }
 0x3a4   :  { %v4924_v34 = vsub.f32 1.0, %v4540_v61  ;;  %v4411_v22 = vmul.f32 %v4347_v60, %v7148_v49  ;;  %v4028_v46 = vand.u32 2147483647, %v3964_v40  ;;  %v2144_v30 = vadd.f32 %v9129_v23, %v8651_v55  ;;  %v10656_v60 = vld [vmem:[#allocation53_spill] sm:$0xff] }
 0x3a5   :  { %v3554_v63 = vadd.f32 1.0, %v10653_v28  ;;  %v9136_v33 = vmul.f32 %v9054_v13, %v7127_v32  ;;  %v3897_v39 = vmul.f32 %v3833_v44, %v7127_v32  ;;  %vm9139_vm10 = vcmp.lt.f32.partialorder %v3578_v47, 0.0004427343 }
 0x3a6   :  { %v9143_v27 = vmul.f32 %v5674_v12, %v4924_v34  ;;  %v3577_v4 = vmul.f32 %v10650_v8, %v3576_v25  ;;  %vm2618_vm5 = vcmp.gt.f32.partialorder %v2144_v30, 0.0  ;;  %v3557_v55 = vmul.f32 -0.5, %v10653_v28 }
 0x3a7   :  { %6438 = vlog2.f32 %v3554_v63  ;;  %v9149_v10 = vadd.f32 %v5111_v58, %v3897_v39  ;;  %v9151_v13 = vmul.f32 %v4156_v1, %v3964_v40  ;;  %v5672_v29 = vsel %vm2618_vm5, 1.0, %v10360_v37 }
 0x3a8   :  { %v3962_v20 = vsub.f32 %v10656_v60, %v2144_v30  ;;  %v6437_v19 = vpop.eup %6436  ;;  %v9155_v15 = vadd.f32 -0.5, %v4028_v46  ;;  %v2810_v12 = vmax.f32 %v10656_v60, 0.0  ;;  %v2874_v8 = vmul.f32 %v5672_v29, %v10656_v60 }
 0x3a9   :  { %vm4474_vm9 = vcmp.gt.f32.partialorder %v10656_v60, 0.0  ;;  %v3574_v42 = vmul.f32 0.6931472, %v6437_v19  ;;  %vm9160_vm12 = vcmp.lt.f32.partialorder %v4028_v46, 1.0  ;;  %v3558_v14 = vadd.f32 1.0, %v3557_v55  ;;  %v10659_v55 = vld [vmem:[#allocation89_spill] sm:$0xff] }
 0x3aa   :  { %v4026_v58 = vand.u32 2147483647, %v3962_v20  ;;  %v4154_v40 = vmul.f32 0.5, %v3962_v20  ;;  %v4538_v47 = vsel %vm4474_vm9, 1.0, %v10360_v37  ;;  %v2938_v50 = vsub.f32 %v2810_v12, %v2874_v8 }
 0x3ab   :  { %v4602_v25 = vmul.f32 %v5672_v29, %v4538_v47  ;;  %v4730_v44 = vsub.f32 1.0, %v5672_v29  ;;  %v3580_v1 = vsel %vm9139_vm10, %v3577_v4, %v3574_v42  ;;  %v4922_v60 = vsub.f32 1.0, %v4538_v47  ;;  %v10660_v42 = vld [vmem:[#allocation56_spill] sm:$0xff] }
 0x3ac   :  { %vm4090_vm11 = vcmp.lt.f32.partialorder %v4026_v58, 1.0  ;;  %v4218_v34 = vmul.f32 %v4154_v40, %v3962_v20  ;;  %v5736_v30 = vadd.f32 -0.5, %v4026_v58  ;;  %v3836_v63 = vadd.f32 %v3580_v1, %v2940_v26 }
 0x3ad   :  { %v4666_v46 = vmul.f32 %v4602_v25, %v7127_v32  ;;  %v4794_v39 = vmul.f32 %v4730_v44, %v4538_v47  ;;  %v3560_v19 = vand.u32 2147483647, %v10653_v28  ;;  %v2165_v12 = vadd.f32 %v9129_v23, %v8699_v36 }
 0x3ae   :  { %v4346_v2 = vsel %vm4090_vm11, %v4218_v34, %v5736_v30  ;;  %v3599_v8 = vadd.f32 1.0, %v10659_v55  ;;  %v3559_v7 = vmul.f32 %v10653_v28, %v3558_v14  ;;  %v4986_v20 = vmul.f32 %v5672_v29, %v4922_v60  ;;  %v9192_v34 = vpop.f32.mrb[116].mxu1 }
 0x3af   :  { %v4410_v56 = vmul.f32 %v4346_v2, %v7148_v49  ;;  %v4858_v4 = vmul.f32 %v4794_v39, %v7127_v32  ;;  %v5251_v26 = vadd.f32 %v9087_v9, %v4666_v46  ;;  %vm2623_vm14 = vcmp.gt.f32.partialorder %v2165_v12, 0.0 }
 0x3b0   :  { %v2815_v58 = vmax.f32 %v10660_v42, 0.0  ;;  %6440 = vlog2.f32 %v3599_v8  ;;  %v5050_v47 = vmul.f32 %v4986_v20, %v7127_v32  ;;  %v5677_v28 = vsel %vm2623_vm14, 1.0, %v10360_v37 }
 0x3b1   :  { %v6439_v40 = vpop.eup %6438  ;;  %v5182_v36 = vadd.f32 %v9096_v24, %v4410_v56  ;;  %v5320_v25 = vadd.f32 %v9089_v53, %v4858_v4  ;;  %v9182_v2 = vadd.f32 %v5251_v26, %v9117_v0  ;;  %v2879_v29 = vmul.f32 %v5677_v28, %v10660_v42 }
 0x3b2   :  { %v3556_v14 = vmul.f32 0.6931472, %v6439_v40  ;;  %v3602_v9 = vmul.f32 -0.5, %v10659_v55  ;;  %vm3561_vm13 = vcmp.lt.f32.partialorder %v3560_v19, 0.0004427343  ;;  %v5389_v24 = vadd.f32 %v9099_v5, %v5050_v47 }
 0x3b3   :  { %v9186_v44 = vadd.f32 %v5182_v36, %v4411_v22  ;;  %v9189_v1 = vadd.f32 %v5320_v25, %v9121_v11  ;;  %v2943_v46 = vsub.f32 %v2815_v58, %v2879_v29  ;;  %v3967_v0 = vsub.f32 %v10660_v42, %v2165_v12 }
 0x3b4   :  { %v3562_v30 = vsel %vm3561_vm13, %v3559_v7, %v3556_v14  ;;  %v4348_v39 = vsel %vm9160_vm12, %v9151_v13, %v9155_v15  ;;  %v9201_v60 = vadd.f32 %v5389_v24, %v9136_v33  ;;  %vm4479_vm15 = vcmp.gt.f32.partialorder %v10660_v42, 0.0 }
 0x3b5   :  { %v3834_v22 = vadd.f32 %v3562_v30, %v2938_v50  ;;  %v3899_v5 = vmul.f32 %v9072_v52, %v7127_v32  ;;  %v3603_v11 = vadd.f32 1.0, %v3602_v9  ;;  %v4543_v7 = vsel %vm4479_vm15, 1.0, %v10360_v37  ;;  %v9218_v50 = vpop.f32.mrb[117].mxu1  ;;  %v10662_v9 = vld [vmem:[#allocation90_spill] sm:$0xff] }
 0x3b6   :  { %v4735_v19 = vsub.f32 1.0, %v5677_v28  ;;  %v9208_v8 = vmul.f32 %v5677_v28, %v4543_v7  ;;  %v4927_v56 = vsub.f32 1.0, %v4543_v7  ;;  %v2157_v13 = vadd.f32 %v9129_v23, %v8725_v38 }
 0x3b7   :  { %v3898_v12 = vmul.f32 %v3834_v22, %v7127_v32  ;;  %v4412_v33 = vmul.f32 %v4348_v39, %v7148_v49  ;;  %v4668_v15 = vmul.f32 %v9113_v48, %v7127_v32  ;;  %v3605_v61 = vand.u32 2147483647, %v10659_v55 }
 0x3b8   :  { %v9216_v52 = vmul.f32 %v4735_v19, %v4543_v7  ;;  %v4031_v20 = vand.u32 2147483647, %v3967_v0  ;;  %v9221_v26 = vmul.f32 %v5677_v28, %v4927_v56  ;;  %vm2621_vm0 = vcmp.gt.f32.partialorder %v2157_v13, 0.0  ;;  %v10661_v28 = vld [vmem:[#allocation57_spill] sm:$0xff] }
 0x3b9   :  { %v5113_v4 = vadd.f32 %v9149_v10, %v3898_v12  ;;  %v4860_v38 = vmul.f32 %v9123_v45, %v7127_v32  ;;  %v5052_v58 = vmul.f32 %v9143_v27, %v7127_v32  ;;  %v4159_v48 = vmul.f32 0.5, %v3967_v0 }
 0x3ba   :  { %v6441_v42 = vpop.eup %6440  ;;  %v5675_v40 = vsel %vm2621_vm0, 1.0, %v10360_v37  ;;  %v3900_v47 = vmul.f32 %v3836_v63, %v7127_v32  ;;  %v3604_v10 = vmul.f32 %v10659_v55, %v3603_v11  ;;  %vm3606_vm2 = vcmp.lt.f32.partialorder %v3605_v61, 0.0004427343 }
 0x3bb   :  { %v5114_v36 = vadd.f32 %v5113_v4, %v3899_v5  ;;  %v3601_v25 = vmul.f32 0.6931472, %v6441_v42  ;;  %v2813_v14 = vmax.f32 %v10661_v28, 0.0  ;;  %v2877_v29 = vmul.f32 %v5675_v40, %v10661_v28 }
 0x3bc   :  { %v3581_v24 = vadd.f32 1.0, %v10662_v9  ;;  %vm9233_vm6 = vcmp.lt.f32.partialorder %v4031_v20, 1.0  ;;  %v3965_v27 = vsub.f32 %v10661_v28, %v2157_v13  ;;  %vm4477_vm1 = vcmp.gt.f32.partialorder %v10661_v28, 0.0 }
 0x3bd   :  { %v3607_v45 = vsel %vm3606_vm2, %v3604_v10, %v3601_v25  ;;  %v4733_v63 = vsub.f32 1.0, %v5675_v40  ;;  %v4223_v55 = vmul.f32 %v4159_v48, %v3967_v0  ;;  %v2941_v22 = vsub.f32 %v2813_v14, %v2877_v29 }
 0x3be   :  { %v9239_v39 = vadd.f32 %v3607_v45, %v2943_v46  ;;  %6442 = vlog2.f32 %v3581_v24  ;;  %v5741_v5 = vadd.f32 -0.5, %v4031_v20  ;;  %v4029_v11 = vand.u32 2147483647, %v3965_v27 }
 0x3bf   :  { %v4157_v7 = vmul.f32 0.5, %v3965_v27  ;;  %v4541_v19 = vsel %vm4477_vm1, 1.0, %v10360_v37  ;;  %v3584_v12 = vmul.f32 -0.5, %v10662_v9  ;;  %v3587_v56 = vand.u32 2147483647, %v10662_v9 }
 0x3c0   :  { %v4605_v61 = vmul.f32 %v5675_v40, %v4541_v19  ;;  %v4797_v4 = vmul.f32 %v4733_v63, %v4541_v19  ;;  %vm4093_vm4 = vcmp.lt.f32.partialorder %v4029_v11, 1.0  ;;  %v5739_v42 = vadd.f32 -0.5, %v4029_v11 }
 0x3c1   :  { %v4221_v13 = vmul.f32 %v4157_v7, %v3965_v27  ;;  %v4925_v25 = vsub.f32 1.0, %v4541_v19  ;;  %v5115_v48 = vadd.f32 %v5114_v36, %v3900_v47  ;;  %v5184_v20 = vadd.f32 %v9186_v44, %v4412_v33  ;;  %v10665_v44 = vld [vmem:[#allocation91_spill] sm:$0xff] }
 0x3c2   :  { %v4669_v46 = vmul.f32 %v4605_v61, %v7127_v32  ;;  %v4861_v0 = vmul.f32 %v4797_v4, %v7127_v32  ;;  %v5253_v14 = vadd.f32 %v9182_v2, %v4668_v15  ;;  %v5322_v29 = vadd.f32 %v9189_v1, %v4860_v38  ;;  %v9275_v4 = vpop.f32.mrb[118].mxu1 }
 0x3c3   :  { %v4349_v10 = vsel %vm4093_vm4, %v4221_v13, %v5739_v42  ;;  %v4989_v28 = vmul.f32 %v5675_v40, %v4925_v25  ;;  %v3585_v24 = vadd.f32 1.0, %v3584_v12  ;;  %v5391_v27 = vadd.f32 %v9201_v60, %v5052_v58  ;;  %v10667_v58 = vld [vmem:[#allocation60_spill] sm:$0xff] }
 0x3c4   :  { %v4413_v45 = vmul.f32 %v4349_v10, %v7148_v49  ;;  %v2168_v63 = vadd.f32 %v9129_v23, %v8782_v31  ;;  %v9254_v7 = vadd.f32 %v5253_v14, %v4669_v46  ;;  %v9256_v47 = vadd.f32 %v5322_v29, %v4861_v0 }
 0x3c5   :  { %v5053_v11 = vmul.f32 %v4989_v28, %v7127_v32  ;;  %v3608_v33 = vadd.f32 1.0, %v10665_v44  ;;  %v10666_v2 = vand.u32 2147483647, %v8531_v51  ;;  %v3611_v60 = vmul.f32 -0.5, %v10665_v44 }
 0x3c6   :  { %v9263_v1 = vadd.f32 %v5184_v20, %v4413_v45  ;;  %vm2624_vm7 = vcmp.gt.f32.partialorder %v2168_v63, 0.0  ;;  %v3968_v40 = vsub.f32 %v10667_v58, %v2168_v63  ;;  %v4351_v19 = vsel %vm9233_vm6, %v4223_v55, %v5741_v5  ;;  %v10668_v63 = vld [vmem:[#allocation92_spill] sm:$0xff] }
 0x3c7   :  { %v9261_v15 = vsub.f32 0.0, %v10666_v2  ;;  %v9266_v38 = vadd.f32 %v5391_v27, %v5053_v11  ;;  %v5678_v31 = vsel %vm2624_vm7, 1.0, %v10360_v37  ;;  %6444 = vlog2.f32 %v3608_v33 }
 0x3c8   :  { %v6443_v36 = vpop.eup %6442  ;;  %v2816_v12 = vmax.f32 %v10667_v58, 0.0  ;;  %v2880_v61 = vmul.f32 %v5678_v31, %v10667_v58  ;;  %vm4480_vm8 = vcmp.gt.f32.partialorder %v10667_v58, 0.0  ;;  %v3586_v42 = vmul.f32 %v10662_v9, %v3585_v24 }
 0x3c9   :  { %v3583_v13 = vmul.f32 0.6931472, %v6443_v36  ;;  %vm3588_vm3 = vcmp.lt.f32.partialorder %v3587_v56, 0.0004427343  ;;  %v4544_v25 = vsel %vm4480_vm8, 1.0, %v10360_v37  ;;  %v4736_v30 = vsub.f32 1.0, %v5678_v31 }
 0x3ca   :  { %v2944_v46 = vsub.f32 %v2816_v12, %v2880_v61  ;;  %v3614_v0 = vand.u32 2147483647, %v10665_v44  ;;  %v9280_v20 = vmul.f32 %v5678_v31, %v4544_v25  ;;  %v9284_v55 = vmul.f32 %v9208_v8, %v7127_v32 }
 0x3cb   :  { %v9288_v5 = vmul.f32 %v9216_v52, %v7127_v32  ;;  %v3589_v10 = vsel %vm3588_vm3, %v3586_v42, %v3583_v13  ;;  %v3612_v28 = vadd.f32 1.0, %v3611_v60  ;;  %v4160_v56 = vmul.f32 0.5, %v3968_v40  ;;  %v9309_v60 = vpop.f32.mrb[119].mxu1 }
 0x3cc   :  { %v3837_v9 = vadd.f32 %v3589_v10, %v2941_v22  ;;  %v9290_v14 = vmul.f32 %v4736_v30, %v4544_v25  ;;  %v4928_v29 = vsub.f32 1.0, %v4544_v25  ;;  %v4415_v24 = vmul.f32 %v4351_v19, %v7148_v49  ;;  %v10671_v19 = vld [vmem:[#allocation61_spill] sm:$0xff] }
 0x3cd   :  { %v4032_v45 = vand.u32 2147483647, %v3968_v40  ;;  %v2160_v27 = vadd.f32 %v9129_v23, %v8816_v54  ;;  %v3590_v8 = vadd.f32 1.0, %v10668_v63  ;;  %v9298_v11 = vmul.f32 %v9221_v26, %v7127_v32 }
 0x3ce   :  { %v3901_v52 = vmul.f32 %v3837_v9, %v7127_v32  ;;  %vm9301_vm10 = vcmp.lt.f32.partialorder %v3614_v0, 0.0004427343  ;;  %v9305_v33 = vmul.f32 %v5678_v31, %v4928_v29  ;;  %v3613_v2 = vmul.f32 %v10665_v44, %v3612_v28 }
 0x3cf   :  { %vm2622_vm5 = vcmp.gt.f32.partialorder %v2160_v27, 0.0  ;;  %6446 = vlog2.f32 %v3590_v8  ;;  %v3593_v54 = vmul.f32 -0.5, %v10668_v63  ;;  %v9313_v26 = vmul.f32 %v4160_v56, %v3968_v40 }
 0x3d0   :  { %v9311_v58 = vadd.f32 %v5115_v48, %v3901_v52  ;;  %v5676_v36 = vsel %vm2622_vm5, 1.0, %v10360_v37  ;;  %v3966_v12 = vsub.f32 %v10671_v19, %v2160_v27  ;;  %v9317_v13 = vadd.f32 -0.5, %v4032_v45 }
 0x3d1   :  { %v6445_v61 = vpop.eup %6444  ;;  %v2814_v31 = vmax.f32 %v10671_v19, 0.0  ;;  %v2878_v44 = vmul.f32 %v5676_v36, %v10671_v19  ;;  %vm4478_vm9 = vcmp.gt.f32.partialorder %v10671_v19, 0.0  ;;  %vm9322_vm12 = vcmp.lt.f32.partialorder %v4032_v45, 1.0 }
 0x3d2   :  { %v3610_v42 = vmul.f32 0.6931472, %v6445_v61  ;;  %v4030_v48 = vand.u32 2147483647, %v3966_v12  ;;  %v4158_v40 = vmul.f32 0.5, %v3966_v12  ;;  %v4542_v0 = vsel %vm4478_vm9, 1.0, %v10360_v37 }
 0x3d3   :  { %v2942_v30 = vsub.f32 %v2814_v31, %v2878_v44  ;;  %v3594_v10 = vadd.f32 1.0, %v3593_v54  ;;  %v4606_v28 = vmul.f32 %v5676_v36, %v4542_v0  ;;  %v4734_v9 = vsub.f32 1.0, %v5676_v36  ;;  %v10674_v54 = vld [vmem:[#allocation98_spill] sm:$0xff] }
 0x3d4   :  { %v3616_v56 = vsel %vm9301_vm10, %v3613_v2, %v3610_v42  ;;  %vm4094_vm11 = vcmp.lt.f32.partialorder %v4030_v48, 1.0  ;;  %v4222_v29 = vmul.f32 %v4158_v40, %v3966_v12  ;;  %v5740_v27 = vadd.f32 -0.5, %v4030_v48  ;;  %v10675_v42 = vld [vmem:[#allocation65_spill] sm:$0xff] }
 0x3d5   :  { %v3840_v8 = vadd.f32 %v3616_v56, %v2944_v46  ;;  %v4670_v45 = vmul.f32 %v4606_v28, %v7127_v32  ;;  %v4798_v52 = vmul.f32 %v4734_v9, %v4542_v0  ;;  %v4926_v19 = vsub.f32 1.0, %v4542_v0 }
 0x3d6   :  { %v3596_v61 = vand.u32 2147483647, %v10668_v63  ;;  %v4350_v53 = vsel %vm4094_vm11, %v4222_v29, %v5740_v27  ;;  %v2181_v31 = vadd.f32 %v9129_v23, %v8861_v18  ;;  %v3635_v44 = vadd.f32 1.0, %v10674_v54  ;;  %v9354_v29 = vpop.f32.mrb[120].mxu1 }
 0x3d7   :  { %v3595_v51 = vmul.f32 %v10668_v63, %v3594_v10  ;;  %v4414_v22 = vmul.f32 %v4350_v53, %v7148_v49  ;;  %v4862_v2 = vmul.f32 %v4798_v52, %v7127_v32  ;;  %v4990_v12 = vmul.f32 %v5676_v36, %v4926_v19 }
 0x3d8   :  { %v5255_v46 = vadd.f32 %v9254_v7, %v4670_v45  ;;  %vm2627_vm14 = vcmp.gt.f32.partialorder %v2181_v31, 0.0  ;;  %v2819_v48 = vmax.f32 %v10675_v42, 0.0  ;;  %6448 = vlog2.f32 %v3635_v44 }
 0x3d9   :  { %v6447_v40 = vpop.eup %6446  ;;  %v5054_v0 = vmul.f32 %v4990_v12, %v7127_v32  ;;  %v5186_v18 = vadd.f32 %v9263_v1, %v4414_v22  ;;  %v5324_v28 = vadd.f32 %v9256_v47, %v4862_v2  ;;  %v5681_v63 = vsel %vm2627_vm14, 1.0, %v10360_v37 }
 0x3da   :  { %v3592_v10 = vmul.f32 0.6931472, %v6447_v40  ;;  %v9344_v53 = vadd.f32 %v5255_v46, %v9284_v55  ;;  %v2883_v36 = vmul.f32 %v5681_v63, %v10675_v42  ;;  %v3638_v7 = vmul.f32 -0.5, %v10674_v54 }
 0x3db   :  { %vm3597_vm13 = vcmp.lt.f32.partialorder %v3596_v61, 0.0004427343  ;;  %v9348_v9 = vadd.f32 %v5186_v18, %v4415_v24  ;;  %v9351_v56 = vadd.f32 %v5324_v28, %v9288_v5  ;;  %v5393_v1 = vadd.f32 %v9266_v38, %v5054_v0 }
 0x3dc   :  { %v3598_v27 = vsel %vm3597_vm13, %v3595_v51, %v3592_v10  ;;  %v2947_v45 = vsub.f32 %v2819_v48, %v2883_v36  ;;  %v3971_v55 = vsub.f32 %v10675_v42, %v2181_v31  ;;  %v4352_v52 = vsel %vm9322_vm12, %v9313_v26, %v9317_v13 }
 0x3dd   :  { %v3838_v24 = vadd.f32 %v3598_v27, %v2942_v30  ;;  %v9363_v19 = vadd.f32 %v5393_v1, %v9298_v11  ;;  %vm4483_vm15 = vcmp.gt.f32.partialorder %v10675_v42, 0.0  ;;  %v3903_v38 = vmul.f32 %v9239_v39, %v7127_v32  ;;  %v9380_v30 = vpop.f32.mrb[121].mxu1 }
 0x3de   :  { %v3639_v5 = vadd.f32 1.0, %v3638_v7  ;;  %v4547_v51 = vsel %vm4483_vm15, 1.0, %v10360_v37  ;;  %v4739_v61 = vsub.f32 1.0, %v5681_v63  ;;  %v2173_v26 = vadd.f32 %v9129_v23, %v8887_v3  ;;  %v10677_v7 = vld [vmem:[#allocation101_spill] sm:$0xff] }
 0x3df   :  { %v3902_v31 = vmul.f32 %v3838_v24, %v7127_v32  ;;  %v9370_v44 = vmul.f32 %v5681_v63, %v4547_v51  ;;  %v4931_v22 = vsub.f32 1.0, %v4547_v51  ;;  %v4416_v11 = vmul.f32 %v4352_v52, %v7148_v49 }
 0x3e0   :  { %v4672_v13 = vmul.f32 %v9280_v20, %v7127_v32  ;;  %v3641_v25 = vand.u32 2147483647, %v10674_v54  ;;  %v9378_v39 = vmul.f32 %v4739_v61, %v4547_v51  ;;  %v4035_v12 = vand.u32 2147483647, %v3971_v55 }
 0x3e1   :  { %v5117_v2 = vadd.f32 %v9311_v58, %v3902_v31  ;;  %v9383_v46 = vmul.f32 %v5681_v63, %v4931_v22  ;;  %vm2625_vm0 = vcmp.gt.f32.partialorder %v2173_v26, 0.0  ;;  %v4864_v3 = vmul.f32 %v9290_v14, %v7127_v32  ;;  %v10676_v63 = vld [vmem:[#allocation67_spill] sm:$0xff] }
 0x3e2   :  { %v6449_v42 = vpop.eup %6448  ;;  %v5056_v48 = vmul.f32 %v9305_v33, %v7127_v32  ;;  %v4163_v20 = vmul.f32 0.5, %v3971_v55  ;;  %v5679_v40 = vsel %vm2625_vm0, 1.0, %v10360_v37  ;;  %v3904_v0 = vmul.f32 %v3840_v8, %v7127_v32 }
 0x3e3   :  { %v5118_v18 = vadd.f32 %v5117_v2, %v3903_v38  ;;  %v3637_v28 = vmul.f32 0.6931472, %v6449_v42  ;;  %v3640_v58 = vmul.f32 %v10674_v54, %v3639_v5  ;;  %vm3642_vm2 = vcmp.lt.f32.partialorder %v3641_v25, 0.0004427343 }
 0x3e4   :  { %v2817_v10 = vmax.f32 %v10676_v63, 0.0  ;;  %v2881_v36 = vmul.f32 %v5679_v40, %v10676_v63  ;;  %v3617_v1 = vadd.f32 1.0, %v10677_v7  ;;  %vm9395_vm6 = vcmp.lt.f32.partialorder %v4035_v12, 1.0 }
 0x3e5   :  { %v3643_v14 = vsel %vm3642_vm2, %v3640_v58, %v3637_v28  ;;  %v3969_v33 = vsub.f32 %v10676_v63, %v2173_v26  ;;  %vm4481_vm1 = vcmp.gt.f32.partialorder %v10676_v63, 0.0  ;;  %v4737_v8 = vsub.f32 1.0, %v5679_v40 }
 0x3e6   :  { %v9401_v52 = vadd.f32 %v3643_v14, %v2947_v45  ;;  %v4227_v54 = vmul.f32 %v4163_v20, %v3971_v55  ;;  %v2945_v24 = vsub.f32 %v2817_v10, %v2881_v36  ;;  %6450 = vlog2.f32 %v3617_v1 }
 0x3e7   :  { %v5745_v38 = vadd.f32 -0.5, %v4035_v12  ;;  %v4033_v5 = vand.u32 2147483647, %v3969_v33  ;;  %v4161_v51 = vmul.f32 0.5, %v3969_v33  ;;  %v4545_v61 = vsel %vm4481_vm1, 1.0, %v10360_v37 }
 0x3e8   :  { %v3620_v31 = vmul.f32 -0.5, %v10677_v7  ;;  %v3623_v22 = vand.u32 2147483647, %v10677_v7  ;;  %v4609_v25 = vmul.f32 %v5679_v40, %v4545_v61  ;;  %v4801_v2 = vmul.f32 %v4737_v8, %v4545_v61 }
 0x3e9   :  { %vm4097_vm4 = vcmp.lt.f32.partialorder %v4033_v5, 1.0  ;;  %v4225_v26 = vmul.f32 %v4161_v51, %v3969_v33  ;;  %v5743_v42 = vadd.f32 -0.5, %v4033_v5  ;;  %v4929_v28 = vsub.f32 1.0, %v4545_v61 }
 0x3ea   :  { %v4673_v45 = vmul.f32 %v4609_v25, %v7127_v32  ;;  %v4865_v55 = vmul.f32 %v4801_v2, %v7127_v32  ;;  %v5119_v20 = vadd.f32 %v5118_v18, %v3904_v0  ;;  %v5188_v12 = vadd.f32 %v9348_v9, %v4416_v11  ;;  %v10680_v9 = vld [vmem:[#allocation106_spill] sm:$0xff] }
 0x3eb   :  { %v4353_v58 = vsel %vm4097_vm4, %v4225_v26, %v5743_v42  ;;  %v4993_v63 = vmul.f32 %v5679_v40, %v4929_v28  ;;  %v5257_v10 = vadd.f32 %v9344_v53, %v4672_v13  ;;  %v5326_v36 = vadd.f32 %v9351_v56, %v4864_v3  ;;  %v10681_v3 = vld [vmem:[#allocation71_spill] sm:$0xff] }
 0x3ec   :  { %v3621_v1 = vadd.f32 1.0, %v3620_v31  ;;  %v4417_v14 = vmul.f32 %v4353_v58, %v7148_v49  ;;  %v5395_v33 = vadd.f32 %v9363_v19, %v5056_v48  ;;  %v2184_v8 = vadd.f32 %v9129_v23, %v8943_v41  ;;  %v9436_v31 = vpop.f32.mrb[122].mxu1 }
 0x3ed   :  { %v5057_v5 = vmul.f32 %v4993_v63, %v7127_v32  ;;  %v9416_v51 = vadd.f32 %v5257_v10, %v4673_v45  ;;  %v9418_v0 = vadd.f32 %v5326_v36, %v4865_v55  ;;  %v3644_v11 = vadd.f32 1.0, %v10680_v9 }
 0x3ee   :  { %v9422_v53 = vmul.f32 1.442695, %v9094_v35  ;;  %v9424_v56 = vadd.f32 %v5188_v12, %v4417_v14  ;;  %vm2628_vm7 = vcmp.gt.f32.partialorder %v2184_v8, 0.0  ;;  %v3647_v13 = vmul.f32 -0.5, %v10680_v9  ;;  %v10682_v14 = vld [vmem:[#allocation107_spill] sm:$0xff] }
 0x3ef   :  { %v9427_v19 = vadd.f32 %v5395_v33, %v5057_v5  ;;  %v5682_v41 = vsel %vm2628_vm7, 1.0, %v10360_v37  ;;  %6452 = vlog2.f32 %v3644_v11  ;;  %v3972_v48 = vsub.f32 %v10681_v3, %v2184_v8  ;;  %v9470_v11 = vpop.f32.mrb[123].mxu1 }
 0x3f0   :  { %v6451_v40 = vpop.eup %6450  ;;  %v4355_v18 = vsel %vm9395_vm6, %v4227_v54, %v5745_v38  ;;  %v2820_v61 = vmax.f32 %v10681_v3, 0.0  ;;  %v2884_v35 = vmul.f32 %v5682_v41, %v10681_v3  ;;  %vm4484_vm8 = vcmp.gt.f32.partialorder %v10681_v3, 0.0 }
 0x3f1   :  { %v3619_v25 = vmul.f32 0.6931472, %v6451_v40  ;;  %v3622_v2 = vmul.f32 %v10677_v7, %v3621_v1  ;;  %vm3624_vm3 = vcmp.lt.f32.partialorder %v3623_v22, 0.0004427343  ;;  %v4548_v26 = vsel %vm4484_vm8, 1.0, %v10360_v37  ;;  %v10685_v40 = vld [vmem:[#allocation72_spill] sm:$0xff] }
 0x3f2   :  { %v2948_v42 = vsub.f32 %v2820_v61, %v2884_v35  ;;  %v3650_v28 = vand.u32 2147483647, %v10680_v9  ;;  %v9441_v45 = vmul.f32 %v5682_v41, %v4548_v26  ;;  %v4740_v27 = vsub.f32 1.0, %v5682_v41 }
 0x3f3   :  { %v9445_v54 = vmul.f32 %v9370_v44, %v7127_v32  ;;  %v9449_v38 = vmul.f32 %v9378_v39, %v7127_v32  ;;  %v3625_v55 = vsel %vm3624_vm3, %v3622_v2, %v3619_v25  ;;  %v3648_v12 = vadd.f32 1.0, %v3647_v13 }
 0x3f4   :  { %v3841_v7 = vadd.f32 %v3625_v55, %v2945_v24  ;;  %v4164_v22 = vmul.f32 0.5, %v3972_v48  ;;  %v9451_v58 = vmul.f32 %v4740_v27, %v4548_v26  ;;  %v4932_v63 = vsub.f32 1.0, %v4548_v26 }
 0x3f5   :  { %v4419_v10 = vmul.f32 %v4355_v18, %v7148_v49  ;;  %v4036_v36 = vand.u32 2147483647, %v3972_v48  ;;  %v2176_v1 = vadd.f32 %v9129_v23, %v8977_v6  ;;  %v3626_v44 = vadd.f32 1.0, %v10682_v14 }
 0x3f6   :  { %v9459_v33 = vmul.f32 %v9383_v46, %v7127_v32  ;;  %v3905_v39 = vmul.f32 %v3841_v7, %v7127_v32  ;;  %vm9462_vm10 = vcmp.lt.f32.partialorder %v3650_v28, 0.0004427343  ;;  %v9466_v8 = vmul.f32 %v5682_v41, %v4932_v63 }
 0x3f7   :  { %v3649_v5 = vmul.f32 %v10680_v9, %v3648_v12  ;;  %vm2626_vm5 = vcmp.gt.f32.partialorder %v2176_v1, 0.0  ;;  %6454 = vlog2.f32 %v3626_v44  ;;  %v3629_v6 = vmul.f32 -0.5, %v10682_v14 }
 0x3f8   :  { %v9472_v13 = vadd.f32 %v5119_v20, %v3905_v39  ;;  %v9474_v46 = vmul.f32 %v4164_v22, %v3972_v48  ;;  %v5680_v3 = vsel %vm2626_vm5, 1.0, %v10360_v37  ;;  %v3970_v18 = vsub.f32 %v10685_v40, %v2176_v1 }
 0x3f9   :  { %v6453_v61 = vpop.eup %6452  ;;  %v9478_v35 = vadd.f32 -0.5, %v4036_v36  ;;  %v2818_v41 = vmax.f32 %v10685_v40, 0.0  ;;  %v2882_v9 = vmul.f32 %v5680_v3, %v10685_v40  ;;  %vm4482_vm9 = vcmp.gt.f32.partialorder %v10685_v40, 0.0 }
 0x3fa   :  { %v3646_v25 = vmul.f32 0.6931472, %v6453_v61  ;;  %vm9483_vm12 = vcmp.lt.f32.partialorder %v4036_v36, 1.0  ;;  %v4034_v20 = vand.u32 2147483647, %v3970_v18  ;;  %v4162_v48 = vmul.f32 0.5, %v3970_v18 }
 0x3fb   :  { %v4546_v26 = vsel %vm4482_vm9, 1.0, %v10360_v37  ;;  %v2946_v28 = vsub.f32 %v2818_v41, %v2882_v9  ;;  %v3630_v27 = vadd.f32 1.0, %v3629_v6  ;;  %v4738_v12 = vsub.f32 1.0, %v5680_v3  ;;  %v10688_v6 = vld [vmem:[#allocation110_spill] sm:$0xff] }
 0x3fc   :  { %v4610_v55 = vmul.f32 %v5680_v3, %v4546_v26  ;;  %v3652_v7 = vsel %vm9462_vm10, %v3649_v5, %v3646_v25  ;;  %vm4098_vm11 = vcmp.lt.f32.partialorder %v4034_v20, 1.0  ;;  %v4226_v22 = vmul.f32 %v4162_v48, %v3970_v18  ;;  %v10689_v25 = vld [vmem:[#allocation74_spill] sm:$0xff] }
 0x3fd   :  { %v5744_v63 = vadd.f32 -0.5, %v4034_v20  ;;  %v3844_v1 = vadd.f32 %v3652_v7, %v2948_v42  ;;  %v4802_v44 = vmul.f32 %v4738_v12, %v4546_v26  ;;  %v4930_v39 = vsub.f32 1.0, %v4546_v26 }
 0x3fe   :  { %v4674_v36 = vmul.f32 %v4610_v55, %v7127_v32  ;;  %v3632_v40 = vand.u32 2147483647, %v10682_v14  ;;  %v2197_v41 = vadd.f32 %v9129_v23, %v9022_v21  ;;  %v3671_v9 = vadd.f32 1.0, %v10688_v6 }
 0x3ff   :  { %v4354_v61 = vsel %vm4098_vm11, %v4226_v22, %v5744_v63  ;;  %v3631_v47 = vmul.f32 %v10682_v14, %v3630_v27  ;;  %v4866_v5 = vmul.f32 %v4802_v44, %v7127_v32  ;;  %v4994_v18 = vmul.f32 %v5680_v3, %v4930_v39  ;;  %v9515_v63 = vpop.f32.mrb[124].mxu1 }
 0x400   :  { %v4418_v24 = vmul.f32 %v4354_v61, %v7148_v49  ;;  %v5259_v42 = vadd.f32 %v9416_v51, %v4674_v36  ;;  %vm2631_vm14 = vcmp.gt.f32.partialorder %v2197_v41, 0.0  ;;  %v2823_v20 = vmax.f32 %v10689_v25, 0.0 }
 0x401   :  { %6456 = vlog2.f32 %v3671_v9  ;;  %v6455_v48 = vpop.eup %6454  ;;  %v5058_v26 = vmul.f32 %v4994_v18, %v7127_v32  ;;  %v5328_v55 = vadd.f32 %v9418_v0, %v4866_v5  ;;  %v5685_v14 = vsel %vm2631_vm14, 1.0, %v10360_v37 }
 0x402   :  { %v5190_v21 = vadd.f32 %v9424_v56, %v4418_v24  ;;  %v3628_v27 = vmul.f32 0.6931472, %v6455_v48  ;;  %v9505_v12 = vadd.f32 %v5259_v42, %v9445_v54  ;;  %v2887_v3 = vmul.f32 %v5685_v14, %v10689_v25 }
 0x403   :  { %v3674_v51 = vmul.f32 -0.5, %v10688_v6  ;;  %vm3633_vm13 = vcmp.lt.f32.partialorder %v3632_v40, 0.0004427343  ;;  %v9512_v22 = vadd.f32 %v5328_v55, %v9449_v38  ;;  %v5397_v56 = vadd.f32 %v9427_v19, %v5058_v26 }
 0x404   :  { %v9509_v7 = vadd.f32 %v5190_v21, %v4419_v10  ;;  %v10690_v0 = vand.u32 2147483647, %v8768_v57  ;;  %v3634_v54 = vsel %vm3633_vm13, %v3631_v47, %v3628_v27  ;;  %v2951_v44 = vsub.f32 %v2823_v20, %v2887_v3 }
 0x405   :  { %v3975_v39 = vsub.f32 %v10689_v25, %v2197_v41  ;;  %v4356_v10 = vsel %vm9483_vm12, %v9474_v46, %v9478_v35  ;;  %v3842_v40 = vadd.f32 %v3634_v54, %v2946_v28  ;;  %v9527_v38 = vadd.f32 %v5397_v56, %v9459_v33  ;;  %v9544_v28 = vpop.f32.mrb[125].mxu1  ;;  %v10692_v56 = vld [vmem:[#allocation111_spill] sm:$0xff] }
 0x406   :  { %v9519_v36 = vsub.f32 0.0, %v10690_v0  ;;  %vm4487_vm15 = vcmp.gt.f32.partialorder %v10689_v25, 0.0  ;;  %v3907_v19 = vmul.f32 %v9401_v52, %v7127_v32  ;;  %v3675_v61 = vadd.f32 1.0, %v3674_v51 }
 0x407   :  { %v4551_v47 = vsel %vm4487_vm15, 1.0, %v10360_v37  ;;  %v4743_v9 = vsub.f32 1.0, %v5685_v14  ;;  %v3906_v41 = vmul.f32 %v3842_v40, %v7127_v32  ;;  %v2189_v46 = vadd.f32 %v9129_v23, %v9051_v59 }
 0x408   :  { %v9534_v24 = vmul.f32 %v5685_v14, %v4551_v47  ;;  %v4935_v5 = vsub.f32 1.0, %v4551_v47  ;;  %v4420_v33 = vmul.f32 %v4356_v10, %v7148_v49  ;;  %v4676_v35 = vmul.f32 %v9441_v45, %v7127_v32 }
 0x409   :  { %v3677_v2 = vand.u32 2147483647, %v10688_v6  ;;  %v9542_v52 = vmul.f32 %v4743_v9, %v4551_v47  ;;  %v5121_v18 = vadd.f32 %v9472_v13, %v3906_v41  ;;  %v4039_v42 = vand.u32 2147483647, %v3975_v39 }
 0x40a   :  { %v9547_v25 = vmul.f32 %v5685_v14, %v4935_v5  ;;  %vm2629_vm0 = vcmp.gt.f32.partialorder %v2189_v46, 0.0  ;;  %v4868_v59 = vmul.f32 %v9451_v58, %v7127_v32  ;;  %v5060_v48 = vmul.f32 %v9466_v8, %v7127_v32  ;;  %v10691_v14 = vld [vmem:[#allocation75_spill] sm:$0xff] }
 0x40b   :  { %v6457_v20 = vpop.eup %6456  ;;  %v4167_v45 = vmul.f32 0.5, %v3975_v39  ;;  %v5683_v26 = vsel %vm2629_vm0, 1.0, %v10360_v37  ;;  %v3908_v21 = vmul.f32 %v3844_v1, %v7127_v32  ;;  %v5122_v55 = vadd.f32 %v5121_v18, %v3907_v19 }
 0x40c   :  { %v3673_v27 = vmul.f32 0.6931472, %v6457_v20  ;;  %v3676_v13 = vmul.f32 %v10688_v6, %v3675_v61  ;;  %vm3678_vm2 = vcmp.lt.f32.partialorder %v3677_v2, 0.0004427343  ;;  %v2821_v3 = vmax.f32 %v10691_v14, 0.0 }
 0x40d   :  { %v2885_v51 = vmul.f32 %v5683_v26, %v10691_v14  ;;  %v3653_v0 = vadd.f32 1.0, %v10692_v56  ;;  %vm9559_vm6 = vcmp.lt.f32.partialorder %v4039_v42, 1.0  ;;  %v3973_v8 = vsub.f32 %v10691_v14, %v2189_v46 }
 0x40e   :  { %v3679_v58 = vsel %vm3678_vm2, %v3676_v13, %v3673_v27  ;;  %vm4485_vm1 = vcmp.gt.f32.partialorder %v10691_v14, 0.0  ;;  %v4741_v1 = vsub.f32 1.0, %v5683_v26  ;;  %v4231_v6 = vmul.f32 %v4167_v45, %v3975_v39 }
 0x40f   :  { %v9565_v10 = vadd.f32 %v3679_v58, %v2951_v44  ;;  %v2949_v40 = vsub.f32 %v2821_v3, %v2885_v51  ;;  %6458 = vlog2.f32 %v3653_v0  ;;  %v5749_v19 = vadd.f32 -0.5, %v4039_v42 }
 0x410   :  { %v4037_v61 = vand.u32 2147483647, %v3973_v8  ;;  %v4165_v47 = vmul.f32 0.5, %v3973_v8  ;;  %v4549_v9 = vsel %vm4485_vm1, 1.0, %v10360_v37  ;;  %v3656_v41 = vmul.f32 -0.5, %v10692_v56 }
 0x411   :  { %v3659_v5 = vand.u32 2147483647, %v10692_v56  ;;  %v4613_v2 = vmul.f32 %v5683_v26, %v4549_v9  ;;  %v4805_v18 = vmul.f32 %v4741_v1, %v4549_v9  ;;  %v4933_v27 = vsub.f32 1.0, %v4549_v9 }
 0x412   :  { %vm4101_vm4 = vcmp.lt.f32.partialorder %v4037_v61, 1.0  ;;  %v4229_v46 = vmul.f32 %v4165_v47, %v3973_v8  ;;  %v5747_v20 = vadd.f32 -0.5, %v4037_v61  ;;  %v5123_v45 = vadd.f32 %v5122_v55, %v3908_v21 }
 0x413   :  { %v4677_v44 = vmul.f32 %v4613_v2, %v7127_v32  ;;  %v4869_v39 = vmul.f32 %v4805_v18, %v7127_v32  ;;  %v5192_v42 = vadd.f32 %v9509_v7, %v4420_v33  ;;  %v4997_v14 = vmul.f32 %v5683_v26, %v4933_v27  ;;  %v10695_v7 = vld [vmem:[#allocation115_spill] sm:$0xff] }
 0x414   :  { %v4357_v13 = vsel %vm4101_vm4, %v4229_v46, %v5747_v20  ;;  %v5261_v3 = vadd.f32 %v9505_v12, %v4676_v35  ;;  %v5330_v51 = vadd.f32 %v9512_v22, %v4868_v59  ;;  %v3657_v0 = vadd.f32 1.0, %v3656_v41  ;;  %v10696_v59 = vld [vmem:[#allocation79_spill] sm:$0xff]  ;;  %v9600_v41 = vpop.f32.mrb[126].mxu1 }
 0x415   :  { %v4421_v58 = vmul.f32 %v4357_v13, %v7148_v49  ;;  %v5399_v8 = vadd.f32 %v9527_v38, %v5060_v48  ;;  %v2200_v1 = vadd.f32 %v9129_v23, %v9108_v17  ;;  %v5061_v61 = vmul.f32 %v4997_v14, %v7127_v32 }
 0x416   :  { %v9580_v47 = vadd.f32 %v5261_v3, %v4677_v44  ;;  %v9582_v21 = vadd.f32 %v5330_v51, %v4869_v39  ;;  %v3680_v33 = vadd.f32 1.0, %v10695_v7  ;;  %v9586_v12 = vmul.f32 1.442695, %v9261_v15 }
 0x417   :  { %v9588_v22 = vadd.f32 %v5192_v42, %v4421_v58  ;;  %vm2632_vm7 = vcmp.gt.f32.partialorder %v2200_v1, 0.0  ;;  %v3683_v35 = vmul.f32 -0.5, %v10695_v7  ;;  %v9591_v38 = vadd.f32 %v5399_v8, %v5061_v61  ;;  %v10697_v58 = vld [vmem:[#allocation116_spill] sm:$0xff] }
 0x418   :  { %v5686_v17 = vsel %vm2632_vm7, 1.0, %v10360_v37  ;;  %6460 = vlog2.f32 %v3680_v33  ;;  %v3976_v48 = vsub.f32 %v10696_v59, %v2200_v1  ;;  %v4359_v55 = vsel %vm9559_vm6, %v4231_v6, %v5749_v19 }
 0x419   :  { %v6459_v26 = vpop.eup %6458  ;;  %v2824_v9 = vmax.f32 %v10696_v59, 0.0  ;;  %v2888_v15 = vmul.f32 %v5686_v17, %v10696_v59  ;;  %vm4488_vm8 = vcmp.gt.f32.partialorder %v10696_v59, 0.0  ;;  %v3658_v18 = vmul.f32 %v10692_v56, %v3657_v0  ;;  %v10700_v59 = vld [vmem:[#allocation82_spill] sm:$0xff] }
 0x41a   :  { %v3655_v2 = vmul.f32 0.6931472, %v6459_v26  ;;  %vm3660_vm3 = vcmp.lt.f32.partialorder %v3659_v5, 0.0004427343  ;;  %v4552_v46 = vsel %vm4488_vm8, 1.0, %v10360_v37  ;;  %v4744_v54 = vsub.f32 1.0, %v5686_v17 }
 0x41b   :  { %v2952_v20 = vsub.f32 %v2824_v9, %v2888_v15  ;;  %v3686_v27 = vand.u32 2147483647, %v10695_v7  ;;  %v9605_v44 = vmul.f32 %v5686_v17, %v4552_v46  ;;  %v9609_v6 = vmul.f32 %v9534_v24, %v7127_v32 }
 0x41c   :  { %v9613_v19 = vmul.f32 %v9542_v52, %v7127_v32  ;;  %v3661_v39 = vsel %vm3660_vm3, %v3658_v18, %v3655_v2  ;;  %v3684_v42 = vadd.f32 1.0, %v3683_v35  ;;  %v4168_v5 = vmul.f32 0.5, %v3976_v48 }
 0x41d   :  { %v3845_v56 = vadd.f32 %v3661_v39, %v2949_v40  ;;  %v9615_v13 = vmul.f32 %v4744_v54, %v4552_v46  ;;  %v4936_v14 = vsub.f32 1.0, %v4552_v46  ;;  %v4423_v3 = vmul.f32 %v4359_v55, %v7148_v49 }
 0x41e   :  { %v4040_v51 = vand.u32 2147483647, %v3976_v48  ;;  %v2192_v0 = vadd.f32 %v9129_v23, %v9147_v43  ;;  %v3662_v24 = vadd.f32 1.0, %v10697_v58  ;;  %v9623_v8 = vmul.f32 %v9547_v25, %v7127_v32  ;;  %v9634_v43 = vpop.f32.mrb[127].mxu1 }
 0x41f   :  { %v3909_v52 = vmul.f32 %v3845_v56, %v7127_v32  ;;  %vm9626_vm10 = vcmp.lt.f32.partialorder %v3686_v27, 0.0004427343  ;;  %v9630_v1 = vmul.f32 %v5686_v17, %v4936_v14  ;;  %v3685_v61 = vmul.f32 %v10695_v7, %v3684_v42 }
 0x420   :  { %vm2630_vm5 = vcmp.gt.f32.partialorder %v2192_v0, 0.0  ;;  %6462 = vlog2.f32 %v3662_v24  ;;  %v3665_v23 = vmul.f32 -0.5, %v10697_v58  ;;  %v9638_v25 = vmul.f32 %v4168_v5, %v3976_v48 }
 0x421   :  { %v9636_v33 = vadd.f32 %v5123_v45, %v3909_v52  ;;  %v5684_v35 = vsel %vm2630_vm5, 1.0, %v10360_v37  ;;  %v3974_v26 = vsub.f32 %v10700_v59, %v2192_v0  ;;  %v9642_v9 = vadd.f32 -0.5, %v4040_v51 }
 0x422   :  { %v6461_v55 = vpop.eup %6460  ;;  %v2822_v17 = vmax.f32 %v10700_v59, 0.0  ;;  %v2886_v7 = vmul.f32 %v5684_v35, %v10700_v59  ;;  %vm4486_vm9 = vcmp.gt.f32.partialorder %v10700_v59, 0.0  ;;  %vm9647_vm12 = vcmp.lt.f32.partialorder %v4040_v51, 1.0 }
 0x423   :  { %v3682_v15 = vmul.f32 0.6931472, %v6461_v55  ;;  %v4038_v45 = vand.u32 2147483647, %v3974_v26  ;;  %v4166_v48 = vmul.f32 0.5, %v3974_v26  ;;  %v4550_v18 = vsel %vm4486_vm9, 1.0, %v10360_v37 }
 0x424   :  { %v2950_v46 = vsub.f32 %v2822_v17, %v2886_v7  ;;  %v3666_v27 = vadd.f32 1.0, %v3665_v23  ;;  %v4614_v54 = vmul.f32 %v5684_v35, %v4550_v18  ;;  %v4742_v39 = vsub.f32 1.0, %v5684_v35  ;;  %v9659_v23 = vld [vmem:[%s10143_s5] ss:$0 sm:$0xff] }
 0x425   :  { %v3688_v42 = vsel %vm9626_vm10, %v3685_v61, %v3682_v15  ;;  %vm4102_vm11 = vcmp.lt.f32.partialorder %v4038_v45, 1.0  ;;  %v4230_v56 = vmul.f32 %v4166_v48, %v3974_v26  ;;  %v5748_v5 = vadd.f32 -0.5, %v4038_v45  ;;  %v10703_v61 = vld [vmem:[#allocation117_spill] sm:$0xff] }
 0x426   :  { %v3848_v14 = vadd.f32 %v3688_v42, %v2952_v20  ;;  %v4678_v51 = vmul.f32 %v4614_v54, %v7127_v32  ;;  %v4806_v0 = vmul.f32 %v4742_v39, %v4550_v18  ;;  %v4934_v24 = vsub.f32 1.0, %v4550_v18  ;;  %v10704_v45 = vld [vmem:[#allocation85_spill] sm:$0xff] }
 0x427   :  { %v3668_v52 = vand.u32 2147483647, %v10697_v58  ;;  %v4358_v59 = vsel %vm4102_vm11, %v4230_v56, %v5748_v5  ;;  %v2213_v40 = vadd.f32 %v9659_v23, %v9192_v34  ;;  %v3707_v55 = vadd.f32 1.0, %v10703_v61 }
 0x428   :  { %v3667_v26 = vmul.f32 %v10697_v58, %v3666_v27  ;;  %v4422_v20 = vmul.f32 %v4358_v59, %v7148_v49  ;;  %v4870_v17 = vmul.f32 %v4806_v0, %v7127_v32  ;;  %v4998_v7 = vmul.f32 %v5684_v35, %v4934_v24 }
 0x429   :  { %v5263_v15 = vadd.f32 %v9580_v47, %v4678_v51  ;;  %vm2635_vm14 = vcmp.gt.f32.partialorder %v2213_v40, 0.0  ;;  %v2827_v48 = vmax.f32 %v10704_v45, 0.0  ;;  %6464 = vlog2.f32 %v3707_v55 }
 0x42a   :  { %v6463_v18 = vpop.eup %6462  ;;  %v5062_v54 = vmul.f32 %v4998_v7, %v7127_v32  ;;  %v5194_v34 = vadd.f32 %v9588_v22, %v4422_v20  ;;  %v5332_v39 = vadd.f32 %v9582_v21, %v4870_v17  ;;  %v5689_v58 = vsel %vm2635_vm14, 1.0, %v10360_v37 }
 0x42b   :  { %v3664_v27 = vmul.f32 0.6931472, %v6463_v18  ;;  %v9674_v42 = vadd.f32 %v5263_v15, %v9609_v6  ;;  %v2891_v35 = vmul.f32 %v5689_v58, %v10704_v45  ;;  %v3710_v47 = vmul.f32 -0.5, %v10703_v61 }
 0x42c   :  { %vm3669_vm13 = vcmp.lt.f32.partialorder %v3668_v52, 0.0004427343  ;;  %v9678_v56 = vadd.f32 %v5194_v34, %v4423_v3  ;;  %v9681_v5 = vadd.f32 %v5332_v39, %v9613_v19  ;;  %v5401_v22 = vadd.f32 %v9591_v38, %v5062_v54 }
 0x42d   :  { %v10705_v21 = vand.u32 2147483647, %v9026_v16  ;;  %v3670_v0 = vsel %vm3669_vm13, %v3667_v26, %v3664_v27  ;;  %v2955_v24 = vsub.f32 %v2827_v48, %v2891_v35  ;;  %v3979_v6 = vsub.f32 %v10704_v45, %v2213_v40 }
 0x42e   :  { %v4360_v52 = vsel %vm9647_vm12, %v9638_v25, %v9642_v9  ;;  %v3846_v3 = vadd.f32 %v3670_v0, %v2950_v46  ;;  %v5402_v59 = vadd.f32 %v5401_v22, %v9623_v8  ;;  %vm4491_vm15 = vcmp.gt.f32.partialorder %v10704_v45, 0.0 }
 0x42f   :  { %v9686_v51 = vsub.f32 0.0, %v10705_v21  ;;  %v3911_v38 = vmul.f32 %v9565_v10, %v7127_v32  ;;  %v3711_v19 = vadd.f32 1.0, %v3710_v47  ;;  %v4555_v55 = vsel %vm4491_vm15, 1.0, %v10360_v37  ;;  %v10707_v47 = vld [vmem:[#allocation118_spill] sm:$0xff] }
 0x430   :  { %v4747_v26 = vsub.f32 1.0, %v5689_v58  ;;  %v3910_v20 = vmul.f32 %v3846_v3, %v7127_v32  ;;  %v9699_v40 = vmul.f32 %v5689_v58, %v4555_v55  ;;  %v4939_v17 = vsub.f32 1.0, %v4555_v55 }
 0x431   :  { %v2205_v25 = vadd.f32 %v9659_v23, %v9218_v50  ;;  %v4424_v9 = vmul.f32 %v4360_v52, %v7148_v49  ;;  %v4680_v8 = vmul.f32 %v9605_v44, %v7127_v32  ;;  %v3713_v2 = vand.u32 2147483647, %v10703_v61 }
 0x432   :  { %v9707_v10 = vmul.f32 %v4747_v26, %v4555_v55  ;;  %v5125_v46 = vadd.f32 %v9636_v33, %v3910_v20  ;;  %v4043_v7 = vand.u32 2147483647, %v3979_v6  ;;  %v9710_v15 = vmul.f32 %v5689_v58, %v4939_v17  ;;  %v10706_v58 = vld [vmem:[#allocation86_spill] sm:$0xff] }
 0x433   :  { %vm2633_vm0 = vcmp.gt.f32.partialorder %v2205_v25, 0.0  ;;  %v6465_v45 = vpop.eup %6464  ;;  %v4872_v48 = vmul.f32 %v9615_v13, %v7127_v32  ;;  %v5064_v50 = vmul.f32 %v9630_v1, %v7127_v32  ;;  %v4171_v18 = vmul.f32 0.5, %v3979_v6 }
 0x434   :  { %v5687_v44 = vsel %vm2633_vm0, 1.0, %v10360_v37  ;;  %v3912_v54 = vmul.f32 %v3848_v14, %v7127_v32  ;;  %v5126_v34 = vadd.f32 %v5125_v46, %v3911_v38  ;;  %v3709_v39 = vmul.f32 0.6931472, %v6465_v45 }
 0x435   :  { %v3712_v33 = vmul.f32 %v10703_v61, %v3711_v19  ;;  %vm3714_vm2 = vcmp.lt.f32.partialorder %v3713_v2, 0.0004427343  ;;  %v2825_v27 = vmax.f32 %v10706_v58, 0.0  ;;  %v2889_v35 = vmul.f32 %v5687_v44, %v10706_v58 }
 0x436   :  { %v3689_v22 = vadd.f32 1.0, %v10707_v47  ;;  %vm9722_vm6 = vcmp.lt.f32.partialorder %v4043_v7, 1.0  ;;  %v3977_v1 = vsub.f32 %v10706_v58, %v2205_v25  ;;  %vm4489_vm1 = vcmp.gt.f32.partialorder %v10706_v58, 0.0 }
 0x437   :  { %v3715_v13 = vsel %vm3714_vm2, %v3712_v33, %v3709_v39  ;;  %v4745_v14 = vsub.f32 1.0, %v5687_v44  ;;  %v4235_v61 = vmul.f32 %v4171_v18, %v3979_v6  ;;  %v2953_v52 = vsub.f32 %v2825_v27, %v2889_v35 }
 0x438   :  { %v9728_v0 = vadd.f32 %v3715_v13, %v2955_v24  ;;  %6466 = vlog2.f32 %v3689_v22  ;;  %v5753_v3 = vadd.f32 -0.5, %v4043_v7  ;;  %v4041_v38 = vand.u32 2147483647, %v3977_v1 }
 0x439   :  { %v4169_v19 = vmul.f32 0.5, %v3977_v1  ;;  %v4553_v55 = vsel %vm4489_vm1, 1.0, %v10360_v37  ;;  %v3692_v26 = vmul.f32 -0.5, %v10707_v47  ;;  %v3695_v20 = vand.u32 2147483647, %v10707_v47 }
 0x43a   :  { %v4617_v17 = vmul.f32 %v5687_v44, %v4553_v55  ;;  %v4809_v2 = vmul.f32 %v4745_v14, %v4553_v55  ;;  %vm4105_vm4 = vcmp.lt.f32.partialorder %v4041_v38, 1.0  ;;  %v5751_v46 = vadd.f32 -0.5, %v4041_v38 }
 0x43b   :  { %v4233_v25 = vmul.f32 %v4169_v19, %v3977_v1  ;;  %v4937_v45 = vsub.f32 1.0, %v4553_v55  ;;  %v5127_v18 = vadd.f32 %v5126_v34, %v3912_v54  ;;  %v5196_v7 = vadd.f32 %v9678_v56, %v4424_v9  ;;  %v10710_v56 = vld [vmem:[#allocation119_spill] sm:$0xff] }
 0x43c   :  { %v4681_v24 = vmul.f32 %v4617_v17, %v7127_v32  ;;  %v4873_v6 = vmul.f32 %v4809_v2, %v7127_v32  ;;  %v5265_v58 = vadd.f32 %v9674_v42, %v4680_v8  ;;  %v5334_v27 = vadd.f32 %v9681_v5, %v4872_v48 }
 0x43d   :  { %v4361_v39 = vsel %vm4105_vm4, %v4233_v25, %v5751_v46  ;;  %v5001_v33 = vmul.f32 %v5687_v44, %v4937_v45  ;;  %v3693_v35 = vadd.f32 1.0, %v3692_v26  ;;  %v5403_v13 = vadd.f32 %v5402_v59, %v5064_v50 }
 0x43e   :  { %v4425_v22 = vmul.f32 %v4361_v39, %v7148_v49  ;;  %v2216_v1 = vadd.f32 %v9659_v23, %v9275_v4  ;;  %v9742_v38 = vadd.f32 %v5265_v58, %v4681_v24  ;;  %v9744_v54 = vadd.f32 %v5334_v27, %v4873_v6  ;;  %v10711_v4 = vld [vmem:[#allocation87_spill] sm:$0xff]  ;;  %v10712_v58 = vld [vmem:[#allocation121_spill] sm:$0xff] }
 0x43f   :  { %v5065_v14 = vmul.f32 %v5001_v33, %v7127_v32  ;;  %v3716_v9 = vadd.f32 1.0, %v10710_v56  ;;  %6468 = vpow2.f32 %v9422_v53  ;;  %v3719_v5 = vmul.f32 -0.5, %v10710_v56 }
 0x440   :  { %v9748_v42 = vadd.f32 %v5196_v7, %v4425_v22  ;;  %vm2636_vm7 = vcmp.gt.f32.partialorder %v2216_v1, 0.0  ;;  %v3980_v48 = vsub.f32 %v10711_v4, %v2216_v1  ;;  %v4363_v44 = vsel %vm9722_vm6, %v4235_v61, %v5753_v3 }
 0x441   :  { %v9751_v8 = vadd.f32 %v5403_v13, %v5065_v14  ;;  %v5690_v59 = vsel %vm2636_vm7, 1.0, %v10360_v37  ;;  %6470 = vlog2.f32 %v3716_v9  ;;  %v2828_v34 = vmax.f32 %v10711_v4, 0.0  ;;  %v10715_v9 = vld [vmem:[#allocation88_spill] sm:$0xff] }
 0x442   :  { %v6467_v50 = vpop.eup %6466  ;;  %v2892_v53 = vmul.f32 %v5690_v59, %v10711_v4  ;;  %vm4492_vm8 = vcmp.gt.f32.partialorder %v10711_v4, 0.0  ;;  %v3694_v55 = vmul.f32 %v10707_v47, %v3693_v35  ;;  %vm3696_vm3 = vcmp.lt.f32.partialorder %v3695_v20, 0.0004427343 }
 0x443   :  { %v3691_v19 = vmul.f32 0.6931472, %v6467_v50  ;;  %v4556_v26 = vsel %vm4492_vm8, 1.0, %v10360_v37  ;;  %v3722_v2 = vand.u32 2147483647, %v10710_v56  ;;  %v4748_v46 = vsub.f32 1.0, %v5690_v59 }
 0x444   :  { %v2956_v17 = vsub.f32 %v2828_v34, %v2892_v53  ;;  %v9763_v25 = vmul.f32 %v5690_v59, %v4556_v26  ;;  %v9767_v21 = vmul.f32 %v9699_v40, %v7127_v32  ;;  %v9771_v61 = vmul.f32 %v9707_v10, %v7127_v32 }
 0x445   :  { %v3697_v3 = vsel %vm3696_vm3, %v3694_v55, %v3691_v19  ;;  %v3720_v45 = vadd.f32 1.0, %v3719_v5  ;;  %v4172_v20 = vmul.f32 0.5, %v3980_v48  ;;  %v9773_v24 = vmul.f32 %v4748_v46, %v4556_v26 }
 0x446   :  { %v3849_v47 = vadd.f32 %v3697_v3, %v2953_v52  ;;  %v4940_v6 = vsub.f32 1.0, %v4556_v26  ;;  %v4427_v7 = vmul.f32 %v4363_v44, %v7148_v49  ;;  %v4044_v39 = vand.u32 2147483647, %v3980_v48 }
 0x447   :  { %v2208_v33 = vadd.f32 %v9659_v23, %v9309_v60  ;;  %v3698_v40 = vadd.f32 1.0, %v10712_v58  ;;  %v9781_v27 = vmul.f32 %v9710_v15, %v7127_v32  ;;  %vm9784_vm10 = vcmp.lt.f32.partialorder %v3722_v2, 0.0004427343 }
 0x448   :  { %v3913_v10 = vmul.f32 %v3849_v47, %v7127_v32  ;;  %v9788_v35 = vmul.f32 %v5690_v59, %v4940_v6  ;;  %v3721_v22 = vmul.f32 %v10710_v56, %v3720_v45  ;;  %v3701_v60 = vmul.f32 -0.5, %v10712_v58 }
 0x449   :  { %vm2634_vm5 = vcmp.gt.f32.partialorder %v2208_v33, 0.0  ;;  %6472 = vlog2.f32 %v3698_v40  ;;  %v9792_v13 = vpop.eup %6468  ;;  %v9796_v15 = vmul.f32 %v4172_v20, %v3980_v48  ;;  %v3978_v5 = vsub.f32 %v10715_v9, %v2208_v33 }
 0x44a   :  { %v9794_v1 = vadd.f32 %v5127_v18, %v3913_v10  ;;  %v5688_v14 = vsel %vm2634_vm5, 1.0, %v10360_v37  ;;  %v9800_v50 = vadd.f32 -0.5, %v4044_v39  ;;  %v2826_v59 = vmax.f32 %v10715_v9, 0.0 }
 0x44b   :  { %v6471_v4 = vpop.eup %6470  ;;  %v2890_v56 = vmul.f32 %v5688_v14, %v10715_v9  ;;  %vm4490_vm9 = vcmp.gt.f32.partialorder %v10715_v9, 0.0  ;;  %vm9805_vm12 = vcmp.lt.f32.partialorder %v4044_v39, 1.0  ;;  %v4042_v18 = vand.u32 2147483647, %v3978_v5 }
 0x44c   :  { %v3718_v44 = vmul.f32 0.6931472, %v6471_v4  ;;  %v4170_v48 = vmul.f32 0.5, %v3978_v5  ;;  %v4554_v53 = vsel %vm4490_vm9, 1.0, %v10360_v37  ;;  %v3702_v55 = vadd.f32 1.0, %v3701_v60  ;;  %v10718_v4 = vld [vmem:[#allocation93_spill] sm:$0xff] }
 0x44d   :  { %v2954_v19 = vsub.f32 %v2826_v59, %v2890_v56  ;;  %v4618_v26 = vmul.f32 %v5688_v14, %v4554_v53  ;;  %v4746_v2 = vsub.f32 1.0, %v5688_v14  ;;  %vm4106_vm11 = vcmp.lt.f32.partialorder %v4042_v18, 1.0 }
 0x44e   :  { %v3724_v46 = vsel %vm9784_vm10, %v3721_v22, %v3718_v44  ;;  %v4234_v3 = vmul.f32 %v4170_v48, %v3978_v5  ;;  %v5752_v45 = vadd.f32 -0.5, %v4042_v18  ;;  %v4938_v39 = vsub.f32 1.0, %v4554_v53 }
 0x44f   :  { %v3852_v47 = vadd.f32 %v3724_v46, %v2956_v17  ;;  %v4682_v20 = vmul.f32 %v4618_v26, %v7127_v32  ;;  %v4810_v6 = vmul.f32 %v4746_v2, %v4554_v53  ;;  %v3704_v33 = vand.u32 2147483647, %v10712_v58 }
 0x450   :  { %v4362_v40 = vsel %vm4106_vm11, %v4234_v3, %v5752_v45  ;;  %v2229_v10 = vadd.f32 %v9659_v23, %v9354_v29  ;;  %v3743_v60 = vadd.f32 1.0, %v8177_v62  ;;  %v3703_v9 = vmul.f32 %v10712_v58, %v3702_v55 }
 0x451   :  { %v4426_v52 = vmul.f32 %v4362_v40, %v7148_v49  ;;  %v4874_v22 = vmul.f32 %v4810_v6, %v7127_v32  ;;  %v5002_v5 = vmul.f32 %v5688_v14, %v4938_v39  ;;  %v5267_v17 = vadd.f32 %v9742_v38, %v4682_v20 }
 0x452   :  { %vm2639_vm14 = vcmp.gt.f32.partialorder %v2229_v10, 0.0  ;;  %v2831_v59 = vmax.f32 %v10718_v4, 0.0  ;;  %6474 = vlog2.f32 %v3743_v60  ;;  %v3746_v38 = vmul.f32 -0.5, %v8177_v62 }
 0x453   :  { %v6473_v56 = vpop.eup %6472  ;;  %v5066_v44 = vmul.f32 %v5002_v5, %v7127_v32  ;;  %v5198_v29 = vadd.f32 %v9748_v42, %v4426_v52  ;;  %v5336_v18 = vadd.f32 %v9744_v54, %v4874_v22  ;;  %v5693_v58 = vsel %vm2639_vm14, 1.0, %v10360_v37 }
 0x454   :  { %v3700_v48 = vmul.f32 0.6931472, %v6473_v56  ;;  %v9827_v53 = vadd.f32 %v5267_v17, %v9767_v21  ;;  %v2895_v14 = vmul.f32 %v5693_v58, %v10718_v4  ;;  %vm3705_vm13 = vcmp.lt.f32.partialorder %v3704_v33, 0.0004427343 }
 0x455   :  { %v9831_v55 = vadd.f32 %v5198_v29, %v4427_v7  ;;  %v9834_v26 = vadd.f32 %v5336_v18, %v9771_v61  ;;  %v5405_v42 = vadd.f32 %v9751_v8, %v5066_v44  ;;  %v9838_v54 = vmul.f32 1.442695, %v9519_v36  ;;  %v10720_v44 = vld [vmem:[#allocation2_spill] sm:$0xff] }
 0x456   :  { %v3706_v2 = vsel %vm3705_vm13, %v3703_v9, %v3700_v48  ;;  %v2959_v46 = vsub.f32 %v2831_v59, %v2895_v14  ;;  %v3983_v21 = vsub.f32 %v10718_v4, %v2229_v10  ;;  %v4364_v3 = vsel %vm9805_vm12, %v9796_v15, %v9800_v50 }
 0x457   :  { %v3850_v45 = vadd.f32 %v3706_v2, %v2954_v19  ;;  %v5406_v7 = vadd.f32 %v5405_v42, %v9781_v27  ;;  %vm4495_vm15 = vcmp.gt.f32.partialorder %v10718_v4, 0.0  ;;  %v3915_v8 = vmul.f32 %v9728_v0, %v7127_v32  ;;  %v10719_v4 = vld [vmem:[#allocation94_spill] sm:$0xff] }
 0x458   :  { %v3747_v61 = vadd.f32 1.0, %v3746_v38  ;;  %v4559_v36 = vsel %vm4495_vm15, 1.0, %v10360_v37  ;;  %v4751_v20 = vsub.f32 1.0, %v5693_v58  ;;  %v2221_v15 = vadd.f32 %v9659_v23, %v9380_v30 }
 0x459   :  { %v3914_v6 = vmul.f32 %v3850_v45, %v7127_v32  ;;  %v9851_v39 = vmul.f32 %v5693_v58, %v4559_v36  ;;  %v4943_v33 = vsub.f32 1.0, %v4559_v36  ;;  %v4428_v50 = vmul.f32 %v4364_v3, %v7148_v49 }
 0x45a   :  { %v4684_v27 = vmul.f32 %v9763_v25, %v7127_v32  ;;  %v3749_v34 = vand.u32 2147483647, %v8177_v62  ;;  %v9859_v0 = vmul.f32 %v4751_v20, %v4559_v36  ;;  %v4047_v40 = vand.u32 2147483647, %v3983_v21 }
 0x45b   :  { %v5129_v19 = vadd.f32 %v9794_v1, %v3914_v6  ;;  %v9862_v10 = vmul.f32 %v5693_v58, %v4943_v33  ;;  %vm2637_vm0 = vcmp.gt.f32.partialorder %v2221_v15, 0.0  ;;  %v4876_v9 = vmul.f32 %v9773_v24, %v7127_v32 }
 0x45c   :  { %v6475_v60 = vpop.eup %6474  ;;  %v5068_v30 = vmul.f32 %v9788_v35, %v7127_v32  ;;  %v4175_v52 = vmul.f32 0.5, %v3983_v21  ;;  %v5691_v25 = vsel %vm2637_vm0, 1.0, %v10360_v37  ;;  %v3916_v22 = vmul.f32 %v3852_v47, %v7127_v32 }
 0x45d   :  { %v5130_v5 = vadd.f32 %v5129_v19, %v3915_v8  ;;  %v3745_v17 = vmul.f32 0.6931472, %v6475_v60  ;;  %v3748_v1 = vmul.f32 %v8177_v62, %v3747_v61  ;;  %vm3750_vm2 = vcmp.lt.f32.partialorder %v3749_v34, 0.0004427343 }
 0x45e   :  { %v2829_v59 = vmax.f32 %v10719_v4, 0.0  ;;  %v2893_v56 = vmul.f32 %v5691_v25, %v10719_v4  ;;  %v3725_v29 = vadd.f32 1.0, %v10720_v44  ;;  %vm9874_vm6 = vcmp.lt.f32.partialorder %v4047_v40, 1.0 }
 0x45f   :  { %v3751_v24 = vsel %vm3750_vm2, %v3748_v1, %v3745_v17  ;;  %v3981_v35 = vsub.f32 %v10719_v4, %v2221_v15  ;;  %vm4493_vm1 = vcmp.gt.f32.partialorder %v10719_v4, 0.0  ;;  %v4749_v47 = vsub.f32 1.0, %v5691_v25 }
 0x460   :  { %v9880_v58 = vadd.f32 %v3751_v24, %v2959_v46  ;;  %v4239_v62 = vmul.f32 %v4175_v52, %v3983_v21  ;;  %v2957_v48 = vsub.f32 %v2829_v59, %v2893_v56  ;;  %6476 = vlog2.f32 %v3725_v29 }
 0x461   :  { %v5757_v14 = vadd.f32 -0.5, %v4047_v40  ;;  %v4045_v38 = vand.u32 2147483647, %v3981_v35  ;;  %v4173_v42 = vmul.f32 0.5, %v3981_v35  ;;  %v4557_v2 = vsel %vm4493_vm1, 1.0, %v10360_v37 }
 0x462   :  { %v3728_v3 = vmul.f32 -0.5, %v10720_v44  ;;  %v3731_v45 = vand.u32 2147483647, %v10720_v44  ;;  %v4621_v8 = vmul.f32 %v5691_v25, %v4557_v2  ;;  %v4813_v61 = vmul.f32 %v4749_v47, %v4557_v2 }
 0x463   :  { %vm4109_vm4 = vcmp.lt.f32.partialorder %v4045_v38, 1.0  ;;  %v4237_v36 = vmul.f32 %v4173_v42, %v3981_v35  ;;  %v5755_v20 = vadd.f32 -0.5, %v4045_v38  ;;  %v4941_v6 = vsub.f32 1.0, %v4557_v2 }
 0x464   :  { %v4685_v46 = vmul.f32 %v4621_v8, %v7127_v32  ;;  %v4877_v21 = vmul.f32 %v4813_v61, %v7127_v32  ;;  %v5131_v33 = vadd.f32 %v5130_v5, %v3916_v22  ;;  %v5200_v15 = vadd.f32 %v9831_v55, %v4428_v50  ;;  %v10723_v55 = vld [vmem:[#allocation3_spill] sm:$0xff] }
 0x465   :  { %v4365_v34 = vsel %vm4109_vm4, %v4237_v36, %v5755_v20  ;;  %v5005_v19 = vmul.f32 %v5691_v25, %v4941_v6  ;;  %v5269_v40 = vadd.f32 %v9827_v53, %v4684_v27  ;;  %v5338_v60 = vadd.f32 %v9834_v26, %v4876_v9 }
 0x466   :  { %v3729_v52 = vadd.f32 1.0, %v3728_v3  ;;  %v4429_v17 = vmul.f32 %v4365_v34, %v7148_v49  ;;  %v5407_v1 = vadd.f32 %v5406_v7, %v5068_v30  ;;  %v2232_v4 = vadd.f32 %v9659_v23, %v9436_v31  ;;  %v10724_v31 = vld [vmem:[#allocation96_spill] sm:$0xff] }
 0x467   :  { %v5069_v59 = vmul.f32 %v5005_v19, %v7127_v32  ;;  %v9894_v56 = vadd.f32 %v5269_v40, %v4685_v46  ;;  %v9896_v22 = vadd.f32 %v5338_v60, %v4877_v21  ;;  %v3752_v50 = vadd.f32 1.0, %v10723_v55  ;;  %v10725_v46 = vld [vmem:[#allocation4_spill] sm:$0xff] }
 0x468   :  { %6478 = vpow2.f32 %v9586_v12  ;;  %v9900_v53 = vadd.f32 %v5200_v15, %v4429_v17  ;;  %vm2640_vm7 = vcmp.gt.f32.partialorder %v2232_v4, 0.0  ;;  %v3755_v26 = vmul.f32 -0.5, %v10723_v55 }
 0x469   :  { %v9903_v27 = vadd.f32 %v5407_v1, %v5069_v59  ;;  %v5694_v7 = vsel %vm2640_vm7, 1.0, %v10360_v37  ;;  %6480 = vlog2.f32 %v3752_v50  ;;  %v3984_v9 = vsub.f32 %v10724_v31, %v2232_v4 }
 0x46a   :  { %v6477_v30 = vpop.eup %6476  ;;  %v4367_v25 = vsel %vm9874_vm6, %v4239_v62, %v5757_v14  ;;  %v2832_v5 = vmax.f32 %v10724_v31, 0.0  ;;  %v2896_v12 = vmul.f32 %v5694_v7, %v10724_v31  ;;  %vm4496_vm8 = vcmp.gt.f32.partialorder %v10724_v31, 0.0 }
 0x46b   :  { %v3727_v29 = vmul.f32 0.6931472, %v6477_v30  ;;  %v3730_v24 = vmul.f32 %v10720_v44, %v3729_v52  ;;  %vm3732_vm3 = vcmp.lt.f32.partialorder %v3731_v45, 0.0004427343  ;;  %v4560_v35 = vsel %vm4496_vm8, 1.0, %v10360_v37  ;;  %v10728_v52 = vld [vmem:[#allocation105_spill] sm:$0xff] }
 0x46c   :  { %v2960_v47 = vsub.f32 %v2832_v5, %v2896_v12  ;;  %v3758_v38 = vand.u32 2147483647, %v10723_v55  ;;  %v9915_v42 = vmul.f32 %v5694_v7, %v4560_v35  ;;  %v4752_v2 = vsub.f32 1.0, %v5694_v7 }
 0x46d   :  { %v9919_v18 = vmul.f32 %v9851_v39, %v7127_v32  ;;  %v9923_v62 = vmul.f32 %v9859_v0, %v7127_v32  ;;  %v3733_v14 = vsel %vm3732_vm3, %v3730_v24, %v3727_v29  ;;  %v3756_v3 = vadd.f32 1.0, %v3755_v26 }
 0x46e   :  { %v3853_v44 = vadd.f32 %v3733_v14, %v2957_v48  ;;  %v4176_v45 = vmul.f32 0.5, %v3984_v9  ;;  %v9925_v8 = vmul.f32 %v4752_v2, %v4560_v35  ;;  %v4944_v61 = vsub.f32 1.0, %v4560_v35  ;;  %v10731_v48 = vld [vmem:[#allocation44_spill] sm:$0xff] }
 0x46f   :  { %v4431_v36 = vmul.f32 %v4367_v25, %v7148_v49  ;;  %v4048_v20 = vand.u32 2147483647, %v3984_v9  ;;  %v2224_v6 = vadd.f32 %v9659_v23, %v9470_v11  ;;  %v3734_v39 = vadd.f32 1.0, %v10725_v46 }
 0x470   :  { %v9933_v21 = vmul.f32 %v9862_v10, %v7127_v32  ;;  %v3917_v0 = vmul.f32 %v3853_v44, %v7127_v32  ;;  %vm9936_vm10 = vcmp.lt.f32.partialorder %v3758_v38, 0.0004427343  ;;  %v9940_v15 = vmul.f32 %v5694_v7, %v4944_v61 }
 0x471   :  { %v3757_v34 = vmul.f32 %v10723_v55, %v3756_v3  ;;  %vm2638_vm5 = vcmp.gt.f32.partialorder %v2224_v6, 0.0  ;;  %6482 = vlog2.f32 %v3734_v39  ;;  %v3737_v11 = vmul.f32 -0.5, %v10725_v46 }
 0x472   :  { %v9944_v19 = vpop.eup %6478  ;;  %v9946_v40 = vadd.f32 %v5131_v33, %v3917_v0  ;;  %v9948_v10 = vmul.f32 %v4176_v45, %v3984_v9  ;;  %v5692_v60 = vsel %vm2638_vm5, 1.0, %v10360_v37  ;;  %v3982_v17 = vsub.f32 %v10728_v52, %v2224_v6 }
 0x473   :  { %v6481_v1 = vpop.eup %6480  ;;  %v9952_v4 = vadd.f32 -0.5, %v4048_v20  ;;  %v2830_v59 = vmax.f32 %v10728_v52, 0.0  ;;  %v2894_v55 = vmul.f32 %v5692_v60, %v10728_v52  ;;  %vm4494_vm9 = vcmp.gt.f32.partialorder %v10728_v52, 0.0 }
 0x474   :  { %v3754_v50 = vmul.f32 0.6931472, %v6481_v1  ;;  %v4046_v26 = vand.u32 2147483647, %v3982_v17  ;;  %v4174_v7 = vmul.f32 0.5, %v3982_v17  ;;  %v4558_v33 = vsel %vm4494_vm9, 1.0, %v10360_v37 }
 0x475   :  { %vm9958_vm12 = vcmp.lt.f32.partialorder %v4048_v20, 1.0  ;;  %v2958_v9 = vsub.f32 %v2830_v59, %v2894_v55  ;;  %v3738_v30 = vadd.f32 1.0, %v3737_v11  ;;  %v4622_v25 = vmul.f32 %v5692_v60, %v4558_v33 }
 0x476   :  { %v4750_v5 = vsub.f32 1.0, %v5692_v60  ;;  %v3760_v12 = vsel %vm9936_vm10, %v3757_v34, %v3754_v50  ;;  %vm4110_vm11 = vcmp.lt.f32.partialorder %v4046_v26, 1.0  ;;  %v4238_v29 = vmul.f32 %v4174_v7, %v3982_v17 }
 0x477   :  { %v5756_v24 = vadd.f32 -0.5, %v4046_v26  ;;  %v3856_v35 = vadd.f32 %v3760_v12, %v2960_v47  ;;  %v4686_v38 = vmul.f32 %v4622_v25, %v7127_v32  ;;  %v4942_v14 = vsub.f32 1.0, %v4558_v33 }
 0x478   :  { %v4814_v2 = vmul.f32 %v4750_v5, %v4558_v33  ;;  %v3740_v3 = vand.u32 2147483647, %v10725_v46  ;;  %v2245_v45 = vadd.f32 %v9659_v23, %v9515_v63  ;;  %v3779_v61 = vadd.f32 1.0, %v9792_v13 }
 0x479   :  { %v4366_v44 = vsel %vm4110_vm11, %v4238_v29, %v5756_v24  ;;  %v3739_v20 = vmul.f32 %v10725_v46, %v3738_v30  ;;  %v5006_v0 = vmul.f32 %v5692_v60, %v4942_v14  ;;  %v5271_v47 = vadd.f32 %v9894_v56, %v4686_v38 }
 0x47a   :  { %v4430_v6 = vmul.f32 %v4366_v44, %v7148_v49  ;;  %v4878_v39 = vmul.f32 %v4814_v2, %v7127_v32  ;;  %vm2643_vm14 = vcmp.gt.f32.partialorder %v2245_v45, 0.0  ;;  %v2835_v34 = vmax.f32 %v10731_v48, 0.0  ;;  %v10732_v44 = vld [vmem:[#allocation58_spill] sm:$0xff] }
 0x47b   :  { %6484 = vlog2.f32 %v3779_v61  ;;  %v6483_v11 = vpop.eup %6482  ;;  %v5070_v52 = vmul.f32 %v5006_v0, %v7127_v32  ;;  %v5697_v46 = vsel %vm2643_vm14, 1.0, %v10360_v37  ;;  %v9979_v59 = vadd.f32 %v5271_v47, %v9919_v18 }
 0x47c   :  { %v5202_v63 = vadd.f32 %v9900_v53, %v4430_v6  ;;  %v5340_v17 = vadd.f32 %v9896_v22, %v4878_v39  ;;  %v3736_v1 = vmul.f32 0.6931472, %v6483_v11  ;;  %v2899_v60 = vmul.f32 %v5697_v46, %v10731_v48 }
 0x47d   :  { %v3782_v56 = vmul.f32 -0.5, %v9792_v13  ;;  %vm3741_vm13 = vcmp.lt.f32.partialorder %v3740_v3, 0.0004427343  ;;  %v5409_v53 = vadd.f32 %v9903_v27, %v5070_v52  ;;  %v3215_v22 = vmul.f32 1.442695, %v9686_v51 }
 0x47e   :  { %v9983_v55 = vadd.f32 %v5202_v63, %v4431_v36  ;;  %v9986_v50 = vadd.f32 %v5340_v17, %v9923_v62  ;;  %v3742_v26 = vsel %vm3741_vm13, %v3739_v20, %v3736_v1  ;;  %v2963_v7 = vsub.f32 %v2835_v34, %v2899_v60 }
 0x47f   :  { %v9991_v33 = vsub.f32 %v10731_v48, %v2245_v45  ;;  %6486 = vpow2.f32 %v9838_v54  ;;  %v3854_v18 = vadd.f32 %v3742_v26, %v2958_v9  ;;  %v9995_v30 = vadd.f32 %v5409_v53, %v9933_v21 }
 0x480   :  { %vm4499_vm15 = vcmp.gt.f32.partialorder %v10731_v48, 0.0  ;;  %v4368_v27 = vsel %vm9958_vm12, %v9948_v10, %v9952_v4  ;;  %v3783_v62 = vadd.f32 1.0, %v3782_v56  ;;  %v4755_v36 = vsub.f32 1.0, %v5697_v46 }
 0x481   :  { %v4563_v51 = vsel %vm4499_vm15, 1.0, %v10360_v37  ;;  %v3918_v25 = vmul.f32 %v3854_v18, %v7127_v32  ;;  %v2237_v21 = vadd.f32 %v9659_v23, %v9544_v28  ;;  %6488 = vpow2.f32 %v3215_v22 }
 0x482   :  { %v10004_v5 = vmul.f32 %v5697_v46, %v4563_v51  ;;  %v4947_v54 = vsub.f32 1.0, %v4563_v51  ;;  %v3919_v9 = vmul.f32 %v9880_v58, %v7127_v32  ;;  %v3785_v12 = vand.u32 2147483647, %v9792_v13 }
 0x483   :  { %v10011_v31 = vmul.f32 %v4755_v36, %v4563_v51  ;;  %v4688_v10 = vmul.f32 %v9915_v42, %v7127_v32  ;;  %v5133_v4 = vadd.f32 %v9946_v40, %v3918_v25  ;;  %vm2641_vm0 = vcmp.gt.f32.partialorder %v2237_v21, 0.0 }
 0x484   :  { %v10016_v29 = vmul.f32 %v5697_v46, %v4947_v54  ;;  %v4432_v38 = vmul.f32 %v4368_v27, %v7148_v49  ;;  %v4880_v28 = vmul.f32 %v9925_v8, %v7127_v32  ;;  %v5072_v58 = vmul.f32 %v9940_v15, %v7127_v32 }
 0x485   :  { %v6485_v24 = vpop.eup %6484  ;;  %v5695_v2 = vsel %vm2641_vm0, 1.0, %v10360_v37  ;;  %v3920_v14 = vmul.f32 %v3856_v35, %v7127_v32  ;;  %v5134_v3 = vadd.f32 %v5133_v4, %v3919_v9  ;;  %v3784_v40 = vmul.f32 %v9792_v13, %v3783_v62 }
 0x486   :  { %v3781_v42 = vmul.f32 0.6931472, %v6485_v24  ;;  %vm3786_vm2 = vcmp.lt.f32.partialorder %v3785_v12, 0.0004427343  ;;  %v2833_v45 = vmax.f32 %v10732_v44, 0.0  ;;  %v2897_v61 = vmul.f32 %v5695_v2, %v10732_v44 }
 0x487   :  { %v3761_v20 = vadd.f32 1.0, %v9944_v19  ;;  %v3985_v8 = vsub.f32 %v10732_v44, %v2237_v21  ;;  %vm4497_vm6 = vcmp.gt.f32.partialorder %v10732_v44, 0.0  ;;  %v4753_v15 = vsub.f32 1.0, %v5695_v2 }
 0x488   :  { %v3787_v6 = vsel %vm3786_vm2, %v3784_v40, %v3781_v42  ;;  %v4051_v35 = vand.u32 2147483647, %v9991_v33  ;;  %v2961_v0 = vsub.f32 %v2833_v45, %v2897_v61  ;;  %v4179_v47 = vmul.f32 0.5, %v9991_v33 }
 0x489   :  { %v10031_v39 = vadd.f32 %v3787_v6, %v2963_v7  ;;  %6490 = vlog2.f32 %v3761_v20  ;;  %v10034_v13 = vpop.eup %6486  ;;  %v4049_v48 = vand.u32 2147483647, %v3985_v8  ;;  %v4177_v34 = vmul.f32 0.5, %v3985_v8 }
 0x48a   :  { %v4561_v11 = vsel %vm4497_vm6, 1.0, %v10360_v37  ;;  %v3764_v52 = vmul.f32 -0.5, %v9944_v19  ;;  %v3767_v63 = vand.u32 2147483647, %v9944_v19  ;;  %v5135_v7 = vadd.f32 %v5134_v3, %v3920_v14 }
 0x48b   :  { %v4625_v17 = vmul.f32 %v5695_v2, %v4561_v11  ;;  %v4817_v46 = vmul.f32 %v4753_v15, %v4561_v11  ;;  %vm4113_vm1 = vcmp.lt.f32.partialorder %v4049_v48, 1.0  ;;  %v4241_v1 = vmul.f32 %v4177_v34, %v3985_v8  ;;  %v10040_v53 = vpop.eup %6488 }
 0x48c   :  { %v5759_v60 = vadd.f32 -0.5, %v4049_v48  ;;  %v4945_v56 = vsub.f32 1.0, %v4561_v11  ;;  %v5204_v18 = vadd.f32 %v9983_v55, %v4432_v38  ;;  %v5273_v51 = vadd.f32 %v9979_v59, %v4688_v10 }
 0x48d   :  { %v4689_v22 = vmul.f32 %v4625_v17, %v7127_v32  ;;  %v4881_v26 = vmul.f32 %v4817_v46, %v7127_v32  ;;  %v5342_v36 = vadd.f32 %v9986_v50, %v4880_v28  ;;  %v3765_v25 = vadd.f32 1.0, %v3764_v52 }
 0x48e   :  { %v4369_v27 = vsel %vm4113_vm1, %v4241_v1, %v5759_v60  ;;  %v5009_v62 = vmul.f32 %v5695_v2, %v4945_v56  ;;  %v5411_v21 = vadd.f32 %v9995_v30, %v5072_v58  ;;  %v2248_v9 = vadd.f32 %v9659_v23, %v9600_v41 }
 0x48f   :  { %v4433_v54 = vmul.f32 %v4369_v27, %v7148_v49  ;;  %v10052_v4 = vadd.f32 %v5273_v51, %v4689_v22  ;;  %v10054_v24 = vadd.f32 %v5342_v36, %v4881_v26  ;;  %v3788_v55 = vadd.f32 1.0, %v10034_v13 }
 0x490   :  { %v5073_v12 = vmul.f32 %v5009_v62, %v7127_v32  ;;  %v10058_v59 = vmul.f32 %v4179_v47, %v9991_v33  ;;  %vm2644_vm4 = vcmp.gt.f32.partialorder %v2248_v9, 0.0  ;;  %v3791_v10 = vmul.f32 -0.5, %v10034_v13 }
 0x491   :  { %v10060_v50 = vadd.f32 %v5204_v18, %v4433_v54  ;;  %v5698_v41 = vsel %vm2644_vm4, 1.0, %v10360_v37  ;;  %6492 = vlog2.f32 %v3788_v55  ;;  %v3988_v38 = vsub.f32 %v8768_v57, %v2248_v9 }
 0x492   :  { %v10063_v30 = vadd.f32 %v5411_v21, %v5073_v12  ;;  %v10067_v58 = vadd.f32 -0.5, %v4051_v35  ;;  %v2836_v2 = vmax.f32 %v8768_v57, 0.0  ;;  %v2900_v33 = vmul.f32 %v5698_v41, %v8768_v57 }
 0x493   :  { %v6491_v28 = vpop.eup %6490  ;;  %vm4500_vm7 = vcmp.gt.f32.partialorder %v8768_v57, 0.0  ;;  %v3766_v3 = vmul.f32 %v9944_v19, %v3765_v25  ;;  %vm3768_vm8 = vcmp.lt.f32.partialorder %v3767_v63, 0.0004427343  ;;  %v3794_v44 = vand.u32 2147483647, %v10034_v13 }
 0x494   :  { %v3763_v14 = vmul.f32 0.6931472, %v6491_v28  ;;  %v4564_v42 = vsel %vm4500_vm7, 1.0, %v10360_v37  ;;  %v2964_v40 = vsub.f32 %v2836_v2, %v2900_v33  ;;  %v4756_v61 = vsub.f32 1.0, %v5698_v41 }
 0x495   :  { %v4628_v45 = vmul.f32 %v5698_v41, %v4564_v42  ;;  %vm10075_vm3 = vcmp.lt.f32.partialorder %v4051_v35, 1.0  ;;  %v3792_v8 = vadd.f32 1.0, %v3791_v10  ;;  %v4180_v15 = vmul.f32 0.5, %v3988_v38 }
 0x496   :  { %v3769_v6 = vsel %vm3768_vm8, %v3766_v3, %v3763_v14  ;;  %v4052_v57 = vand.u32 2147483647, %v3988_v38  ;;  %v4820_v48 = vmul.f32 %v4756_v61, %v4564_v42  ;;  %v4948_v34 = vsub.f32 1.0, %v4564_v42 }
 0x497   :  { %v3857_v47 = vadd.f32 %v3769_v6, %v2961_v0  ;;  %v4691_v19 = vmul.f32 %v10004_v5, %v7127_v32  ;;  %v2240_v11 = vadd.f32 %v9659_v23, %v9634_v43  ;;  %v3770_v52 = vadd.f32 1.0, %v10040_v53 }
 0x498   :  { %v4371_v35 = vsel %vm10075_vm3, %v10058_v59, %v10067_v58  ;;  %vm10089_vm10 = vcmp.lt.f32.partialorder %v3794_v44, 0.0004427343  ;;  %v5012_v17 = vmul.f32 %v5698_v41, %v4948_v34  ;;  %v3793_v46 = vmul.f32 %v10034_v13, %v3792_v8 }
 0x499   :  { %v3921_v63 = vmul.f32 %v3857_v47, %v7127_v32  ;;  %v4244_v5 = vmul.f32 %v4180_v15, %v3988_v38  ;;  %vm2642_vm5 = vcmp.gt.f32.partialorder %v2240_v11, 0.0  ;;  %6494 = vlog2.f32 %v3770_v52 }
 0x49a   :  { %v5762_v23 = vadd.f32 -0.5, %v4052_v57  ;;  %v5696_v1 = vsel %vm2642_vm5, 1.0, %v10360_v37  ;;  %v3986_v60 = vsub.f32 %v9026_v16, %v2240_v11  ;;  %v2834_v22 = vmax.f32 %v9026_v16, 0.0 }
 0x49b   :  { %v10094_v43 = vadd.f32 %v5135_v7, %v3921_v63  ;;  %v6493_v56 = vpop.eup %6492  ;;  %v2898_v26 = vmul.f32 %v5696_v1, %v9026_v16  ;;  %v3773_v18 = vmul.f32 -0.5, %v10040_v53  ;;  %vm4498_vm9 = vcmp.gt.f32.partialorder %v9026_v16, 0.0 }
 0x49c   :  { %v3790_v13 = vmul.f32 0.6931472, %v6493_v56  ;;  %v4050_v27 = vand.u32 2147483647, %v3986_v60  ;;  %v4178_v62 = vmul.f32 0.5, %v3986_v60  ;;  %v4562_v7 = vsel %vm4498_vm9, 1.0, %v10360_v37 }
 0x49d   :  { %vm10103_vm12 = vcmp.lt.f32.partialorder %v4052_v57, 1.0  ;;  %v2962_v36 = vsub.f32 %v2834_v22, %v2898_v26  ;;  %v4626_v25 = vmul.f32 %v5696_v1, %v4562_v7  ;;  %v4754_v54 = vsub.f32 1.0, %v5696_v1 }
 0x49e   :  { %v3796_v21 = vsel %vm10089_vm10, %v3793_v46, %v3790_v13  ;;  %vm4114_vm11 = vcmp.lt.f32.partialorder %v4050_v27, 1.0  ;;  %v4242_v9 = vmul.f32 %v4178_v62, %v3986_v60  ;;  %v5760_v12 = vadd.f32 -0.5, %v4050_v27 }
 0x49f   :  { %v3860_v55 = vadd.f32 %v3796_v21, %v2964_v40  ;;  %v4690_v16 = vmul.f32 %v4626_v25, %v7127_v32  ;;  %v4818_v59 = vmul.f32 %v4754_v54, %v4562_v7  ;;  %v4946_v10 = vsub.f32 1.0, %v4562_v7 }
 0x4a0   :  { %v4883_v37 = vmul.f32 %v10011_v31, %v7127_v32  ;;  %v4372_v41 = vsel %vm10103_vm12, %v4244_v5, %v5762_v23  ;;  %v3774_v38 = vadd.f32 1.0, %v3773_v18  ;;  %v4370_v28 = vsel %vm4114_vm11, %v4242_v9, %v5760_v12 }
 0x4a1   :  { %v3776_v58 = vand.u32 2147483647, %v10040_v53  ;;  %v4434_v2 = vmul.f32 %v4370_v28, %v7148_v49  ;;  %v4882_v33 = vmul.f32 %v4818_v59, %v7127_v32  ;;  %v5010_v14 = vmul.f32 %v5696_v1, %v4946_v10 }
 0x4a2   :  { %v4435_v3 = vmul.f32 %v4371_v35, %v7148_v49  ;;  %v5075_v42 = vmul.f32 %v10016_v29, %v7127_v32  ;;  %v4692_v40 = vmul.f32 %v4628_v45, %v7127_v32  ;;  %v5275_v31 = vadd.f32 %v10052_v4, %v4690_v16 }
 0x4a3   :  { %v6495_v44 = vpop.eup %6494  ;;  %v4436_v61 = vmul.f32 %v4372_v41, %v7148_v49  ;;  %v5074_v20 = vmul.f32 %v5010_v14, %v7127_v32  ;;  %v5206_v6 = vadd.f32 %v10060_v50, %v4434_v2  ;;  %v5344_v8 = vadd.f32 %v10054_v24, %v4882_v33 }
 0x4a4   :  { %v4884_v15 = vmul.f32 %v4820_v48, %v7127_v32  ;;  %v3772_v47 = vmul.f32 0.6931472, %v6495_v44  ;;  %v3775_v57 = vmul.f32 %v10040_v53, %v3774_v38  ;;  %v5276_v34 = vadd.f32 %v5275_v31, %v4691_v19 }
 0x4a5   :  { %vm3777_vm14 = vcmp.lt.f32.partialorder %v3776_v58, 0.0004427343  ;;  %v5207_v29 = vadd.f32 %v5206_v6, %v4435_v3  ;;  %v5345_v45 = vadd.f32 %v5344_v8, %v4883_v37  ;;  %v5413_v4 = vadd.f32 %v10063_v30, %v5074_v20 }
 0x4a6   :  { %v5076_v11 = vmul.f32 %v5012_v17, %v7127_v32  ;;  %v3778_v49 = vsel %vm3777_vm14, %v3775_v57, %v3772_v47  ;;  %v5277_v52 = vadd.f32 %v5276_v34, %v4692_v40  ;;  %v3923_v19 = vmul.f32 %v10031_v39, %v7127_v32 }
 0x4a7   :  { %v3858_v35 = vadd.f32 %v3778_v49, %v2962_v36  ;;  %v5208_v63 = vadd.f32 %v5207_v29, %v4436_v61  ;;  %v5346_v50 = vadd.f32 %v5345_v45, %v4884_v15  ;;  %v5414_v0 = vadd.f32 %v5413_v4, %v5075_v42 }
 0x4a8   :  { %v5278_v24 = vrot.slane %v5277_v52, 4  ;;  %v3924_v60 = vmul.f32 %v3860_v55, %v7127_v32  ;;  %vm5422_vm13 = vcmask 1040384   ;;  %vm5424_vm15 = vcmask 1041408  }
 0x4a9   :  { %v3922_v48 = vmul.f32 %v3858_v35, %v7127_v32  ;;  %v5209_v46 = vrot.slane %v5208_v63, 4  ;;  %v5347_v5 = vrot.slane %v5346_v50, 4  ;;  %v5415_v53 = vadd.f32 %v5414_v0, %v5076_v11 }
 0x4aa   :  { %v5279_v17 = vadd.f32 %v5278_v24, %v5277_v52  ;;  %vm5426_vm0 = vcmask 1042432   ;;  %vm5428_vm2 = vcmask 1043456   ;;  %vm5430_vm6 = vcmask 1044480  }
 0x4ab   :  { %v5137_v23 = vadd.f32 %v10094_v43, %v3922_v48  ;;  %v5210_v30 = vadd.f32 %v5209_v46, %v5208_v63  ;;  %v5416_v1 = vrot.slane %v5415_v53, 4  ;;  %v5348_v26 = vadd.f32 %v5347_v5, %v5346_v50 }
 0x4ac   :  { %v5280_v27 = vrot.slane %v5279_v17, 2 }
 0x4ad   :  { %v5138_v56 = vadd.f32 %v5137_v23, %v3923_v19  ;;  %v5211_v22 = vrot.slane %v5210_v30, 2  ;;  %v5417_v18 = vadd.f32 %v5416_v1, %v5415_v53  ;;  %v5349_v51 = vrot.slane %v5348_v26, 2 }
 0x4ae   :  { %v5281_v54 = vadd.f32 %v5280_v27, %v5279_v17 }
 0x4af   :  { %v5139_v13 = vadd.f32 %v5138_v56, %v3924_v60  ;;  %v5212_v7 = vadd.f32 %v5211_v22, %v5210_v30  ;;  %v5418_v36 = vrot.slane %v5417_v18, 2  ;;  %v5350_v43 = vadd.f32 %v5349_v51, %v5348_v26 }
 0x4b0   :  { %v5282_v16 = vrot.slane %v5281_v54, 1 }
 0x4b1   :  { %v5140_v62 = vrot.slane %v5139_v13, 4  ;;  %v5213_v21 = vrot.slane %v5212_v7, 1  ;;  %v5419_v9 = vadd.f32 %v5418_v36, %v5417_v18  ;;  %v5351_v55 = vrot.slane %v5350_v43, 1 }
 0x4b2   :  { %v5283_v41 = vadd.f32 %v5282_v16, %v5281_v54 }
 0x4b3   :  { %v5141_v25 = vadd.f32 %v5140_v62, %v5139_v13  ;;  %v5214_v32 = vadd.f32 %v5213_v21, %v5212_v7  ;;  %v5420_v10 = vrot.slane %v5419_v9, 1  ;;  %v5352_v38 = vadd.f32 %v5351_v55, %v5350_v43 }
 0x4b5   :  { %v5142_v39 = vrot.slane %v5141_v25, 2  ;;  %v5421_v58 = vadd.f32 %v5420_v10, %v5419_v9 }
 0x4b7   :  { %v5143_v12 = vadd.f32 %v5142_v39, %v5141_v25 }
 0x4b9   :  { %v5144_v59 = vrot.slane %v5143_v12, 1 }
 0x4bb   :  { %v5145_v37 = vadd.f32 %v5144_v59, %v5143_v12 }
 0x4bd   :  { %v5423_v28 = vsel %vm5422_vm13, %v5145_v37, %v5214_v32 }
 0x4be   :  { %v5425_v2 = vsel %vm5424_vm15, %v5423_v28, %v5283_v41 }
 0x4bf   :  { %v5427_v33 = vsel %vm5426_vm0, %v5425_v2, %v5352_v38 }
 0x4c0   :  { %v5429_v14 = vsel %vm5428_vm2, %v5427_v33, %v5421_v58 }
 0x4c1   :  { %v5431_v3 = vsel %vm5430_vm6, %v5429_v14, 0.0 }
 0x4c2   :  { %5432 = vst [vmem:[%s10144_s6] sm:$0xff] %v5431_v3 }

</bundles_post_ra>
